<compile_context>
chip_gen: v5e
topology: v5e:2x2
jax: 0.10.0
libtpu: 0.0.40
codegen_flags: <defaults>
</compile_context>

<pallas_src>
import math

import jax
import jax.numpy as jnp
from jax.experimental import pallas as pl
from jax.experimental.pallas import tpu as pltpu


def _round_up(n, m):
    return ((n + m - 1) // m) * m


def _layer_norm(x, g, b, eps=1e-5):
    mu = jnp.mean(x, axis=-1, keepdims=True)
    var = jnp.mean((x - mu) ** 2, axis=-1, keepdims=True)
    return (x - mu) * jax.lax.rsqrt(var + eps) * g + b


# -----------------------------------------------------------------------------
# Kernel
# -----------------------------------------------------------------------------
def emotion_transformer_kernel(
    x_ref,       # (block_b, IN_PAD)  f32
    w_emb_ref,   # (IN_PAD, D)        compute dtype (bf16)
    wv_ref,      # (L, D, D)
    wo_ref,      # (L, D, D)
    w1_ref,      # (L, D, F)
    w2_ref,      # (L, F, D)
    w_cls_ref,   # (D, NPAD)
    glob_ref,    # (8, max(D, NPAD))  f32: rows [pe, b_emb, b_cls, 0...]
    layer_ref,   # (L, 8, max(D, F))  f32: rows [bv, bo, g1, b1n, b2, g2, b2n, b1ff]
    out_ref,     # (block_b, NPAD)    f32
):
    f32 = jnp.float32
    cdt = w_emb_ref.dtype                     # matmul compute dtype (bf16 or f32)
    D = wv_ref.shape[-1]
    F = w1_ref.shape[-1]
    NPAD = w_cls_ref.shape[-1]
    L = wv_ref.shape[0]

    gv = glob_ref[...]                        # (8, WG) f32
    pe = gv[0:1, :D]
    b_emb = gv[1:2, :D]
    b_cls = gv[2:3, :NPAD]

    # nn.Linear embedding (+ embedding_dropout == identity at inference)
    # + positional encoding for sequence position 0.
    x = x_ref[...].astype(cdt)
    h = jnp.dot(x, w_emb_ref[...], preferred_element_type=f32) + b_emb + pe

    for l in range(L):
        lv = layer_ref[l]                     # (8, WL) f32
        bv, bo = lv[0:1, :D], lv[1:2, :D]
        g1, bn1 = lv[2:3, :D], lv[3:4, :D]
        b2, g2, bn2 = lv[4:5, :D], lv[5:6, :D], lv[6:7, :D]
        b1 = lv[7:8, :F]

        # nn.MultiheadAttention with a length-1 sequence: softmax over a single
        # key is exactly 1 for every head, so attn_output == out_proj(v_proj(h)).
        v = jnp.dot(h.astype(cdt), wv_ref[l], preferred_element_type=f32) + bv
        attn = jnp.dot(v.astype(cdt), wo_ref[l], preferred_element_type=f32) + bo
        h = _layer_norm(h + attn, g1, bn1)

        # feed-forward: Linear -> ReLU -> Linear
        ff = jnp.dot(h.astype(cdt), w1_ref[l], preferred_element_type=f32) + b1
        ff = jnp.maximum(ff, 0.0)
        ff = jnp.dot(ff.astype(cdt), w2_ref[l], preferred_element_type=f32) + b2
        h = _layer_norm(h + ff, g2, bn2)

    # mean over length-1 seq dim is identity; lane-dense (NPAD-wide) classifier.
    out_ref[...] = (
        jnp.dot(h.astype(cdt), w_cls_ref[...], preferred_element_type=f32) + b_cls
    )


# -----------------------------------------------------------------------------
# Parameter packing (padding + dtype cast + small-tensor packing)
# -----------------------------------------------------------------------------
def pack_params(p, *, use_bf16=True):
    in_dim, D = p["w_emb"].shape
    L = p["wv"].shape[0]
    F = p["w1"].shape[-1]
    NC = p["w_cls"].shape[-1]
    IN_PAD = _round_up(in_dim, 128)
    NPAD = _round_up(NC, 128)
    WG = max(D, NPAD)
    WL = max(D, F)
    cdt = jnp.bfloat16 if use_bf16 else jnp.float32

    # zero-pad embedding rows / classifier columns to lane-dense widths.
    w_emb = jnp.zeros((IN_PAD, D), jnp.float32).at[:in_dim, :].set(p["w_emb"])
    w_cls = jnp.zeros((D, NPAD), jnp.float32).at[:, :NC].set(p["w_cls"])

    glob = jnp.zeros((8, WG), jnp.float32)
    glob = glob.at[0, :D].set(p["pe"].reshape(-1))
    glob = glob.at[1, :D].set(p["b_emb"].reshape(-1))
    glob = glob.at[2, :NC].set(p["b_cls"].reshape(-1))

    layer = jnp.zeros((L, 8, WL), jnp.float32)
    layer = layer.at[:, 0, :D].set(p["bv"].reshape(L, D))
    layer = layer.at[:, 1, :D].set(p["bo"].reshape(L, D))
    layer = layer.at[:, 2, :D].set(p["ln1_g"].reshape(L, D))
    layer = layer.at[:, 3, :D].set(p["ln1_b"].reshape(L, D))
    layer = layer.at[:, 4, :D].set(p["b2"].reshape(L, D))
    layer = layer.at[:, 5, :D].set(p["ln2_g"].reshape(L, D))
    layer = layer.at[:, 6, :D].set(p["ln2_b"].reshape(L, D))
    layer = layer.at[:, 7, :F].set(p["b1"].reshape(L, F))

    return dict(
        w_emb=w_emb.astype(cdt),
        wv=p["wv"].astype(cdt),
        wo=p["wo"].astype(cdt),
        w1=p["w1"].astype(cdt),
        w2=p["w2"].astype(cdt),
        w_cls=w_cls.astype(cdt),
        glob=glob,
        layer=layer,
        in_dim=in_dim,
        num_classes=NC,
    )


# -----------------------------------------------------------------------------
# Wrapper
# -----------------------------------------------------------------------------
_WEIGHT_KEYS = ("w_emb", "wv", "wo", "w1", "w2", "w_cls", "glob", "layer")


def emotion_transformer(x, packed, *, block_b=None, interpret=False):
    B, in_dim = x.shape
    assert in_dim == packed["in_dim"], (in_dim, packed["in_dim"])
    IN_PAD, D = packed["w_emb"].shape
    NPAD = packed["w_cls"].shape[-1]
    L = packed["wv"].shape[0]
    F = packed["w1"].shape[-1]
    NC = packed["num_classes"]

    # pad input features to a lane-dense multiple of 128 (aligned loads, full K).
    x = x.astype(jnp.float32)
    if IN_PAD != in_dim:
        x = jnp.pad(x, ((0, 0), (0, IN_PAD - in_dim)))

    # Batch tile: as large as possible (fills the 128/256-row MXU and amortizes
    # per-step overhead); for larger batches use >=2 grid steps so both v7x
    # TensorCores get work via dimension_semantics=("parallel",).
    if block_b is None:
        if B >= 32:
            block_b = min(256, _round_up(pl.cdiv(B, 2), 8))
        else:
            block_b = _round_up(max(B, 8), 8)
    grid = (pl.cdiv(B, block_b),)

    weights = [packed[k] for k in _WEIGHT_KEYS]

    def full_spec(a):
        nd = a.ndim
        return pl.BlockSpec(a.shape, lambda i, _nd=nd: (0,) * _nd)

    flops = 2 * B * (IN_PAD * D + L * (2 * D * D + 2 * D * F) + D * NPAD)
    bytes_accessed = int(
        x.size * x.dtype.itemsize
        + sum(int(w.size) * w.dtype.itemsize for w in weights)
        + B * NPAD * 4
    )
    cost = pl.CostEstimate(
        flops=flops, transcendentals=2 * B * L, bytes_accessed=bytes_accessed
    )

    out = pl.pallas_call(
        emotion_transformer_kernel,
        out_shape=jax.ShapeDtypeStruct((B, NPAD), jnp.float32),
        grid=grid,
        in_specs=[pl.BlockSpec((block_b, IN_PAD), lambda i: (i, 0))]
        + [full_spec(w) for w in weights],
        out_specs=pl.BlockSpec((block_b, NPAD), lambda i: (i, 0)),
        compiler_params=pltpu.CompilerParams(dimension_semantics=("parallel",)),
        cost_estimate=cost,
        interpret=interpret,
    )(x, *weights)
    return out[:, :NC]


# -----------------------------------------------------------------------------
# Parameter init (PyTorch-equivalent shapes; nn.Linear weights pre-transposed
# to (in_features, out_features) so the kernel does x @ W + b)
# -----------------------------------------------------------------------------
def init_params(key, input_size, embed_dim=128, num_heads=4, ff_dim=256,
                num_classes=7, num_layers=4):
    del num_heads  # only the v/out projections matter for a length-1 sequence
    ks = jax.random.split(key, 12)

    def lin(k, fan_in, shape):
        bound = 1.0 / math.sqrt(fan_in)
        return jax.random.uniform(k, shape, jnp.float32, -bound, bound)

    # PositionalEncoding row 0: sin(0)=0 on even dims, cos(0)=1 on odd dims.
    pe0 = jnp.zeros((embed_dim,), jnp.float32).at[1::2].set(1.0)[None, :]

    L, D, F = num_layers, embed_dim, ff_dim
    return dict(
        pe=pe0,
        w_emb=lin(ks[0], input_size, (input_size, D)),
        b_emb=lin(ks[1], input_size, (1, D)),
        # Only the v-slice of MultiheadAttention's in_proj matters for seq_len=1.
        wv=lin(ks[2], D, (L, D, D)),
        bv=lin(ks[3], D, (L, 1, D)),
        wo=lin(ks[4], D, (L, D, D)),
        bo=lin(ks[5], D, (L, 1, D)),
        ln1_g=jnp.ones((L, 1, D), jnp.float32),
        ln1_b=jnp.zeros((L, 1, D), jnp.float32),
        w1=lin(ks[6], D, (L, D, F)),
        b1=lin(ks[7], D, (L, 1, F)),
        w2=lin(ks[8], F, (L, F, D)),
        b2=lin(ks[9], F, (L, 1, D)),
        ln2_g=jnp.ones((L, 1, D), jnp.float32),
        ln2_b=jnp.zeros((L, 1, D), jnp.float32),
        w_cls=lin(ks[10], D, (D, num_classes)),
        b_cls=lin(ks[11], D, (1, num_classes)),
    )


def reference(x, p, *, compute_dtype=jnp.float32):
    """Pure-JAX reference mirroring the PyTorch forward (inference mode).

    `compute_dtype` mimics the kernel's matmul-operand cast (bf16) with f32
    accumulation; everything else stays f32.
    """
    def dot(a, w):
        return jnp.dot(a.astype(compute_dtype), w.astype(compute_dtype),
                       preferred_element_type=jnp.float32)

    h = dot(x, p["w_emb"]) + p["b_emb"] + p["pe"]
    for l in range(p["wv"].shape[0]):
        v = dot(h, p["wv"][l]) + p["bv"][l]
        attn = dot(v, p["wo"][l]) + p["bo"][l]
        h = _layer_norm(h + attn, p["ln1_g"][l], p["ln1_b"][l])
        ff = jnp.maximum(dot(h, p["w1"][l]) + p["b1"][l], 0.0)
        ff = dot(ff, p["w2"][l]) + p["b2"][l]
        h = _layer_norm(h + ff, p["ln2_g"][l], p["ln2_b"][l])
    return dot(h, p["w_cls"]) + p["b_cls"]


if __name__ == "__main__":
    key = jax.random.PRNGKey(0)
    kx, kp = jax.random.split(key)

    # Small, module-consistent shapes; input_size=48 exercises the feature-dim
    # padding (48 -> 128) and B=64 gives a 2-step parallel grid (block_b=32).
    B, input_size = 64, 48
    x = jax.random.normal(kx, (B, input_size), dtype=jnp.float32)
    params = init_params(kp, input_size)

    packed = pack_params(params, use_bf16=True)
    out = emotion_transformer(x, packed)
    jax.block_until_ready(out)

    ref = reference(x, params, compute_dtype=jnp.bfloat16)
    assert out.shape == (B, 7), out.shape
    err = float(jnp.max(jnp.abs(out - ref)))
    assert err < 2e-2, err
    print("KERNEL_OK")
</pallas_src>

<mosaic_0001>
module attributes {stable_mosaic.version = 11 : i64} {
  func.func @emotion_transformer_kernel(%arg0: i32, %arg1: memref<32x128xf32, #tpu.memory_space<vmem>>, %arg2: memref<128x128xbf16, #tpu.memory_space<vmem>>, %arg3: memref<4x128x128xbf16, #tpu.memory_space<vmem>>, %arg4: memref<4x128x128xbf16, #tpu.memory_space<vmem>>, %arg5: memref<4x128x256xbf16, #tpu.memory_space<vmem>>, %arg6: memref<4x256x128xbf16, #tpu.memory_space<vmem>>, %arg7: memref<128x128xbf16, #tpu.memory_space<vmem>>, %arg8: memref<8x128xf32, #tpu.memory_space<vmem>>, %arg9: memref<4x8x256xf32, #tpu.memory_space<vmem>>, %arg10: memref<32x128xf32, #tpu.memory_space<vmem>>) attributes {dimension_semantics = [#tpu.dimension_semantics<parallel>], iteration_bounds = array<i64: 2>, scalar_prefetch = 0 : i64, scratch_operands = 0 : i64, tpu.core_type = #tpu.core_type<tc>, window_params = [{transform_indices = @transform_0, window_bounds = array<i64: 32, 128>}, {pipeline_mode = #tpu.pipeline_mode<synchronous>, transform_indices = @transform_1, window_bounds = array<i64: 128, 128>}, {pipeline_mode = #tpu.pipeline_mode<synchronous>, transform_indices = @transform_2, window_bounds = array<i64: 4, 128, 128>}, {pipeline_mode = #tpu.pipeline_mode<synchronous>, transform_indices = @transform_3, window_bounds = array<i64: 4, 128, 128>}, {pipeline_mode = #tpu.pipeline_mode<synchronous>, transform_indices = @transform_4, window_bounds = array<i64: 4, 128, 256>}, {pipeline_mode = #tpu.pipeline_mode<synchronous>, transform_indices = @transform_5, window_bounds = array<i64: 4, 256, 128>}, {pipeline_mode = #tpu.pipeline_mode<synchronous>, transform_indices = @transform_6, window_bounds = array<i64: 128, 128>}, {pipeline_mode = #tpu.pipeline_mode<synchronous>, transform_indices = @transform_7, window_bounds = array<i64: 8, 128>}, {pipeline_mode = #tpu.pipeline_mode<synchronous>, transform_indices = @transform_8, window_bounds = array<i64: 4, 8, 256>}, {transform_indices = @transform_9, window_bounds = array<i64: 32, 128>}]} {
    %c0 = arith.constant 0 : index
    %c0_0 = arith.constant 0 : index
    %0 = vector.load %arg8[%c0, %c0_0] : memref<8x128xf32, #tpu.memory_space<vmem>>, vector<8x128xf32>
    %1 = vector.extract_strided_slice %0 {offsets = [0, 0], sizes = [1, 128], strides = [1, 1]} : vector<8x128xf32> to vector<1x128xf32>
    %2 = vector.extract_strided_slice %0 {offsets = [1, 0], sizes = [1, 128], strides = [1, 1]} : vector<8x128xf32> to vector<1x128xf32>
    %3 = vector.extract_strided_slice %0 {offsets = [2, 0], sizes = [1, 128], strides = [1, 1]} : vector<8x128xf32> to vector<1x128xf32>
    %c0_1 = arith.constant 0 : index
    %c0_2 = arith.constant 0 : index
    %4 = vector.load %arg1[%c0_1, %c0_2] : memref<32x128xf32, #tpu.memory_space<vmem>>, vector<32x128xf32>
    %5 = arith.truncf %4 : vector<32x128xf32> to vector<32x128xbf16>
    %c0_3 = arith.constant 0 : index
    %c0_4 = arith.constant 0 : index
    %6 = vector.load %arg2[%c0_3, %c0_4] : memref<128x128xbf16, #tpu.memory_space<vmem>>, vector<128x128xbf16>
    %cst = arith.constant dense<0.000000e+00> : vector<32x128xf32>
    %7 = tpu.matmul %5, %6, %cst {dimension_numbers = #tpu.dot_dimension_numbers<[1], [0], [0], [1], [0, 0, 1, 1], [], []>} : vector<32x128xbf16>, vector<128x128xbf16>, vector<32x128xf32> -> vector<32x128xf32>
    %8 = vector.broadcast %2 : vector<1x128xf32> to vector<32x128xf32>
    %9 = arith.addf %7, %8 : vector<32x128xf32>
    %10 = vector.broadcast %1 : vector<1x128xf32> to vector<32x128xf32>
    %11 = arith.addf %9, %10 : vector<32x128xf32>
    %c0_5 = arith.constant 0 : index
    %c0_6 = arith.constant 0 : index
    %c0_7 = arith.constant 0 : index
    %12 = vector.load %arg9[%c0_5, %c0_6, %c0_7] : memref<4x8x256xf32, #tpu.memory_space<vmem>>, vector<1x8x256xf32>
    %13 = vector.shape_cast %12 : vector<1x8x256xf32> to vector<8x256xf32>
    %14 = vector.extract_strided_slice %13 {offsets = [0, 0], sizes = [1, 128], strides = [1, 1]} : vector<8x256xf32> to vector<1x128xf32>
    %15 = vector.extract_strided_slice %13 {offsets = [1, 0], sizes = [1, 128], strides = [1, 1]} : vector<8x256xf32> to vector<1x128xf32>
    %16 = vector.extract_strided_slice %13 {offsets = [2, 0], sizes = [1, 128], strides = [1, 1]} : vector<8x256xf32> to vector<1x128xf32>
    %17 = vector.extract_strided_slice %13 {offsets = [3, 0], sizes = [1, 128], strides = [1, 1]} : vector<8x256xf32> to vector<1x128xf32>
    %18 = vector.extract_strided_slice %13 {offsets = [4, 0], sizes = [1, 128], strides = [1, 1]} : vector<8x256xf32> to vector<1x128xf32>
    %19 = vector.extract_strided_slice %13 {offsets = [5, 0], sizes = [1, 128], strides = [1, 1]} : vector<8x256xf32> to vector<1x128xf32>
    %20 = vector.extract_strided_slice %13 {offsets = [6, 0], sizes = [1, 128], strides = [1, 1]} : vector<8x256xf32> to vector<1x128xf32>
    %21 = vector.extract_strided_slice %13 {offsets = [7, 0], sizes = [1, 256], strides = [1, 1]} : vector<8x256xf32> to vector<1x256xf32>
    %22 = arith.truncf %11 : vector<32x128xf32> to vector<32x128xbf16>
    %c0_8 = arith.constant 0 : index
    %c0_9 = arith.constant 0 : index
    %c0_10 = arith.constant 0 : index
    %23 = vector.load %arg3[%c0_8, %c0_9, %c0_10] : memref<4x128x128xbf16, #tpu.memory_space<vmem>>, vector<1x128x128xbf16>
    %24 = vector.shape_cast %23 : vector<1x128x128xbf16> to vector<128x128xbf16>
    %cst_11 = arith.constant dense<0.000000e+00> : vector<32x128xf32>
    %25 = tpu.matmul %22, %24, %cst_11 {dimension_numbers = #tpu.dot_dimension_numbers<[1], [0], [0], [1], [0, 0, 1, 1], [], []>} : vector<32x128xbf16>, vector<128x128xbf16>, vector<32x128xf32> -> vector<32x128xf32>
    %26 = vector.broadcast %14 : vector<1x128xf32> to vector<32x128xf32>
    %27 = arith.addf %25, %26 : vector<32x128xf32>
    %28 = arith.truncf %27 : vector<32x128xf32> to vector<32x128xbf16>
    %c0_12 = arith.constant 0 : index
    %c0_13 = arith.constant 0 : index
    %c0_14 = arith.constant 0 : index
    %29 = vector.load %arg4[%c0_12, %c0_13, %c0_14] : memref<4x128x128xbf16, #tpu.memory_space<vmem>>, vector<1x128x128xbf16>
    %30 = vector.shape_cast %29 : vector<1x128x128xbf16> to vector<128x128xbf16>
    %cst_15 = arith.constant dense<0.000000e+00> : vector<32x128xf32>
    %31 = tpu.matmul %28, %30, %cst_15 {dimension_numbers = #tpu.dot_dimension_numbers<[1], [0], [0], [1], [0, 0, 1, 1], [], []>} : vector<32x128xbf16>, vector<128x128xbf16>, vector<32x128xf32> -> vector<32x128xf32>
    %32 = vector.broadcast %15 : vector<1x128xf32> to vector<32x128xf32>
    %33 = arith.addf %31, %32 : vector<32x128xf32>
    %34 = arith.addf %11, %33 : vector<32x128xf32>
    %cst_16 = arith.constant dense<0.000000e+00> : vector<32xf32>
    %35 = vector.multi_reduction <add>, %34, %cst_16 [1] : vector<32x128xf32> to vector<32xf32>
    %36 = vector.shape_cast %35 : vector<32xf32> to vector<32x1xf32>
    %cst_17 = arith.constant 1.280000e+02 : f32
    %37 = vector.broadcast %cst_17 : f32 to vector<32x1xf32>
    %38 = arith.divf %36, %37 : vector<32x1xf32>
    %39 = vector.broadcast %38 : vector<32x1xf32> to vector<32x128xf32>
    %40 = arith.subf %34, %39 : vector<32x128xf32>
    %41 = arith.mulf %40, %40 : vector<32x128xf32>
    %cst_18 = arith.constant dense<0.000000e+00> : vector<32xf32>
    %42 = vector.multi_reduction <add>, %41, %cst_18 [1] : vector<32x128xf32> to vector<32xf32>
    %43 = vector.shape_cast %42 : vector<32xf32> to vector<32x1xf32>
    %cst_19 = arith.constant 1.280000e+02 : f32
    %44 = vector.broadcast %cst_19 : f32 to vector<32x1xf32>
    %45 = arith.divf %43, %44 : vector<32x1xf32>
    %46 = vector.broadcast %38 : vector<32x1xf32> to vector<32x128xf32>
    %47 = arith.subf %34, %46 : vector<32x128xf32>
    %cst_20 = arith.constant 9.99999974E-6 : f32
    %48 = vector.broadcast %cst_20 : f32 to vector<32x1xf32>
    %49 = arith.addf %45, %48 : vector<32x1xf32>
    %50 = math.rsqrt %49 : vector<32x1xf32>
    %51 = vector.broadcast %50 : vector<32x1xf32> to vector<32x128xf32>
    %52 = arith.mulf %47, %51 : vector<32x128xf32>
    %53 = vector.broadcast %16 : vector<1x128xf32> to vector<32x128xf32>
    %54 = arith.mulf %52, %53 : vector<32x128xf32>
    %55 = vector.broadcast %17 : vector<1x128xf32> to vector<32x128xf32>
    %56 = arith.addf %54, %55 : vector<32x128xf32>
    %57 = arith.truncf %56 : vector<32x128xf32> to vector<32x128xbf16>
    %c0_21 = arith.constant 0 : index
    %c0_22 = arith.constant 0 : index
    %c0_23 = arith.constant 0 : index
    %58 = vector.load %arg5[%c0_21, %c0_22, %c0_23] : memref<4x128x256xbf16, #tpu.memory_space<vmem>>, vector<1x128x256xbf16>
    %59 = vector.shape_cast %58 : vector<1x128x256xbf16> to vector<128x256xbf16>
    %cst_24 = arith.constant dense<0.000000e+00> : vector<32x256xf32>
    %60 = tpu.matmul %57, %59, %cst_24 {dimension_numbers = #tpu.dot_dimension_numbers<[1], [0], [0], [1], [0, 0, 1, 1], [], []>} : vector<32x128xbf16>, vector<128x256xbf16>, vector<32x256xf32> -> vector<32x256xf32>
    %61 = vector.broadcast %21 : vector<1x256xf32> to vector<32x256xf32>
    %62 = arith.addf %60, %61 : vector<32x256xf32>
    %cst_25 = arith.constant 0.000000e+00 : f32
    %63 = vector.broadcast %cst_25 : f32 to vector<32x256xf32>
    %64 = arith.maximumf %62, %63 : vector<32x256xf32>
    %65 = arith.truncf %64 : vector<32x256xf32> to vector<32x256xbf16>
    %c0_26 = arith.constant 0 : index
    %c0_27 = arith.constant 0 : index
    %c0_28 = arith.constant 0 : index
    %66 = vector.load %arg6[%c0_26, %c0_27, %c0_28] : memref<4x256x128xbf16, #tpu.memory_space<vmem>>, vector<1x256x128xbf16>
    %67 = vector.shape_cast %66 : vector<1x256x128xbf16> to vector<256x128xbf16>
    %cst_29 = arith.constant dense<0.000000e+00> : vector<32x128xf32>
    %68 = tpu.matmul %65, %67, %cst_29 {dimension_numbers = #tpu.dot_dimension_numbers<[1], [0], [0], [1], [0, 0, 1, 1], [], []>} : vector<32x256xbf16>, vector<256x128xbf16>, vector<32x128xf32> -> vector<32x128xf32>
    %69 = vector.broadcast %18 : vector<1x128xf32> to vector<32x128xf32>
    %70 = arith.addf %68, %69 : vector<32x128xf32>
    %71 = arith.addf %56, %70 : vector<32x128xf32>
    %cst_30 = arith.constant dense<0.000000e+00> : vector<32xf32>
    %72 = vector.multi_reduction <add>, %71, %cst_30 [1] : vector<32x128xf32> to vector<32xf32>
    %73 = vector.shape_cast %72 : vector<32xf32> to vector<32x1xf32>
    %cst_31 = arith.constant 1.280000e+02 : f32
    %74 = vector.broadcast %cst_31 : f32 to vector<32x1xf32>
    %75 = arith.divf %73, %74 : vector<32x1xf32>
    %76 = vector.broadcast %75 : vector<32x1xf32> to vector<32x128xf32>
    %77 = arith.subf %71, %76 : vector<32x128xf32>
    %78 = arith.mulf %77, %77 : vector<32x128xf32>
    %cst_32 = arith.constant dense<0.000000e+00> : vector<32xf32>
    %79 = vector.multi_reduction <add>, %78, %cst_32 [1] : vector<32x128xf32> to vector<32xf32>
    %80 = vector.shape_cast %79 : vector<32xf32> to vector<32x1xf32>
    %cst_33 = arith.constant 1.280000e+02 : f32
    %81 = vector.broadcast %cst_33 : f32 to vector<32x1xf32>
    %82 = arith.divf %80, %81 : vector<32x1xf32>
    %83 = vector.broadcast %75 : vector<32x1xf32> to vector<32x128xf32>
    %84 = arith.subf %71, %83 : vector<32x128xf32>
    %cst_34 = arith.constant 9.99999974E-6 : f32
    %85 = vector.broadcast %cst_34 : f32 to vector<32x1xf32>
    %86 = arith.addf %82, %85 : vector<32x1xf32>
    %87 = math.rsqrt %86 : vector<32x1xf32>
    %88 = vector.broadcast %87 : vector<32x1xf32> to vector<32x128xf32>
    %89 = arith.mulf %84, %88 : vector<32x128xf32>
    %90 = vector.broadcast %19 : vector<1x128xf32> to vector<32x128xf32>
    %91 = arith.mulf %89, %90 : vector<32x128xf32>
    %92 = vector.broadcast %20 : vector<1x128xf32> to vector<32x128xf32>
    %93 = arith.addf %91, %92 : vector<32x128xf32>
    %c1 = arith.constant 1 : index
    %c0_35 = arith.constant 0 : index
    %c0_36 = arith.constant 0 : index
    %94 = vector.load %arg9[%c1, %c0_35, %c0_36] : memref<4x8x256xf32, #tpu.memory_space<vmem>>, vector<1x8x256xf32>
    %95 = vector.shape_cast %94 : vector<1x8x256xf32> to vector<8x256xf32>
    %96 = vector.extract_strided_slice %95 {offsets = [0, 0], sizes = [1, 128], strides = [1, 1]} : vector<8x256xf32> to vector<1x128xf32>
    %97 = vector.extract_strided_slice %95 {offsets = [1, 0], sizes = [1, 128], strides = [1, 1]} : vector<8x256xf32> to vector<1x128xf32>
    %98 = vector.extract_strided_slice %95 {offsets = [2, 0], sizes = [1, 128], strides = [1, 1]} : vector<8x256xf32> to vector<1x128xf32>
    %99 = vector.extract_strided_slice %95 {offsets = [3, 0], sizes = [1, 128], strides = [1, 1]} : vector<8x256xf32> to vector<1x128xf32>
    %100 = vector.extract_strided_slice %95 {offsets = [4, 0], sizes = [1, 128], strides = [1, 1]} : vector<8x256xf32> to vector<1x128xf32>
    %101 = vector.extract_strided_slice %95 {offsets = [5, 0], sizes = [1, 128], strides = [1, 1]} : vector<8x256xf32> to vector<1x128xf32>
    %102 = vector.extract_strided_slice %95 {offsets = [6, 0], sizes = [1, 128], strides = [1, 1]} : vector<8x256xf32> to vector<1x128xf32>
    %103 = vector.extract_strided_slice %95 {offsets = [7, 0], sizes = [1, 256], strides = [1, 1]} : vector<8x256xf32> to vector<1x256xf32>
    %104 = arith.truncf %93 : vector<32x128xf32> to vector<32x128xbf16>
    %c1_37 = arith.constant 1 : index
    %c0_38 = arith.constant 0 : index
    %c0_39 = arith.constant 0 : index
    %105 = vector.load %arg3[%c1_37, %c0_38, %c0_39] : memref<4x128x128xbf16, #tpu.memory_space<vmem>>, vector<1x128x128xbf16>
    %106 = vector.shape_cast %105 : vector<1x128x128xbf16> to vector<128x128xbf16>
    %cst_40 = arith.constant dense<0.000000e+00> : vector<32x128xf32>
    %107 = tpu.matmul %104, %106, %cst_40 {dimension_numbers = #tpu.dot_dimension_numbers<[1], [0], [0], [1], [0, 0, 1, 1], [], []>} : vector<32x128xbf16>, vector<128x128xbf16>, vector<32x128xf32> -> vector<32x128xf32>
    %108 = vector.broadcast %96 : vector<1x128xf32> to vector<32x128xf32>
    %109 = arith.addf %107, %108 : vector<32x128xf32>
    %110 = arith.truncf %109 : vector<32x128xf32> to vector<32x128xbf16>
    %c1_41 = arith.constant 1 : index
    %c0_42 = arith.constant 0 : index
    %c0_43 = arith.constant 0 : index
    %111 = vector.load %arg4[%c1_41, %c0_42, %c0_43] : memref<4x128x128xbf16, #tpu.memory_space<vmem>>, vector<1x128x128xbf16>
    %112 = vector.shape_cast %111 : vector<1x128x128xbf16> to vector<128x128xbf16>
    %cst_44 = arith.constant dense<0.000000e+00> : vector<32x128xf32>
    %113 = tpu.matmul %110, %112, %cst_44 {dimension_numbers = #tpu.dot_dimension_numbers<[1], [0], [0], [1], [0, 0, 1, 1], [], []>} : vector<32x128xbf16>, vector<128x128xbf16>, vector<32x128xf32> -> vector<32x128xf32>
    %114 = vector.broadcast %97 : vector<1x128xf32> to vector<32x128xf32>
    %115 = arith.addf %113, %114 : vector<32x128xf32>
    %116 = arith.addf %93, %115 : vector<32x128xf32>
    %cst_45 = arith.constant dense<0.000000e+00> : vector<32xf32>
    %117 = vector.multi_reduction <add>, %116, %cst_45 [1] : vector<32x128xf32> to vector<32xf32>
    %118 = vector.shape_cast %117 : vector<32xf32> to vector<32x1xf32>
    %cst_46 = arith.constant 1.280000e+02 : f32
    %119 = vector.broadcast %cst_46 : f32 to vector<32x1xf32>
    %120 = arith.divf %118, %119 : vector<32x1xf32>
    %121 = vector.broadcast %120 : vector<32x1xf32> to vector<32x128xf32>
    %122 = arith.subf %116, %121 : vector<32x128xf32>
    %123 = arith.mulf %122, %122 : vector<32x128xf32>
    %cst_47 = arith.constant dense<0.000000e+00> : vector<32xf32>
    %124 = vector.multi_reduction <add>, %123, %cst_47 [1] : vector<32x128xf32> to vector<32xf32>
    %125 = vector.shape_cast %124 : vector<32xf32> to vector<32x1xf32>
    %cst_48 = arith.constant 1.280000e+02 : f32
    %126 = vector.broadcast %cst_48 : f32 to vector<32x1xf32>
    %127 = arith.divf %125, %126 : vector<32x1xf32>
    %128 = vector.broadcast %120 : vector<32x1xf32> to vector<32x128xf32>
    %129 = arith.subf %116, %128 : vector<32x128xf32>
    %cst_49 = arith.constant 9.99999974E-6 : f32
    %130 = vector.broadcast %cst_49 : f32 to vector<32x1xf32>
    %131 = arith.addf %127, %130 : vector<32x1xf32>
    %132 = math.rsqrt %131 : vector<32x1xf32>
    %133 = vector.broadcast %132 : vector<32x1xf32> to vector<32x128xf32>
    %134 = arith.mulf %129, %133 : vector<32x128xf32>
    %135 = vector.broadcast %98 : vector<1x128xf32> to vector<32x128xf32>
    %136 = arith.mulf %134, %135 : vector<32x128xf32>
    %137 = vector.broadcast %99 : vector<1x128xf32> to vector<32x128xf32>
    %138 = arith.addf %136, %137 : vector<32x128xf32>
    %139 = arith.truncf %138 : vector<32x128xf32> to vector<32x128xbf16>
    %c1_50 = arith.constant 1 : index
    %c0_51 = arith.constant 0 : index
    %c0_52 = arith.constant 0 : index
    %140 = vector.load %arg5[%c1_50, %c0_51, %c0_52] : memref<4x128x256xbf16, #tpu.memory_space<vmem>>, vector<1x128x256xbf16>
    %141 = vector.shape_cast %140 : vector<1x128x256xbf16> to vector<128x256xbf16>
    %cst_53 = arith.constant dense<0.000000e+00> : vector<32x256xf32>
    %142 = tpu.matmul %139, %141, %cst_53 {dimension_numbers = #tpu.dot_dimension_numbers<[1], [0], [0], [1], [0, 0, 1, 1], [], []>} : vector<32x128xbf16>, vector<128x256xbf16>, vector<32x256xf32> -> vector<32x256xf32>
    %143 = vector.broadcast %103 : vector<1x256xf32> to vector<32x256xf32>
    %144 = arith.addf %142, %143 : vector<32x256xf32>
    %cst_54 = arith.constant 0.000000e+00 : f32
    %145 = vector.broadcast %cst_54 : f32 to vector<32x256xf32>
    %146 = arith.maximumf %144, %145 : vector<32x256xf32>
    %147 = arith.truncf %146 : vector<32x256xf32> to vector<32x256xbf16>
    %c1_55 = arith.constant 1 : index
    %c0_56 = arith.constant 0 : index
    %c0_57 = arith.constant 0 : index
    %148 = vector.load %arg6[%c1_55, %c0_56, %c0_57] : memref<4x256x128xbf16, #tpu.memory_space<vmem>>, vector<1x256x128xbf16>
    %149 = vector.shape_cast %148 : vector<1x256x128xbf16> to vector<256x128xbf16>
    %cst_58 = arith.constant dense<0.000000e+00> : vector<32x128xf32>
    %150 = tpu.matmul %147, %149, %cst_58 {dimension_numbers = #tpu.dot_dimension_numbers<[1], [0], [0], [1], [0, 0, 1, 1], [], []>} : vector<32x256xbf16>, vector<256x128xbf16>, vector<32x128xf32> -> vector<32x128xf32>
    %151 = vector.broadcast %100 : vector<1x128xf32> to vector<32x128xf32>
    %152 = arith.addf %150, %151 : vector<32x128xf32>
    %153 = arith.addf %138, %152 : vector<32x128xf32>
    %cst_59 = arith.constant dense<0.000000e+00> : vector<32xf32>
    %154 = vector.multi_reduction <add>, %153, %cst_59 [1] : vector<32x128xf32> to vector<32xf32>
    %155 = vector.shape_cast %154 : vector<32xf32> to vector<32x1xf32>
    %cst_60 = arith.constant 1.280000e+02 : f32
    %156 = vector.broadcast %cst_60 : f32 to vector<32x1xf32>
    %157 = arith.divf %155, %156 : vector<32x1xf32>
    %158 = vector.broadcast %157 : vector<32x1xf32> to vector<32x128xf32>
    %159 = arith.subf %153, %158 : vector<32x128xf32>
    %160 = arith.mulf %159, %159 : vector<32x128xf32>
    %cst_61 = arith.constant dense<0.000000e+00> : vector<32xf32>
    %161 = vector.multi_reduction <add>, %160, %cst_61 [1] : vector<32x128xf32> to vector<32xf32>
    %162 = vector.shape_cast %161 : vector<32xf32> to vector<32x1xf32>
    %cst_62 = arith.constant 1.280000e+02 : f32
    %163 = vector.broadcast %cst_62 : f32 to vector<32x1xf32>
    %164 = arith.divf %162, %163 : vector<32x1xf32>
    %165 = vector.broadcast %157 : vector<32x1xf32> to vector<32x128xf32>
    %166 = arith.subf %153, %165 : vector<32x128xf32>
    %cst_63 = arith.constant 9.99999974E-6 : f32
    %167 = vector.broadcast %cst_63 : f32 to vector<32x1xf32>
    %168 = arith.addf %164, %167 : vector<32x1xf32>
    %169 = math.rsqrt %168 : vector<32x1xf32>
    %170 = vector.broadcast %169 : vector<32x1xf32> to vector<32x128xf32>
    %171 = arith.mulf %166, %170 : vector<32x128xf32>
    %172 = vector.broadcast %101 : vector<1x128xf32> to vector<32x128xf32>
    %173 = arith.mulf %171, %172 : vector<32x128xf32>
    %174 = vector.broadcast %102 : vector<1x128xf32> to vector<32x128xf32>
    %175 = arith.addf %173, %174 : vector<32x128xf32>
    %c2 = arith.constant 2 : index
    %c0_64 = arith.constant 0 : index
    %c0_65 = arith.constant 0 : index
    %176 = vector.load %arg9[%c2, %c0_64, %c0_65] : memref<4x8x256xf32, #tpu.memory_space<vmem>>, vector<1x8x256xf32>
    %177 = vector.shape_cast %176 : vector<1x8x256xf32> to vector<8x256xf32>
    %178 = vector.extract_strided_slice %177 {offsets = [0, 0], sizes = [1, 128], strides = [1, 1]} : vector<8x256xf32> to vector<1x128xf32>
    %179 = vector.extract_strided_slice %177 {offsets = [1, 0], sizes = [1, 128], strides = [1, 1]} : vector<8x256xf32> to vector<1x128xf32>
    %180 = vector.extract_strided_slice %177 {offsets = [2, 0], sizes = [1, 128], strides = [1, 1]} : vector<8x256xf32> to vector<1x128xf32>
    %181 = vector.extract_strided_slice %177 {offsets = [3, 0], sizes = [1, 128], strides = [1, 1]} : vector<8x256xf32> to vector<1x128xf32>
    %182 = vector.extract_strided_slice %177 {offsets = [4, 0], sizes = [1, 128], strides = [1, 1]} : vector<8x256xf32> to vector<1x128xf32>
    %183 = vector.extract_strided_slice %177 {offsets = [5, 0], sizes = [1, 128], strides = [1, 1]} : vector<8x256xf32> to vector<1x128xf32>
    %184 = vector.extract_strided_slice %177 {offsets = [6, 0], sizes = [1, 128], strides = [1, 1]} : vector<8x256xf32> to vector<1x128xf32>
    %185 = vector.extract_strided_slice %177 {offsets = [7, 0], sizes = [1, 256], strides = [1, 1]} : vector<8x256xf32> to vector<1x256xf32>
    %186 = arith.truncf %175 : vector<32x128xf32> to vector<32x128xbf16>
    %c2_66 = arith.constant 2 : index
    %c0_67 = arith.constant 0 : index
    %c0_68 = arith.constant 0 : index
    %187 = vector.load %arg3[%c2_66, %c0_67, %c0_68] : memref<4x128x128xbf16, #tpu.memory_space<vmem>>, vector<1x128x128xbf16>
    %188 = vector.shape_cast %187 : vector<1x128x128xbf16> to vector<128x128xbf16>
    %cst_69 = arith.constant dense<0.000000e+00> : vector<32x128xf32>
    %189 = tpu.matmul %186, %188, %cst_69 {dimension_numbers = #tpu.dot_dimension_numbers<[1], [0], [0], [1], [0, 0, 1, 1], [], []>} : vector<32x128xbf16>, vector<128x128xbf16>, vector<32x128xf32> -> vector<32x128xf32>
    %190 = vector.broadcast %178 : vector<1x128xf32> to vector<32x128xf32>
    %191 = arith.addf %189, %190 : vector<32x128xf32>
    %192 = arith.truncf %191 : vector<32x128xf32> to vector<32x128xbf16>
    %c2_70 = arith.constant 2 : index
    %c0_71 = arith.constant 0 : index
    %c0_72 = arith.constant 0 : index
    %193 = vector.load %arg4[%c2_70, %c0_71, %c0_72] : memref<4x128x128xbf16, #tpu.memory_space<vmem>>, vector<1x128x128xbf16>
    %194 = vector.shape_cast %193 : vector<1x128x128xbf16> to vector<128x128xbf16>
    %cst_73 = arith.constant dense<0.000000e+00> : vector<32x128xf32>
    %195 = tpu.matmul %192, %194, %cst_73 {dimension_numbers = #tpu.dot_dimension_numbers<[1], [0], [0], [1], [0, 0, 1, 1], [], []>} : vector<32x128xbf16>, vector<128x128xbf16>, vector<32x128xf32> -> vector<32x128xf32>
    %196 = vector.broadcast %179 : vector<1x128xf32> to vector<32x128xf32>
    %197 = arith.addf %195, %196 : vector<32x128xf32>
    %198 = arith.addf %175, %197 : vector<32x128xf32>
    %cst_74 = arith.constant dense<0.000000e+00> : vector<32xf32>
    %199 = vector.multi_reduction <add>, %198, %cst_74 [1] : vector<32x128xf32> to vector<32xf32>
    %200 = vector.shape_cast %199 : vector<32xf32> to vector<32x1xf32>
    %cst_75 = arith.constant 1.280000e+02 : f32
    %201 = vector.broadcast %cst_75 : f32 to vector<32x1xf32>
    %202 = arith.divf %200, %201 : vector<32x1xf32>
    %203 = vector.broadcast %202 : vector<32x1xf32> to vector<32x128xf32>
    %204 = arith.subf %198, %203 : vector<32x128xf32>
    %205 = arith.mulf %204, %204 : vector<32x128xf32>
    %cst_76 = arith.constant dense<0.000000e+00> : vector<32xf32>
    %206 = vector.multi_reduction <add>, %205, %cst_76 [1] : vector<32x128xf32> to vector<32xf32>
    %207 = vector.shape_cast %206 : vector<32xf32> to vector<32x1xf32>
    %cst_77 = arith.constant 1.280000e+02 : f32
    %208 = vector.broadcast %cst_77 : f32 to vector<32x1xf32>
    %209 = arith.divf %207, %208 : vector<32x1xf32>
    %210 = vector.broadcast %202 : vector<32x1xf32> to vector<32x128xf32>
    %211 = arith.subf %198, %210 : vector<32x128xf32>
    %cst_78 = arith.constant 9.99999974E-6 : f32
    %212 = vector.broadcast %cst_78 : f32 to vector<32x1xf32>
    %213 = arith.addf %209, %212 : vector<32x1xf32>
    %214 = math.rsqrt %213 : vector<32x1xf32>
    %215 = vector.broadcast %214 : vector<32x1xf32> to vector<32x128xf32>
    %216 = arith.mulf %211, %215 : vector<32x128xf32>
    %217 = vector.broadcast %180 : vector<1x128xf32> to vector<32x128xf32>
    %218 = arith.mulf %216, %217 : vector<32x128xf32>
    %219 = vector.broadcast %181 : vector<1x128xf32> to vector<32x128xf32>
    %220 = arith.addf %218, %219 : vector<32x128xf32>
    %221 = arith.truncf %220 : vector<32x128xf32> to vector<32x128xbf16>
    %c2_79 = arith.constant 2 : index
    %c0_80 = arith.constant 0 : index
    %c0_81 = arith.constant 0 : index
    %222 = vector.load %arg5[%c2_79, %c0_80, %c0_81] : memref<4x128x256xbf16, #tpu.memory_space<vmem>>, vector<1x128x256xbf16>
    %223 = vector.shape_cast %222 : vector<1x128x256xbf16> to vector<128x256xbf16>
    %cst_82 = arith.constant dense<0.000000e+00> : vector<32x256xf32>
    %224 = tpu.matmul %221, %223, %cst_82 {dimension_numbers = #tpu.dot_dimension_numbers<[1], [0], [0], [1], [0, 0, 1, 1], [], []>} : vector<32x128xbf16>, vector<128x256xbf16>, vector<32x256xf32> -> vector<32x256xf32>
    %225 = vector.broadcast %185 : vector<1x256xf32> to vector<32x256xf32>
    %226 = arith.addf %224, %225 : vector<32x256xf32>
    %cst_83 = arith.constant 0.000000e+00 : f32
    %227 = vector.broadcast %cst_83 : f32 to vector<32x256xf32>
    %228 = arith.maximumf %226, %227 : vector<32x256xf32>
    %229 = arith.truncf %228 : vector<32x256xf32> to vector<32x256xbf16>
    %c2_84 = arith.constant 2 : index
    %c0_85 = arith.constant 0 : index
    %c0_86 = arith.constant 0 : index
    %230 = vector.load %arg6[%c2_84, %c0_85, %c0_86] : memref<4x256x128xbf16, #tpu.memory_space<vmem>>, vector<1x256x128xbf16>
    %231 = vector.shape_cast %230 : vector<1x256x128xbf16> to vector<256x128xbf16>
    %cst_87 = arith.constant dense<0.000000e+00> : vector<32x128xf32>
    %232 = tpu.matmul %229, %231, %cst_87 {dimension_numbers = #tpu.dot_dimension_numbers<[1], [0], [0], [1], [0, 0, 1, 1], [], []>} : vector<32x256xbf16>, vector<256x128xbf16>, vector<32x128xf32> -> vector<32x128xf32>
    %233 = vector.broadcast %182 : vector<1x128xf32> to vector<32x128xf32>
    %234 = arith.addf %232, %233 : vector<32x128xf32>
    %235 = arith.addf %220, %234 : vector<32x128xf32>
    %cst_88 = arith.constant dense<0.000000e+00> : vector<32xf32>
    %236 = vector.multi_reduction <add>, %235, %cst_88 [1] : vector<32x128xf32> to vector<32xf32>
    %237 = vector.shape_cast %236 : vector<32xf32> to vector<32x1xf32>
    %cst_89 = arith.constant 1.280000e+02 : f32
    %238 = vector.broadcast %cst_89 : f32 to vector<32x1xf32>
    %239 = arith.divf %237, %238 : vector<32x1xf32>
    %240 = vector.broadcast %239 : vector<32x1xf32> to vector<32x128xf32>
    %241 = arith.subf %235, %240 : vector<32x128xf32>
    %242 = arith.mulf %241, %241 : vector<32x128xf32>
    %cst_90 = arith.constant dense<0.000000e+00> : vector<32xf32>
    %243 = vector.multi_reduction <add>, %242, %cst_90 [1] : vector<32x128xf32> to vector<32xf32>
    %244 = vector.shape_cast %243 : vector<32xf32> to vector<32x1xf32>
    %cst_91 = arith.constant 1.280000e+02 : f32
    %245 = vector.broadcast %cst_91 : f32 to vector<32x1xf32>
    %246 = arith.divf %244, %245 : vector<32x1xf32>
    %247 = vector.broadcast %239 : vector<32x1xf32> to vector<32x128xf32>
    %248 = arith.subf %235, %247 : vector<32x128xf32>
    %cst_92 = arith.constant 9.99999974E-6 : f32
    %249 = vector.broadcast %cst_92 : f32 to vector<32x1xf32>
    %250 = arith.addf %246, %249 : vector<32x1xf32>
    %251 = math.rsqrt %250 : vector<32x1xf32>
    %252 = vector.broadcast %251 : vector<32x1xf32> to vector<32x128xf32>
    %253 = arith.mulf %248, %252 : vector<32x128xf32>
    %254 = vector.broadcast %183 : vector<1x128xf32> to vector<32x128xf32>
    %255 = arith.mulf %253, %254 : vector<32x128xf32>
    %256 = vector.broadcast %184 : vector<1x128xf32> to vector<32x128xf32>
    %257 = arith.addf %255, %256 : vector<32x128xf32>
    %c3 = arith.constant 3 : index
    %c0_93 = arith.constant 0 : index
    %c0_94 = arith.constant 0 : index
    %258 = vector.load %arg9[%c3, %c0_93, %c0_94] : memref<4x8x256xf32, #tpu.memory_space<vmem>>, vector<1x8x256xf32>
    %259 = vector.shape_cast %258 : vector<1x8x256xf32> to vector<8x256xf32>
    %260 = vector.extract_strided_slice %259 {offsets = [0, 0], sizes = [1, 128], strides = [1, 1]} : vector<8x256xf32> to vector<1x128xf32>
    %261 = vector.extract_strided_slice %259 {offsets = [1, 0], sizes = [1, 128], strides = [1, 1]} : vector<8x256xf32> to vector<1x128xf32>
    %262 = vector.extract_strided_slice %259 {offsets = [2, 0], sizes = [1, 128], strides = [1, 1]} : vector<8x256xf32> to vector<1x128xf32>
    %263 = vector.extract_strided_slice %259 {offsets = [3, 0], sizes = [1, 128], strides = [1, 1]} : vector<8x256xf32> to vector<1x128xf32>
    %264 = vector.extract_strided_slice %259 {offsets = [4, 0], sizes = [1, 128], strides = [1, 1]} : vector<8x256xf32> to vector<1x128xf32>
    %265 = vector.extract_strided_slice %259 {offsets = [5, 0], sizes = [1, 128], strides = [1, 1]} : vector<8x256xf32> to vector<1x128xf32>
    %266 = vector.extract_strided_slice %259 {offsets = [6, 0], sizes = [1, 128], strides = [1, 1]} : vector<8x256xf32> to vector<1x128xf32>
    %267 = vector.extract_strided_slice %259 {offsets = [7, 0], sizes = [1, 256], strides = [1, 1]} : vector<8x256xf32> to vector<1x256xf32>
    %268 = arith.truncf %257 : vector<32x128xf32> to vector<32x128xbf16>
    %c3_95 = arith.constant 3 : index
    %c0_96 = arith.constant 0 : index
    %c0_97 = arith.constant 0 : index
    %269 = vector.load %arg3[%c3_95, %c0_96, %c0_97] : memref<4x128x128xbf16, #tpu.memory_space<vmem>>, vector<1x128x128xbf16>
    %270 = vector.shape_cast %269 : vector<1x128x128xbf16> to vector<128x128xbf16>
    %cst_98 = arith.constant dense<0.000000e+00> : vector<32x128xf32>
    %271 = tpu.matmul %268, %270, %cst_98 {dimension_numbers = #tpu.dot_dimension_numbers<[1], [0], [0], [1], [0, 0, 1, 1], [], []>} : vector<32x128xbf16>, vector<128x128xbf16>, vector<32x128xf32> -> vector<32x128xf32>
    %272 = vector.broadcast %260 : vector<1x128xf32> to vector<32x128xf32>
    %273 = arith.addf %271, %272 : vector<32x128xf32>
    %274 = arith.truncf %273 : vector<32x128xf32> to vector<32x128xbf16>
    %c3_99 = arith.constant 3 : index
    %c0_100 = arith.constant 0 : index
    %c0_101 = arith.constant 0 : index
    %275 = vector.load %arg4[%c3_99, %c0_100, %c0_101] : memref<4x128x128xbf16, #tpu.memory_space<vmem>>, vector<1x128x128xbf16>
    %276 = vector.shape_cast %275 : vector<1x128x128xbf16> to vector<128x128xbf16>
    %cst_102 = arith.constant dense<0.000000e+00> : vector<32x128xf32>
    %277 = tpu.matmul %274, %276, %cst_102 {dimension_numbers = #tpu.dot_dimension_numbers<[1], [0], [0], [1], [0, 0, 1, 1], [], []>} : vector<32x128xbf16>, vector<128x128xbf16>, vector<32x128xf32> -> vector<32x128xf32>
    %278 = vector.broadcast %261 : vector<1x128xf32> to vector<32x128xf32>
    %279 = arith.addf %277, %278 : vector<32x128xf32>
    %280 = arith.addf %257, %279 : vector<32x128xf32>
    %cst_103 = arith.constant dense<0.000000e+00> : vector<32xf32>
    %281 = vector.multi_reduction <add>, %280, %cst_103 [1] : vector<32x128xf32> to vector<32xf32>
    %282 = vector.shape_cast %281 : vector<32xf32> to vector<32x1xf32>
    %cst_104 = arith.constant 1.280000e+02 : f32
    %283 = vector.broadcast %cst_104 : f32 to vector<32x1xf32>
    %284 = arith.divf %282, %283 : vector<32x1xf32>
    %285 = vector.broadcast %284 : vector<32x1xf32> to vector<32x128xf32>
    %286 = arith.subf %280, %285 : vector<32x128xf32>
    %287 = arith.mulf %286, %286 : vector<32x128xf32>
    %cst_105 = arith.constant dense<0.000000e+00> : vector<32xf32>
    %288 = vector.multi_reduction <add>, %287, %cst_105 [1] : vector<32x128xf32> to vector<32xf32>
    %289 = vector.shape_cast %288 : vector<32xf32> to vector<32x1xf32>
    %cst_106 = arith.constant 1.280000e+02 : f32
    %290 = vector.broadcast %cst_106 : f32 to vector<32x1xf32>
    %291 = arith.divf %289, %290 : vector<32x1xf32>
    %292 = vector.broadcast %284 : vector<32x1xf32> to vector<32x128xf32>
    %293 = arith.subf %280, %292 : vector<32x128xf32>
    %cst_107 = arith.constant 9.99999974E-6 : f32
    %294 = vector.broadcast %cst_107 : f32 to vector<32x1xf32>
    %295 = arith.addf %291, %294 : vector<32x1xf32>
    %296 = math.rsqrt %295 : vector<32x1xf32>
    %297 = vector.broadcast %296 : vector<32x1xf32> to vector<32x128xf32>
    %298 = arith.mulf %293, %297 : vector<32x128xf32>
    %299 = vector.broadcast %262 : vector<1x128xf32> to vector<32x128xf32>
    %300 = arith.mulf %298, %299 : vector<32x128xf32>
    %301 = vector.broadcast %263 : vector<1x128xf32> to vector<32x128xf32>
    %302 = arith.addf %300, %301 : vector<32x128xf32>
    %303 = arith.truncf %302 : vector<32x128xf32> to vector<32x128xbf16>
    %c3_108 = arith.constant 3 : index
    %c0_109 = arith.constant 0 : index
    %c0_110 = arith.constant 0 : index
    %304 = vector.load %arg5[%c3_108, %c0_109, %c0_110] : memref<4x128x256xbf16, #tpu.memory_space<vmem>>, vector<1x128x256xbf16>
    %305 = vector.shape_cast %304 : vector<1x128x256xbf16> to vector<128x256xbf16>
    %cst_111 = arith.constant dense<0.000000e+00> : vector<32x256xf32>
    %306 = tpu.matmul %303, %305, %cst_111 {dimension_numbers = #tpu.dot_dimension_numbers<[1], [0], [0], [1], [0, 0, 1, 1], [], []>} : vector<32x128xbf16>, vector<128x256xbf16>, vector<32x256xf32> -> vector<32x256xf32>
    %307 = vector.broadcast %267 : vector<1x256xf32> to vector<32x256xf32>
    %308 = arith.addf %306, %307 : vector<32x256xf32>
    %cst_112 = arith.constant 0.000000e+00 : f32
    %309 = vector.broadcast %cst_112 : f32 to vector<32x256xf32>
    %310 = arith.maximumf %308, %309 : vector<32x256xf32>
    %311 = arith.truncf %310 : vector<32x256xf32> to vector<32x256xbf16>
    %c3_113 = arith.constant 3 : index
    %c0_114 = arith.constant 0 : index
    %c0_115 = arith.constant 0 : index
    %312 = vector.load %arg6[%c3_113, %c0_114, %c0_115] : memref<4x256x128xbf16, #tpu.memory_space<vmem>>, vector<1x256x128xbf16>
    %313 = vector.shape_cast %312 : vector<1x256x128xbf16> to vector<256x128xbf16>
    %cst_116 = arith.constant dense<0.000000e+00> : vector<32x128xf32>
    %314 = tpu.matmul %311, %313, %cst_116 {dimension_numbers = #tpu.dot_dimension_numbers<[1], [0], [0], [1], [0, 0, 1, 1], [], []>} : vector<32x256xbf16>, vector<256x128xbf16>, vector<32x128xf32> -> vector<32x128xf32>
    %315 = vector.broadcast %264 : vector<1x128xf32> to vector<32x128xf32>
    %316 = arith.addf %314, %315 : vector<32x128xf32>
    %317 = arith.addf %302, %316 : vector<32x128xf32>
    %cst_117 = arith.constant dense<0.000000e+00> : vector<32xf32>
    %318 = vector.multi_reduction <add>, %317, %cst_117 [1] : vector<32x128xf32> to vector<32xf32>
    %319 = vector.shape_cast %318 : vector<32xf32> to vector<32x1xf32>
    %cst_118 = arith.constant 1.280000e+02 : f32
    %320 = vector.broadcast %cst_118 : f32 to vector<32x1xf32>
    %321 = arith.divf %319, %320 : vector<32x1xf32>
    %322 = vector.broadcast %321 : vector<32x1xf32> to vector<32x128xf32>
    %323 = arith.subf %317, %322 : vector<32x128xf32>
    %324 = arith.mulf %323, %323 : vector<32x128xf32>
    %cst_119 = arith.constant dense<0.000000e+00> : vector<32xf32>
    %325 = vector.multi_reduction <add>, %324, %cst_119 [1] : vector<32x128xf32> to vector<32xf32>
    %326 = vector.shape_cast %325 : vector<32xf32> to vector<32x1xf32>
    %cst_120 = arith.constant 1.280000e+02 : f32
    %327 = vector.broadcast %cst_120 : f32 to vector<32x1xf32>
    %328 = arith.divf %326, %327 : vector<32x1xf32>
    %329 = vector.broadcast %321 : vector<32x1xf32> to vector<32x128xf32>
    %330 = arith.subf %317, %329 : vector<32x128xf32>
    %cst_121 = arith.constant 9.99999974E-6 : f32
    %331 = vector.broadcast %cst_121 : f32 to vector<32x1xf32>
    %332 = arith.addf %328, %331 : vector<32x1xf32>
    %333 = math.rsqrt %332 : vector<32x1xf32>
    %334 = vector.broadcast %333 : vector<32x1xf32> to vector<32x128xf32>
    %335 = arith.mulf %330, %334 : vector<32x128xf32>
    %336 = vector.broadcast %265 : vector<1x128xf32> to vector<32x128xf32>
    %337 = arith.mulf %335, %336 : vector<32x128xf32>
    %338 = vector.broadcast %266 : vector<1x128xf32> to vector<32x128xf32>
    %339 = arith.addf %337, %338 : vector<32x128xf32>
    %340 = arith.truncf %339 : vector<32x128xf32> to vector<32x128xbf16>
    %c0_122 = arith.constant 0 : index
    %c0_123 = arith.constant 0 : index
    %341 = vector.load %arg7[%c0_122, %c0_123] : memref<128x128xbf16, #tpu.memory_space<vmem>>, vector<128x128xbf16>
    %cst_124 = arith.constant dense<0.000000e+00> : vector<32x128xf32>
    %342 = tpu.matmul %340, %341, %cst_124 {dimension_numbers = #tpu.dot_dimension_numbers<[1], [0], [0], [1], [0, 0, 1, 1], [], []>} : vector<32x128xbf16>, vector<128x128xbf16>, vector<32x128xf32> -> vector<32x128xf32>
    %343 = vector.broadcast %3 : vector<1x128xf32> to vector<32x128xf32>
    %344 = arith.addf %342, %343 : vector<32x128xf32>
    %c0_125 = arith.constant 0 : index
    %c0_126 = arith.constant 0 : index
    %345 = vector.load %arg10[%c0_125, %c0_126] : memref<32x128xf32, #tpu.memory_space<vmem>>, vector<32x128xf32>
    tpu.vector_store %arg10[%c0_125, %c0_126], %344 {strides = array<i32>} : memref<32x128xf32, #tpu.memory_space<vmem>>, vector<32x128xf32>,
    return
  }
  func.func @transform_0(%arg0: i32) -> (i32, i32) {
    %c0_i32 = arith.constant 0 : i32
    %c0_i32_0 = arith.constant 0 : i32
    return %arg0, %c0_i32 : i32, i32
  }
  func.func @transform_1(%arg0: i32) -> (i32, i32) {
    %c0_i32 = arith.constant 0 : i32
    %c0_i32_0 = arith.constant 0 : i32
    %c0_i32_1 = arith.constant 0 : i32
    return %c0_i32, %c0_i32_0 : i32, i32
  }
  func.func @transform_2(%arg0: i32) -> (i32, i32, i32) {
    %c0_i32 = arith.constant 0 : i32
    %c0_i32_0 = arith.constant 0 : i32
    %c0_i32_1 = arith.constant 0 : i32
    %c0_i32_2 = arith.constant 0 : i32
    return %c0_i32, %c0_i32_0, %c0_i32_1 : i32, i32, i32
  }
  func.func @transform_3(%arg0: i32) -> (i32, i32, i32) {
    %c0_i32 = arith.constant 0 : i32
    %c0_i32_0 = arith.constant 0 : i32
    %c0_i32_1 = arith.constant 0 : i32
    %c0_i32_2 = arith.constant 0 : i32
    return %c0_i32, %c0_i32_0, %c0_i32_1 : i32, i32, i32
  }
  func.func @transform_4(%arg0: i32) -> (i32, i32, i32) {
    %c0_i32 = arith.constant 0 : i32
    %c0_i32_0 = arith.constant 0 : i32
    %c0_i32_1 = arith.constant 0 : i32
    %c0_i32_2 = arith.constant 0 : i32
    return %c0_i32, %c0_i32_0, %c0_i32_1 : i32, i32, i32
  }
  func.func @transform_5(%arg0: i32) -> (i32, i32, i32) {
    %c0_i32 = arith.constant 0 : i32
    %c0_i32_0 = arith.constant 0 : i32
    %c0_i32_1 = arith.constant 0 : i32
    %c0_i32_2 = arith.constant 0 : i32
    return %c0_i32, %c0_i32_0, %c0_i32_1 : i32, i32, i32
  }
  func.func @transform_6(%arg0: i32) -> (i32, i32) {
    %c0_i32 = arith.constant 0 : i32
    %c0_i32_0 = arith.constant 0 : i32
    %c0_i32_1 = arith.constant 0 : i32
    return %c0_i32, %c0_i32_0 : i32, i32
  }
  func.func @transform_7(%arg0: i32) -> (i32, i32) {
    %c0_i32 = arith.constant 0 : i32
    %c0_i32_0 = arith.constant 0 : i32
    %c0_i32_1 = arith.constant 0 : i32
    return %c0_i32, %c0_i32_0 : i32, i32
  }
  func.func @transform_8(%arg0: i32) -> (i32, i32, i32) {
    %c0_i32 = arith.constant 0 : i32
    %c0_i32_0 = arith.constant 0 : i32
    %c0_i32_1 = arith.constant 0 : i32
    %c0_i32_2 = arith.constant 0 : i32
    return %c0_i32, %c0_i32_0, %c0_i32_1 : i32, i32, i32
  }
  func.func @transform_9(%arg0: i32) -> (i32, i32) {
    %c0_i32 = arith.constant 0 : i32
    %c0_i32_0 = arith.constant 0 : i32
    return %arg0, %c0_i32 : i32, i32
  }
}

</mosaic_0001>

<bundles_post_ra>
// kernel: tpu_custom_call.1
= control target key start
LH: loop header
LB: loop body
LE: loop exit
PB: predicated region body
PF: predicated region fallthrough
CT: control target
= control target key end

     0   :  { %s5842_s0 = inlined_call_operand.hbm [shape: f32[64,128], index: 0, kind: input, shape index: {}]   ;;  %s5843_s1 = inlined_call_operand.hbm [shape: bf16[128,128], index: 1, kind: input, shape index: {}]   ;;  %s5844_s2 = inlined_call_operand.hbm [shape: bf16[4,128,128], index: 2, kind: input, shape index: {}]   ;;  %s5845_s3 = inlined_call_operand.hbm [shape: bf16[4,128,128], index: 3, kind: input, shape index: {}]   ;;  %s5846_s4 = inlined_call_operand.hbm [shape: bf16[4,128,256], index: 4, kind: input, shape index: {}]   ;;  %s5847_s5 = inlined_call_operand.hbm [shape: bf16[4,256,128], index: 5, kind: input, shape index: {}]   ;;  %s5848_s6 = inlined_call_operand.hbm [shape: bf16[128,128], index: 6, kind: input, shape index: {}]   ;;  %s5849_s7 = inlined_call_operand.hbm [shape: f32[8,128], index: 7, kind: input, shape index: {}]   ;;  %s5850_s8 = inlined_call_operand.hbm [shape: f32[4,8,256], index: 8, kind: input, shape index: {}]   ;;  %s5851_s9 = inlined_call_operand.hbm [shape: f32[64,128], index: 9, kind: output, shape index: {}]  }
   0x1   :  { %5854 = sst [smem:[#allocation24_spill]] %s5843_s1 }
   0x2   :  { %5855 = sst [smem:[#allocation25_spill]] %s5844_s2 }
   0x3   :  { %5856 = sst [smem:[#allocation26_spill]] %s5845_s3 }
   0x4   :  { %5857 = sst [smem:[#allocation27_spill]] %s5846_s4 }
   0x5   :  { %14 = vsyncpa [#allocation3], 0 }
   0x6   :  { %16 = vsyncpa [#allocation3 + $0x1], 0 }
   0x7   :  { %17 = vsyncpa [#allocation6], 0 }
   0x8   :  { %18 = vsyncpa [#allocation9], 0 }
   0x9   :  { %19 = vsyncpa [#allocation12], 0 }
   0xa   :  { %20 = vsyncpa [#allocation15], 0 }
   0xb   :  { %21 = vsyncpa [#allocation4], 0 }
   0xc   :  { %23 = vsyncpa [#allocation4 + $0x1], 0  ;;  %s5286_s30 = smov 0   ;;  %s5288_s10 = smov 0  }
   0xd   :  { %s5290_s11 = smov 0   ;;  %s5292_s12 = smov 0  }
   0xe LB: > { %s5858_s1 = sld [smem:[#allocation24_spill]]  ;;  %s5310_s16 = sadd.s32 4294967295, %s5217_s12   ;;  %s5217_s12 = sphi %s5292_s12, %s5875_s12   ;;  %s5213_s11 = sphi %s5290_s11, %s5874_s11   ;;  %s5209_s10 = sphi %s5288_s10, %s5873_s10   ;;  %s5205_s30 = sphi %s5286_s30, %s5872_s30  }
   0xf   : > { %p3575_p0 = scmp.ge.s32.totalorder %s5217_s12, 1  ;;  %p50_p1 = scmp.eq.s32.totalorder %s5310_s16, 0 }
  0x10   : > { %p254_p2 = scmp.lt.s32.totalorder %s5217_s12, 3  ;;  %s5219_s18 = smov [#allocation5]  }
  0x11   : > { %s267_s19 = sshll.u32 %s5219_s18, 4  ;;  %s5860_s3 = sld [smem:[#allocation26_spill]]  ;;  %s268_s19 = int_to_ptr.vmem [resolvable:$true] %s267_s19 }
  0x12   : > { %p5315_p3 = pnand %p3575_p0, %p254_p2  ;;  %s321_s26 = sshll.u32 %s5847_s5, 4  ;;  %s322_s26 = int_to_ptr.hbm [resolvable:$true] %s321_s26 }
  0x13   : > { %s5220_s27 = smov [#allocation8]   ;;  %s5221_s29 = smov 64  }
  0x14   : > { %s265_s15 = sshll.u32 %s5858_s1, 4  ;;  %p4698_p4 = pneg %p5315_p3  ;;  %s266_s15 = int_to_ptr.hbm [resolvable:$true] %s265_s15 }
  0x15   : > { %s295_s28 = sshll.u32 %s5220_s27, 4  ;;  %s5222_s13 = smov 4   ;;  %s296_s28 = int_to_ptr.vmem [resolvable:$true] %s295_s28 }
  0x16   : > { %p5327_p6 = pnand %p4698_p4, %p50_p1  ;;  %s350_s20 = sshll.u32 %s5849_s7, 4  ;;  %s351_s20 = int_to_ptr.hbm [resolvable:$true] %s350_s20 }
  0x17   : > { %s293_s22 = sshll.u32 %s5860_s3, 4  ;;  %s5223_s21 = smov [#allocation11]   ;;  %s294_s22 = int_to_ptr.hbm [resolvable:$true] %s293_s22 }
  0x18   : > { %4701 = dma.hbm_to_vmem [thread:$0]  (!%p5327_p6), %s266_s15, 1024, %s268_s19, [#allocation6], %s5221_s29, %s5221_s29, %s5222_s13  }
  0x19   : > { %4707 = dma.hbm_to_vmem [thread:$0]  (!%p5327_p6), %s294_s22, 4096, %s296_s28, [#allocation9], %s5221_s29, %s5221_s29, %s5222_s13  }
  0x1a   : > { %s323_s24 = sshll.u32 %s5223_s21, 4  ;;  %s5224_s15 = smov [#allocation14]   ;;  %s324_s24 = int_to_ptr.vmem [resolvable:$true] %s323_s24 }
  0x1b   : > { %4713 = dma.hbm_to_vmem [thread:$0]  (!%p5327_p6), %s322_s26, 8192, %s324_s24, [#allocation12], %s5221_s29, %s5221_s29, %s5222_s13  }
  0x1c   : > { %s352_s19 = sshll.u32 %s5224_s15, 4  ;;  %s5862_s2 = sld [smem:[#allocation25_spill]]  ;;  %s353_s19 = int_to_ptr.vmem [resolvable:$true] %s352_s19 }
  0x1d   : > { %4719 = dma.hbm_to_vmem [thread:$0]  (!%p5327_p6), %s351_s20, 128, %s353_s19, [#allocation15]  }
  0x1e   : > { %s5863_s4 = sld [smem:[#allocation27_spill]]  ;;  %s5225_s21 = smov [#allocation7]  }
  0x1f   : > { %s281_s1 = sshll.u32 %s5225_s21, 4  ;;  %s5226_s26 = smov [#allocation10]   ;;  %s282_s1 = int_to_ptr.vmem [resolvable:$true] %s281_s1 }
  0x20   : > { %s309_s24 = sshll.u32 %s5226_s26, 4  ;;  %s5852_s15 = smov 128   ;;  %s310_s24 = int_to_ptr.vmem [resolvable:$true] %s309_s24 }
  0x21   : > { %s5853_s20 = smov 8   ;;  %s335_s27 = sshll.u32 %s5848_s6, 4  ;;  %s336_s27 = int_to_ptr.hbm [resolvable:$true] %s335_s27 }
  0x22   : > { %s279_s22 = sshll.u32 %s5862_s2, 4  ;;  %s361_s21 = sshll.u32 %s5850_s8, 4  ;;  %s280_s22 = int_to_ptr.hbm [resolvable:$true] %s279_s22  ;;  %s362_s21 = int_to_ptr.hbm [resolvable:$true] %s361_s21 }
  0x23   : > { %4704 = dma.hbm_to_vmem [thread:$0]  (!%p5327_p6), %s280_s22, 4096, %s282_s1, [#allocation6], %s5221_s29, %s5221_s29, %s5222_s13  }
  0x24   : > { %s307_s18 = sshll.u32 %s5863_s4, 4  ;;  %s5229_s1 = smov [#allocation13]   ;;  %s308_s18 = int_to_ptr.hbm [resolvable:$true] %s307_s18 }
  0x25   : > { %4710 = dma.hbm_to_vmem [thread:$0]  (!%p5327_p6), %s308_s18, 8192, %s310_s24, [#allocation9], %s5852_s15, %s5852_s15, %s5853_s20  }
  0x26   : > { %s337_s22 = sshll.u32 %s5229_s1, 4  ;;  %s5230_s18 = smov [#allocation16]   ;;  %s338_s22 = int_to_ptr.vmem [resolvable:$true] %s337_s22 }
  0x27   : > { %4716 = dma.hbm_to_vmem [thread:$0]  (!%p5327_p6), %s336_s27, 1024, %s338_s22, [#allocation12], %s5221_s29, %s5221_s29, %s5222_s13  }
  0x28   : > { %s363_s26 = sshll.u32 %s5230_s18, 4  ;;  %s5231_s24 = smov 256   ;;  %s364_s26 = int_to_ptr.vmem [resolvable:$true] %s363_s26 }
  0x29   : > { %s5232_s19 = smov 16   ;;  %s3574_s25 = sadd.s32 4294967294, %s5217_s12  }
  0x2a   : > { %4722 = dma.hbm_to_vmem [thread:$0]  (!%p5327_p6), %s362_s21, 1024, %s364_s26, [#allocation15], %s5231_s24, %s5231_s24, %s5232_s19  }
  0x2b   : > { %s5385_s1 = sadd.s32 1, %s5217_s12   ;;  %s36_s29 = sadd.s32 1, %s5213_s11 }
  0x2c   : > { %s33_s28 = ssub.s32 %s5217_s12, %s5385_s1  ;;  %p43_p8 = scmp.ne.s32.totalorder %s5213_s11, %s5209_s10 }
  0x2d   : > { %p34_p7 = scmp.eq.s32.totalorder %s33_s28, 0  ;;  %p44_p9 = scmp.eq.s32.totalorder %s5217_s12, 0 }
  0x2e   : > { %p49_p10 = scmp.ne.s32.totalorder %s5209_s10, %s5205_s30  ;;  %p241_p13 = scmp.eq.s32.totalorder %s5310_s16, 1 }
  0x2f   : > { %s5396_s13 = scalar_select %p34_p7, %s5213_s11, %s36_s29  }
  0x30   : > { %p5398_p11 = por %p44_p9, %p43_p8  ;;  %p5404_p12 = por %p50_p1, %p49_p10 }
  0x31   : > { %p247_p0 = scmp.eq.s32.totalorder %s3574_s25, 1  ;;  %p4739_p2 = scmp.lt.s32.totalorder %s5217_s12, 2 }
  0x32   : > { %s377_s22 = sand.u32 1, %s5213_s11   ;;  %p5411_p4 = por %p241_p13, %p43_p8 }
  0x33   : > { %p5415_p6 = por %p247_p0, %p49_p10  ;;  %s3585_s18 = sshll.u32 %s377_s22, 5 }
  0x34   : > { %s4436_s26 = sshll.u32 %s5217_s12, 5  ;;  %s381_s29 = scalar_lea.vmem [#allocation2], %s3585_s18 }
  0x35   : > { %s386_s28 = scalar_lea.hbm %s5842_s0, %s4436_s26  ;;  %s389_s15 = sshll.u32 %s381_s29, 4  ;;  %s390_s15 = int_to_ptr.vmem [resolvable:$true] %s389_s15 }
  0x36   : > { %s387_s20 = sshll.u32 %s386_s28, 4  ;;  %p5425_p7 = pnand %p4739_p2, %p5398_p11  ;;  %s388_s20 = int_to_ptr.hbm [resolvable:$true] %s387_s20 }
  0x37   : > { %s378_s2 = scalar_lea.sflag [#allocation3], %s377_s22  ;;  %s5105_s3 = sshra.s32 %s388_s20, 4  ;;  %s5106_s3 = int_to_ptr.hbm [resolvable:$true] %s5105_s3 }
  0x38   : > { %s5107_s4 = scalar_lea.hbm %s5106_s3, 32  ;;  %p5109_p9 = pneg %p5425_p7 }
  0x39   : > { %p5108_p8 = scmp.ne.s32.totalorder %s5106_s3, %s5107_s4  ;;  %s5112_s24 = scalar_lea.hbm %s5842_s0, 64 }
  0x3a   : > { %p5113_p11 = scmp.lt.s32.totalorder %s5106_s3, %s5842_s0  ;;  %p5114_p0 = scmp.lt.s32.totalorder %s5112_s24, %s5107_s4 }
  0x3b   : > { %p5110_p10 = pnand %p5109_p9, %p5108_p8 }
  0x3c   : > { %p5115_p2 = por %p5114_p0, %p5113_p11 }
  0x3d   : > { %p5111_p13 = pneg %p5110_p10 }
  0x3f   : > { %p5116_p5 = pnand %p5115_p2, %p5111_p13 }
  0x41   : > { %5119 = shalt.err (!%p5116_p5)
}
  0x42   : > { %s5869_s22 = smov 8   ;;  %s5870_s28 = smov 128  }
  0x43   : > { %4726 = dma.hbm_to_vmem [thread:$0]  (!%p5425_p7), %s388_s20, 512, %s390_s15, %s378_s2, %s5870_s28, %s5870_s28, %s5869_s22  }
  0x44   : > { %401 = sbr.rel (%p5315_p3) target bundleno = 4836 (0x12e4), region = 56  ;;  %s5445_s29 = sand.u32 (!%p5315_p3), 1, %s5209_s10  }
  0x45   : > { %s3589_s3 = sshll.u32 (!%p5315_p3), %s5445_s29, 5  ;;  %s404_s4 = scalar_lea.sflag (!%p5315_p3), [#allocation3], %s5445_s29 }
  0x46   : > { %s5451_s18 = scalar_lea.vmem (!%p5315_p3), [#allocation2], %s3589_s3 }
  0x49   : > { %5180 = dma.done.wait (%p5404_p12), %s404_s4, 512  }
  0x4a   : > { %5182 = vsyncadd (%p5404_p12), %s404_s4, 4294966784 }
  0x4b   : > { %5184 = dma.done.wait (%p50_p1), [#allocation6], 5120  }
  0x4c   : > { %5186 = vsyncadd (%p50_p1), [#allocation6], 4294962176 }
  0x4d   : > { %5188 = dma.done.wait (%p50_p1), [#allocation9], 12288  }
  0x4e   : > { %5190 = vsyncadd (%p50_p1), [#allocation9], 4294955008 }
  0x4f   : > { %5192 = dma.done.wait (%p50_p1), [#allocation12], 9216  }
  0x50   : > { %5194 = vsyncadd (%p50_p1), [#allocation12], 4294958080 }
  0x51   : > { %5196 = dma.done.wait (%p50_p1), [#allocation15], 1152  }
  0x52   : > { %5198 = vsyncadd (%p50_p1), [#allocation15], 4294966144  ;;  %v4444_v0 = vld [vmem:[#allocation5 + $0x38] sm:$0xff]  ;;  %v4443_v1 = vld [vmem:[#allocation5 + $0x30] sm:$0xff]  ;;  %s482_s2 = scalar_lea.vmem [#allocation17], %s3589_s3  ;;  %s4645_s17 = sshll.u32 %s5310_s16, 5 }
  0x53   : > { %557 = vmatpush.bf16.msra.mxu0 %v4444_v0  ;;  %v4442_v2 = vld [vmem:[#allocation5 + $0x28] sm:$0xff]  ;;  %v4441_v3 = vld [vmem:[#allocation5 + $0x20] sm:$0xff]  ;;  %v4440_v4 = vld [vmem:[#allocation5 + $0x18] sm:$0xff]  ;;  %s3421_s23 = scalar_lea.hbm %s5851_s9, %s4645_s17  ;;  %s3422_s25 = sshll.u32 %s482_s2, 4  ;;  %s3423_s25 = int_to_ptr.vmem [resolvable:$true] %s3422_s25 }
  0x54   : > { %v4452_v5 = vld [vmem:[#allocation7 + $0x38] sm:$0xff]  ;;  %v4439_v6 = vld [vmem:[#allocation5 + $0x10] sm:$0xff]  ;;  %v4438_v8 = vld [vmem:[#allocation5 + $0x8] sm:$0xff]  ;;  %s3424_s26 = sshll.u32 %s3421_s23, 4  ;;  %s3410_s24 = scalar_lea.sflag [#allocation4], %s5445_s29  ;;  %s3425_s26 = int_to_ptr.hbm [resolvable:$true] %s3424_s26 }
  0x55   : > { %650 = vmatpush.bf16.msra.mxu1 %v4452_v5  ;;  %v4451_v7 = vld [vmem:[#allocation7 + $0x30] sm:$0xff]  ;;  %v4450_v9 = vld [vmem:[#allocation7 + $0x28] sm:$0xff]  ;;  %v4437_v10 = vld [vmem:[#allocation5] sm:$0xff]  ;;  %s5149_s16 = sshra.s32 %s3425_s26, 4  ;;  %s5155_s28 = scalar_lea.hbm %s5851_s9, 64  ;;  %s5150_s16 = int_to_ptr.hbm [resolvable:$true] %s5149_s16 }
  0x56   : > { %v486_v11 = vld [vmem:[%s5451_s18] sm:$0xff]  ;;  %v487_v12 = vld [vmem:[%s5451_s18 + $0x8] sm:$0xff]  ;;  %v488_v15 = vld [vmem:[%s5451_s18 + $0x10] sm:$0xff]  ;;  %s5151_s19 = scalar_lea.hbm %s5150_s16, 32  ;;  %p5156_p12 = scmp.lt.s32.totalorder %s5150_s16, %s5851_s9 }
  0x57   : > { %558 = vmatpush.bf16.msra.mxu0 %v4443_v1  ;;  %v4449_v13 = vld [vmem:[#allocation7 + $0x20] sm:$0xff]  ;;  %v490_v14 = vpack.c.bf16 %v487_v12, %v486_v11  ;;  %v489_v16 = vld [vmem:[%s5451_s18 + $0x18] sm:$0xff]  ;;  %v4447_v19 = vld [vmem:[#allocation7 + $0x10] sm:$0xff]  ;;  %p5152_p1 = scmp.ne.s32.totalorder %s5150_s16, %s5151_s19  ;;  %p5157_p7 = scmp.lt.s32.totalorder %s5155_s28, %s5151_s19 }
  0x58   : > { %v491_v17 = vpack.c.bf16 %v489_v16, %v488_v15  ;;  %v4448_v18 = vld [vmem:[#allocation7 + $0x18] sm:$0xff]  ;;  %v4446_v20 = vld [vmem:[#allocation7 + $0x8] sm:$0xff]  ;;  %v4445_v21 = vld [vmem:[#allocation7] sm:$0xff] }
  0x59   : > { %651 = vmatpush.bf16.msra.mxu1 %v4451_v7  ;;  %v4460_v22 = vld [vmem:[#allocation8 + $0x38] sm:$0xff]  ;;  %v485_v23 = vld [vmem:[#allocation14] sm:$0xff]  ;;  %v4459_v25 = vld [vmem:[#allocation8 + $0x30] sm:$0xff]  ;;  %p5153_p3 = pnand %p5152_p1, %p5411_p4  ;;  %p5158_p8 = por %p5157_p7, %p5156_p12 }
  0x5a   : > { %736 = vmatpush.bf16.msra.mxu2 %v4460_v22  ;;  %v508_v26 = vperm.slane %v485_v23, 1  ;;  %v4458_v27 = vld [vmem:[#allocation8 + $0x28] sm:$0xff]  ;;  %v576_v29 = vperm.slane %v485_v23, 0  ;;  %v4457_v32 = vld [vmem:[#allocation8 + $0x20] sm:$0xff]  ;;  %v4456_v36 = vld [vmem:[#allocation8 + $0x18] sm:$0xff] }
  0x5b   : > { %559 = vmatpush.bf16.msra.mxu0 %v4442_v2  ;;  %v4455_v44 = vld [vmem:[#allocation8 + $0x10] sm:$0xff]  ;;  %v4454_v45 = vld [vmem:[#allocation8 + $0x8] sm:$0xff]  ;;  %v4453_v46 = vld [vmem:[#allocation8] sm:$0xff]  ;;  %p5154_p5 = pneg %p5153_p3 }
  0x5c   : > { %v5477_v48 = vld [vmem:[#allocation16] sm:$0xff] }
  0x5d   : > { %652 = vmatpush.bf16.msra.mxu1 %v4450_v9  ;;  %v601_v49 = vperm.slane %v5477_v48, 0  ;;  %v687_v59 = vperm.slane %v5477_v48, 1  ;;  %p5159_p9 = pnand %p5158_p8, %p5154_p5 }
  0x5e   : > { %737 = vmatpush.bf16.msra.mxu2 %v4459_v25 }
  0x5f   : > { %560 = vmatpush.bf16.msra.mxu0 %v4441_v3 }
  0x61   : > { %653 = vmatpush.bf16.msra.mxu1 %v4449_v13 }
  0x62   : > { %738 = vmatpush.bf16.msra.mxu2 %v4458_v27 }
  0x63   : > { %561 = vmatpush.bf16.msra.mxu0 %v4440_v4 }
  0x65   : > { %654 = vmatpush.bf16.msra.mxu1 %v4448_v18 }
  0x66   : > { %739 = vmatpush.bf16.msra.mxu2 %v4457_v32  ;;  %v4476_v32 = vld [vmem:[#allocation10 + $0x74] sm:$0xf0] }
  0x67   : > { %562 = vmatpush.bf16.msra.mxu0 %v4439_v6 }
  0x69   : > { %655 = vmatpush.bf16.msra.mxu1 %v4447_v19 }
  0x6a   : > { %740 = vmatpush.bf16.msra.mxu2 %v4456_v36 }
  0x6b   : > { %563 = vmatpush.bf16.msra.mxu0 %v4438_v8  ;;  %v5233_v8 = vmov 128.0  }
  0x6c   : > { %4798 = vrcp.f32 %v5233_v8  ;;  %v3707_v8 = vld [vmem:[#allocation10 + $0x18] sm:$0xf0] }
  0x6d   : > { %656 = vmatpush.bf16.msra.mxu1 %v4446_v20 }
  0x6e   : > { %741 = vmatpush.bf16.msra.mxu2 %v4455_v44  ;;  %v4472_v44 = vld [vmem:[#allocation10 + $0x54] sm:$0xf0] }
  0x6f   : > { %564 = vmatpush.bf16.msra.mxu0 %v4437_v10 }
  0x71   : > { %657 = vmatpush.bf16.msra.mxu1 %v4445_v21 }
  0x72   : > { %565 = vmatmul.bf16.vlgmr.msra.gmra.mxu0 %v490_v14  ;;  %742 = vmatpush.bf16.msra.mxu2 %v4454_v45  ;;  %v4799_v9 = vpop.eup %4798  ;;  %v4471_v45 = vld [vmem:[#allocation10 + $0x54] sm:$0xf] }
  0x73   : > { %v768_v10 = vmul.f32 128.0, %v4799_v9  ;;  %vm772_vm0 = vweird.f32 %v4799_v9 }
  0x75   : > { %v769_v11 = vsub.f32 1.0, %v768_v10 }
  0x76   : > { %743 = vmatpush.bf16.msra.mxu2 %v4453_v46 }
  0x77   : > { %v770_v12 = vmul.f32 %v4799_v9, %v769_v11 }
  0x79   : > { %v771_v13 = vadd.f32 %v4799_v9, %v770_v12  ;;  %v3697_v12 = vld [vmem:[#allocation10] sm:$0xf] }
  0x7b   : > { %v5481_v14 = vsel %vm772_vm0, %v4799_v9, %v771_v13  ;;  %v4462_v13 = vld [vmem:[#allocation10 + $0x4] sm:$0xf0] }
  0x82   : > { %570 = vmatmul.bf16.gmra.mxu0 %v491_v17 }
  0xef   : > { %v566_v24 = vpop.f32.mrf.mxu0 }
  0xf0   : > { %v567_v28 = vadd.f32 %v566_v24, %v508_v26 }
  0xf2   : > { %v577_v33 = vadd.f32 %v576_v29, %v567_v28 }
  0xf7   : > { %v568_v30 = vpop.f32.mrf.mxu0 }
  0xf8   : > { %v569_v31 = vadd.f32 %v568_v30, %v508_v26 }
  0xfa   : > { %v578_v34 = vadd.f32 %v576_v29, %v569_v31  ;;  %v3753_v31 = vld [vmem:[#allocation10 + $0x70] sm:$0xf] }
  0xfc   : > { %v583_v35 = vpack.c.bf16 %v578_v34, %v577_v33 }
  0xfe   : > { %658 = vmatmul.bf16.vlgmr.msra.gmra.mxu1 %v583_v35  ;;  %v3755_v35 = vld [vmem:[#allocation10 + $0x78] sm:$0xf0] }
  0xff   : > { %v571_v37 = vpop.f32.mrf.mxu0 }
 0x100   : > { %v572_v38 = vadd.f32 %v571_v37, %v508_v26  ;;  %v3745_v37 = vld [vmem:[#allocation10 + $0x60] sm:$0xf] }
 0x102   : > { %v579_v41 = vadd.f32 %v576_v29, %v572_v38  ;;  %v4474_v38 = vld [vmem:[#allocation10 + $0x64] sm:$0xf0] }
 0x107   : > { %v573_v39 = vpop.f32.mrf.mxu0 }
 0x108   : > { %v574_v40 = vadd.f32 %v573_v39, %v508_v26  ;;  %v4473_v39 = vld [vmem:[#allocation10 + $0x64] sm:$0xf] }
 0x10a   : > { %v580_v42 = vadd.f32 %v576_v29, %v574_v40  ;;  %v3746_v40 = vor.u32 %v4474_v38, %v3745_v37 }
 0x10c   : > { %v584_v43 = vpack.c.bf16 %v580_v42, %v579_v41 }
 0x10e   : > { %663 = vmatmul.bf16.gmra.mxu1 %v584_v43  ;;  %v3737_v43 = vld [vmem:[#allocation10 + $0x50] sm:$0xf] }
 0x10f   : > { %v3738_v46 = vor.u32 %v4472_v44, %v3737_v43 }
 0x17b   : > { %v659_v47 = vpop.f32.mrf.mxu1 }
 0x17c   : > { %v660_v51 = vadd.f32 %v659_v47, %v601_v49  ;;  %v3739_v47 = vld [vmem:[#allocation10 + $0x58] sm:$0xf0] }
 0x183   : > { %v661_v50 = vpop.f32.mrf.mxu1 }
 0x184   : > { %v662_v52 = vadd.f32 %v661_v50, %v601_v49  ;;  %v3729_v50 = vld [vmem:[#allocation10 + $0x40] sm:$0xf] }
 0x186   : > { %v669_v53 = vpack.c.bf16 %v662_v52, %v660_v51  ;;  %v4470_v51 = vld [vmem:[#allocation10 + $0x44] sm:$0xf0]  ;;  %v4469_v52 = vld [vmem:[#allocation10 + $0x44] sm:$0xf] }
 0x188   : > { %744 = vmatmul.bf16.vlgmr.msra.gmra.mxu2 %v669_v53  ;;  %v3730_v53 = vor.u32 %v4470_v51, %v3729_v50 }
 0x18b   : > { %v664_v54 = vpop.f32.mrf.mxu1 }
 0x18c   : > { %v665_v56 = vadd.f32 %v664_v54, %v601_v49  ;;  %v3731_v54 = vld [vmem:[#allocation10 + $0x48] sm:$0xf0] }
 0x193   : > { %v666_v55 = vpop.f32.mrf.mxu1 }
 0x194   : > { %v667_v57 = vadd.f32 %v666_v55, %v601_v49  ;;  %v3742_v49 = vor.u32 %v4471_v45, %v3739_v47  ;;  %v3734_v55 = vor.u32 %v4469_v52, %v3731_v54  ;;  %v4491_v45 = vld [vmem:[#allocation11 + $0x70] sm:$0xff]  ;;  %v846_v52 = vperm.slane %v5477_v48, 2 }
 0x196   : > { %v670_v58 = vpack.c.bf16 %v667_v57, %v665_v56  ;;  %v3721_v56 = vld [vmem:[#allocation10 + $0x30] sm:$0xf]  ;;  %v4468_v57 = vld [vmem:[#allocation10 + $0x34] sm:$0xf0] }
 0x198   : > { %749 = vmatmul.bf16.gmra.mxu2 %v670_v58  ;;  %v4467_v58 = vld [vmem:[#allocation10 + $0x34] sm:$0xf] }
 0x20b   : > { %v745_v60 = vpop.f32.mrf.mxu2 }
 0x20c   : > { %v746_v61 = vadd.f32 %v745_v60, %v687_v59  ;;  %v3723_v60 = vld [vmem:[#allocation10 + $0x38] sm:$0xf0] }
 0x20e   : > { %v755_v62 = vadd.f32 %v746_v61, %v577_v33  ;;  %v4475_v33 = vld [vmem:[#allocation10 + $0x74] sm:$0xf]  ;;  %v3726_v61 = vor.u32 %v4467_v58, %v3723_v60 }
 0x20f   : > { %v3758_v36 = vor.u32 %v4475_v33, %v3755_v35 }
 0x210   : > { %759 = vadd.xlane.f32.xlu0 %v755_v62 }
 0x211   : > { %975 = vmatpush.bf16.msrb.mxu0 %v3758_v36 }
 0x213   : > { %v747_v63 = vpop.f32.mrf.mxu2 }
 0x214   : > { %v748_v0 = vadd.f32 %v747_v63, %v687_v59  ;;  %v4466_v63 = vld [vmem:[#allocation10 + $0x24] sm:$0xf0] }
 0x216   : > { %v756_v1 = vadd.f32 %v748_v0, %v578_v34  ;;  %v3754_v34 = vor.u32 %v4476_v32, %v3753_v31  ;;  %v4465_v0 = vld [vmem:[#allocation10 + $0x24] sm:$0xf] }
 0x218   : > { %761 = vadd.xlane.f32.xlu0 %v756_v1  ;;  %956 = vmatpush.bf16.msra.mxu3 %v3754_v34 }
 0x21b   : > { %v750_v2 = vpop.f32.mrf.mxu2 }
 0x21c   : > { %v751_v3 = vadd.f32 %v750_v2, %v687_v59  ;;  %957 = vmatpush.bf16.msra.mxu3 %v3746_v40  ;;  %v3715_v2 = vld [vmem:[#allocation10 + $0x28] sm:$0xf0]  ;;  %v4484_v40 = vld [vmem:[#allocation11 + $0x38] sm:$0xff] }
 0x21d   : > { %1135 = vmatpush.bf16.msrb.mxu1 %v4484_v40 }
 0x21e   : > { %v757_v4 = vadd.f32 %v751_v3, %v579_v41  ;;  %v3747_v41 = vld [vmem:[#allocation10 + $0x68] sm:$0xf0]  ;;  %v3718_v3 = vor.u32 %v4465_v0, %v3715_v2 }
 0x220   : > { %763 = vadd.xlane.f32.xlu1 %v757_v4  ;;  %958 = vmatpush.bf16.msra.mxu3 %v3738_v46  ;;  %v4483_v46 = vld [vmem:[#allocation11 + $0x30] sm:$0xff] }
 0x221   : > { %1136 = vmatpush.bf16.msrb.mxu1 %v4483_v46 }
 0x223   : > { %v752_v5 = vpop.f32.mrf.mxu2 }
 0x224   : > { %v753_v6 = vadd.f32 %v752_v5, %v687_v59  ;;  %959 = vmatpush.bf16.msra.mxu3 %v3730_v53  ;;  %v3722_v59 = vor.u32 %v4468_v57, %v3721_v56  ;;  %v4464_v5 = vld [vmem:[#allocation10 + $0x14] sm:$0xf0]  ;;  %v4482_v56 = vld [vmem:[#allocation11 + $0x28] sm:$0xff] }
 0x225   : > { %1137 = vmatpush.bf16.msrb.mxu1 %v4482_v56 }
 0x226   : > { %v758_v7 = vadd.f32 %v753_v6, %v580_v42  ;;  %v3750_v42 = vor.u32 %v4473_v39, %v3747_v41  ;;  %v4463_v6 = vld [vmem:[#allocation10 + $0x14] sm:$0xf]  ;;  %v4492_v39 = vld [vmem:[#allocation11 + $0x78] sm:$0xff] }
 0x227   : > { %v3710_v9 = vor.u32 %v4463_v6, %v3707_v8  ;;  %1154 = vmatpush.bf16.msrb.mxu2 %v4492_v39 }
 0x228   : > { %765 = vadd.xlane.f32.xlu1 %v758_v7  ;;  %976 = vmatpush.bf16.msrb.mxu0 %v3750_v42 }
 0x229   : > { %960 = vmatpush.bf16.msra.mxu3 %v3722_v59 }
 0x22b   : > { %1155 = vmatpush.bf16.msrb.mxu2 %v4491_v45 }
 0x22c   : > { %977 = vmatpush.bf16.msrb.mxu0 %v3742_v49 }
 0x230   : > { %978 = vmatpush.bf16.msrb.mxu0 %v3734_v55  ;;  %v4490_v55 = vld [vmem:[#allocation11 + $0x68] sm:$0xff] }
 0x231   : > { %1156 = vmatpush.bf16.msrb.mxu2 %v4490_v55 }
 0x234   : > { %979 = vmatpush.bf16.msrb.mxu0 %v3726_v61  ;;  %v851_v61 = vperm.slane %v5477_v48, 3 }
 0x238   : > { %980 = vmatpush.bf16.msrb.mxu0 %v3718_v3 }
 0x23c   : > { %981 = vmatpush.bf16.msrb.mxu0 %v3710_v9 }
 0x283   : > { %v760_v15 = vpop.xlane.xlu0 %759 }
 0x284   : > { %v774_v16 = vmul.f32 %v5481_v14, %v760_v15  ;;  %v4461_v15 = vld [vmem:[#allocation10 + $0x4] sm:$0xf] }
 0x286   : > { %v5484_v17 = vsub.f32 %v755_v62, %v774_v16  ;;  %v3713_v62 = vld [vmem:[#allocation10 + $0x20] sm:$0xf]  ;;  %v3698_v16 = vor.u32 %v4462_v13, %v3697_v12 }
 0x288   : > { %v782_v18 = vmul.f32 %v5484_v17, %v5484_v17 }
 0x28a   : > { %786 = vadd.xlane.f32.xlu2 %v782_v18  ;;  %v3699_v18 = vld [vmem:[#allocation10 + $0x8] sm:$0xf0] }
 0x28b   : > { %v762_v19 = vpop.xlane.xlu0 %761 }
 0x28c   : > { %v775_v20 = vmul.f32 %v5481_v14, %v762_v19 }
 0x28e   : > { %v5489_v21 = vsub.f32 %v756_v1, %v775_v20  ;;  %v3714_v1 = vor.u32 %v4466_v63, %v3713_v62  ;;  %v3702_v20 = vor.u32 %v4461_v15, %v3699_v18  ;;  %v4489_v63 = vld [vmem:[#allocation11 + $0x60] sm:$0xff] }
 0x28f   : > { %1157 = vmatpush.bf16.msrb.mxu2 %v4489_v63 }
 0x290   : > { %v783_v22 = vmul.f32 %v5489_v21, %v5489_v21  ;;  %961 = vmatpush.bf16.msra.mxu3 %v3714_v1  ;;  %982 = vmatpush.bf16.msrb.mxu0 %v3702_v20 }
 0x292   : > { %788 = vadd.xlane.f32.xlu2 %v783_v22 }
 0x293   : > { %v764_v23 = vpop.xlane.xlu1 %763 }
 0x294   : > { %v776_v24 = vmul.f32 %v5481_v14, %v764_v23 }
 0x296   : > { %v5494_v25 = vsub.f32 %v757_v4, %v776_v24  ;;  %v3705_v4 = vld [vmem:[#allocation10 + $0x10] sm:$0xf] }
 0x298   : > { %v784_v26 = vmul.f32 %v5494_v25, %v5494_v25 }
 0x29a   : > { %790 = vadd.xlane.f32.xlu0 %v784_v26 }
 0x29b   : > { %v766_v27 = vpop.xlane.xlu1 %765 }
 0x29c   : > { %v777_v28 = vmul.f32 %v5481_v14, %v766_v27 }
 0x29e   : > { %v5499_v29 = vsub.f32 %v758_v7, %v777_v28  ;;  %v3706_v7 = vor.u32 %v4464_v5, %v3705_v4 }
 0x2a0   : > { %v785_v30 = vmul.f32 %v5499_v29, %v5499_v29  ;;  %962 = vmatpush.bf16.msra.mxu3 %v3706_v7 }
 0x2a2   : > { %792 = vadd.xlane.f32.xlu1 %v785_v30 }
 0x2a4   : > { %963 = vmatpush.bf16.msra.mxu3 %v3698_v16 }
 0x2fd   : > { %v787_v10 = vpop.xlane.xlu2 %786 }
 0x2fe   : > { %v794_v11 = vmul.f32 %v787_v10, %v5481_v14 }
 0x300   : > { %v798_v19 = vadd.f32 1e-05, %v794_v11 }
 0x302   : > { %4800 = vrsqrt.f32 %v798_v19  ;;  %vm808_vm2 = vweird.f32 %v798_v19 }
 0x305   : > { %v789_v22 = vpop.xlane.xlu2 %788 }
 0x306   : > { %v795_v23 = vmul.f32 %v789_v22, %v5481_v14  ;;  %v4488_v22 = vld [vmem:[#allocation11 + $0x58] sm:$0xff] }
 0x307   : > { %1158 = vmatpush.bf16.msrb.mxu2 %v4488_v22 }
 0x308   : > { %v4801_v24 = vpop.eup %4800  ;;  %v799_v26 = vadd.f32 1e-05, %v795_v23  ;;  %v4487_v23 = vld [vmem:[#allocation11 + $0x50] sm:$0xff] }
 0x309   : > { %v803_v27 = vmul.f32 %v4801_v24, %v798_v19  ;;  %vm809_vm1 = vweird.f32 %v4801_v24 }
 0x30a   : > { %4802 = vrsqrt.f32 %v799_v26  ;;  %vm810_vm3 = vmor %vm808_vm2, %vm809_vm1  ;;  %vm818_vm5 = vweird.f32 %v799_v26 }
 0x30b   : > { %v804_v28 = vmul.f32 %v4801_v24, %v803_v27  ;;  %1159 = vmatpush.bf16.msrb.mxu2 %v4487_v23  ;;  %v4485_v27 = vld [vmem:[#allocation11 + $0x40] sm:$0xff] }
 0x30d   : > { %v805_v30 = vmul.f32 0.5, %v804_v28  ;;  %v791_v31 = vpop.xlane.xlu0 %790  ;;  %v4478_v28 = vld [vmem:[#allocation11 + $0x8] sm:$0xff] }
 0x30e   : > { %v796_v32 = vmul.f32 %v791_v31, %v5481_v14  ;;  %v582_v31 = vld [vmem:[#allocation16 + $0x8] sm:$0xff] }
 0x30f   : > { %v806_v33 = vsub.f32 1.5, %v805_v30  ;;  %v4477_v30 = vld [vmem:[#allocation11] sm:$0xff] }
 0x310   : > { %v4803_v34 = vpop.eup %4802  ;;  %v800_v35 = vadd.f32 1e-05, %v796_v32 }
 0x311   : > { %v807_v36 = vmul.f32 %v4801_v24, %v806_v33  ;;  %v813_v37 = vmul.f32 %v4803_v34, %v799_v26  ;;  %vm819_vm4 = vweird.f32 %v4803_v34  ;;  %v4479_v26 = vld [vmem:[#allocation11 + $0x10] sm:$0xff]  ;;  %v875_v33 = vperm.slane %v582_v31, 7 }
 0x312   : > { %4804 = vrsqrt.f32 %v800_v35  ;;  %vm820_vm6 = vmor %vm818_vm5, %vm819_vm4  ;;  %vm828_vm8 = vweird.f32 %v800_v35 }
 0x313   : > { %v814_v38 = vmul.f32 %v4803_v34, %v813_v37  ;;  %v811_v43 = vsel %vm810_vm3, %v4801_v24, %v807_v36  ;;  %v4480_v24 = vld [vmem:[#allocation11 + $0x18] sm:$0xff]  ;;  %v874_v37 = vperm.slane %v5477_v48, 7 }
 0x314   : > { %v842_v51 = vmul.f32 %v811_v43, %v5484_v17 }
 0x315   : > { %v815_v41 = vmul.f32 0.5, %v814_v38  ;;  %v793_v42 = vpop.xlane.xlu1 %792 }
 0x316   : > { %v797_v44 = vmul.f32 %v793_v42, %v5481_v14  ;;  %v847_v60 = vmul.f32 %v846_v52, %v842_v51 }
 0x317   : > { %v816_v47 = vsub.f32 1.5, %v815_v41 }
 0x318   : > { %v4805_v49 = vpop.eup %4804  ;;  %v801_v50 = vadd.f32 1e-05, %v797_v44  ;;  %v5511_v2 = vadd.f32 %v851_v61, %v847_v60 }
 0x319   : > { %v817_v53 = vmul.f32 %v4803_v34, %v816_v47  ;;  %v823_v54 = vmul.f32 %v4805_v49, %v800_v35  ;;  %vm829_vm7 = vweird.f32 %v4805_v49 }
 0x31a   : > { %4806 = vrsqrt.f32 %v801_v50  ;;  %vm830_vm9 = vmor %vm828_vm8, %vm829_vm7  ;;  %vm838_vm11 = vweird.f32 %v801_v50 }
 0x31b   : > { %v824_v57 = vmul.f32 %v4805_v49, %v823_v54  ;;  %v821_v58 = vsel %vm820_vm6, %v4803_v34, %v817_v53 }
 0x31c   : > { %v843_v59 = vmul.f32 %v821_v58, %v5489_v21 }
 0x31d   : > { %v825_v62 = vmul.f32 0.5, %v824_v57 }
 0x31e   : > { %v848_v17 = vmul.f32 %v846_v52, %v843_v59 }
 0x31f   : > { %v826_v0 = vsub.f32 1.5, %v825_v62 }
 0x320   : > { %v4807_v1 = vpop.eup %4806  ;;  %v5513_v3 = vadd.f32 %v851_v61, %v848_v17  ;;  %v1038_v17 = vperm.slane %v5477_v48, 4 }
 0x321   : > { %v827_v4 = vmul.f32 %v4805_v49, %v826_v0  ;;  %v833_v5 = vmul.f32 %v4807_v1, %v801_v50  ;;  %vm839_vm10 = vweird.f32 %v4807_v1 }
 0x322   : > { %v856_v21 = vpack.c.bf16 %v5513_v3, %v5511_v2  ;;  %vm840_vm12 = vmor %vm838_vm11, %vm839_vm10 }
 0x323   : > { %v834_v6 = vmul.f32 %v4807_v1, %v833_v5  ;;  %v831_v8 = vsel %vm830_vm9, %v4805_v49, %v827_v4 }
 0x324   : > { %964 = vmatmul.bf16.vlgmr.msra.gmra.mxu3 %v856_v21  ;;  %983 = vmatmul.bf16.vlgmr.msrb.gmra.mxu0 %v856_v21  ;;  %v844_v10 = vmul.f32 %v831_v8, %v5494_v25  ;;  %v4481_v25 = vld [vmem:[#allocation11 + $0x20] sm:$0xff] }
 0x325   : > { %v835_v7 = vmul.f32 0.5, %v834_v6  ;;  %1138 = vmatpush.bf16.msrb.mxu1 %v4481_v25 }
 0x326   : > { %v849_v15 = vmul.f32 %v846_v52, %v844_v10 }
 0x327   : > { %v836_v9 = vsub.f32 1.5, %v835_v7 }
 0x328   : > { %v5519_v18 = vadd.f32 %v851_v61, %v849_v15 }
 0x329   : > { %v837_v11 = vmul.f32 %v4807_v1, %v836_v9  ;;  %1139 = vmatpush.bf16.msrb.mxu1 %v4480_v24 }
 0x32b   : > { %v841_v12 = vsel %vm840_vm12, %v4807_v1, %v837_v11 }
 0x32c   : > { %v845_v13 = vmul.f32 %v841_v12, %v5499_v29  ;;  %v4486_v29 = vld [vmem:[#allocation11 + $0x48] sm:$0xff] }
 0x32d   : > { %1160 = vmatpush.bf16.msrb.mxu2 %v4486_v29  ;;  %1140 = vmatpush.bf16.msrb.mxu1 %v4479_v26 }
 0x32e   : > { %v850_v16 = vmul.f32 %v846_v52, %v845_v13 }
 0x330   : > { %v5521_v19 = vadd.f32 %v851_v61, %v850_v16 }
 0x331   : > { %1161 = vmatpush.bf16.msrb.mxu2 %v4485_v27  ;;  %1141 = vmatpush.bf16.msrb.mxu1 %v4478_v28 }
 0x332   : > { %v857_v20 = vpack.c.bf16 %v5521_v19, %v5519_v18 }
 0x334   : > { %969 = vmatmul.bf16.gmra.mxu3 %v857_v20  ;;  %988 = vmatmul.bf16.gmra.mxu0 %v857_v20 }
 0x335   : > { %1142 = vmatpush.bf16.msrb.mxu1 %v4477_v30 }
 0x3a1   : > { %v984_v32 = vpop.f32.mrf.mxu0 }
 0x3a2   : > { %v985_v35 = vadd.f32 %v984_v32, %v875_v33 }
 0x3a4   : > { %v995_v39 = vmax.f32 %v985_v35, 0.0 }
 0x3a7   : > { %v965_v34 = vpop.f32.mrf.mxu3 }
 0x3a8   : > { %v966_v41 = vadd.f32 %v965_v34, %v874_v37 }
 0x3a9   : > { %v986_v36 = vpop.f32.mrf.mxu0 }
 0x3aa   : > { %v987_v38 = vadd.f32 %v986_v36, %v875_v33  ;;  %v994_v46 = vmax.f32 %v966_v41, 0.0  ;;  %v4496_v41 = vld [vmem:[#allocation7 + $0x58] sm:$0xff] }
 0x3ac   : > { %v997_v40 = vmax.f32 %v987_v38, 0.0  ;;  %v4499_v38 = vld [vmem:[#allocation7 + $0x70] sm:$0xff] }
 0x3ae   : > { %v1003_v42 = vpack.c.bf16 %v997_v40, %v995_v39  ;;  %v4498_v39 = vld [vmem:[#allocation7 + $0x68] sm:$0xff]  ;;  %v4497_v40 = vld [vmem:[#allocation7 + $0x60] sm:$0xff] }
 0x3af   : > { %v967_v43 = vpop.f32.mrf.mxu3 }
 0x3b0   : > { %v968_v44 = vadd.f32 %v967_v43, %v874_v37  ;;  %1162 = vmatmul.bf16.vlgmr.msrb.gmra.mxu2 %v1003_v42  ;;  %v4495_v42 = vld [vmem:[#allocation7 + $0x50] sm:$0xff]  ;;  %v4494_v43 = vld [vmem:[#allocation7 + $0x48] sm:$0xff] }
 0x3b1   : > { %v989_v45 = vpop.f32.mrf.mxu0 }
 0x3b2   : > { %v996_v47 = vmax.f32 %v968_v44, 0.0  ;;  %v990_v51 = vadd.f32 %v989_v45, %v875_v33 }
 0x3b4   : > { %v1002_v49 = vpack.c.bf16 %v996_v47, %v994_v46  ;;  %v999_v54 = vmax.f32 %v990_v51, 0.0  ;;  %v4493_v46 = vld [vmem:[#allocation7 + $0x40] sm:$0xff] }
 0x3b6   : > { %1143 = vmatmul.bf16.vlgmr.msrb.gmra.mxu1 %v1002_v49 }
 0x3b7   : > { %v970_v50 = vpop.f32.mrf.mxu3 }
 0x3b8   : > { %v971_v56 = vadd.f32 %v970_v50, %v874_v37 }
 0x3b9   : > { %v991_v52 = vpop.f32.mrf.mxu0 }
 0x3ba   : > { %v992_v53 = vadd.f32 %v991_v52, %v875_v33  ;;  %v998_v60 = vmax.f32 %v971_v56, 0.0 }
 0x3bc   : > { %v1001_v55 = vmax.f32 %v992_v53, 0.0 }
 0x3be   : > { %v1005_v57 = vpack.c.bf16 %v1001_v55, %v999_v54 }
 0x3bf   : > { %v972_v58 = vpop.f32.mrf.mxu3 }
 0x3c0   : > { %v973_v59 = vadd.f32 %v972_v58, %v874_v37  ;;  %1167 = vmatmul.bf16.gmra.mxu2 %v1005_v57  ;;  %v4500_v37 = vld [vmem:[#allocation7 + $0x78] sm:$0xff] }
 0x3c1   : > { %1338 = vmatpush.bf16.msrb.mxu3 %v4500_v37 }
 0x3c2   : > { %v1000_v61 = vmax.f32 %v973_v59, 0.0 }
 0x3c4   : > { %v1004_v62 = vpack.c.bf16 %v1000_v61, %v998_v60 }
 0x3c5   : > { %1339 = vmatpush.bf16.msrb.mxu3 %v4499_v38 }
 0x3c6   : > { %1148 = vmatmul.bf16.gmra.mxu1 %v1004_v62 }
 0x3c9   : > { %1340 = vmatpush.bf16.msrb.mxu3 %v4498_v39 }
 0x3cd   : > { %1341 = vmatpush.bf16.msrb.mxu3 %v4497_v40 }
 0x3d1   : > { %1342 = vmatpush.bf16.msrb.mxu3 %v4496_v41 }
 0x3d5   : > { %1343 = vmatpush.bf16.msrb.mxu3 %v4495_v42 }
 0x3d9   : > { %1344 = vmatpush.bf16.msrb.mxu3 %v4494_v43 }
 0x3dd   : > { %1345 = vmatpush.bf16.msrb.mxu3 %v4493_v46  ;;  %v4502_v46 = vld [vmem:[#allocation8 + $0x48] sm:$0xff] }
 0x433   : > { %v1144_v63 = vpop.f32.mrf.mxu1  ;;  %v1163_v0 = vpop.f32.mrf.mxu2 }
 0x434   : > { %v1145_v1 = vadd.f32 %v1144_v63, %v1038_v17  ;;  %v4508_v63 = vld [vmem:[#allocation8 + $0x78] sm:$0xff] }
 0x435   : > { %1425 = vmatpush.bf16.msra.mxu0 %v4508_v63 }
 0x436   : > { %v1164_v4 = vadd.f32 %v1163_v0, %v1145_v1 }
 0x438   : > { %v1173_v5 = vadd.f32 %v1164_v4, %v5511_v2 }
 0x43a   : > { %1177 = vadd.xlane.f32.xlu2 %v1173_v5 }
 0x43b   : > { %v1146_v21 = vpop.f32.mrf.mxu1  ;;  %v1165_v6 = vpop.f32.mrf.mxu2 }
 0x43c   : > { %v1147_v7 = vadd.f32 %v1146_v21, %v1038_v17  ;;  %v4507_v21 = vld [vmem:[#allocation8 + $0x70] sm:$0xff] }
 0x43d   : > { %1426 = vmatpush.bf16.msra.mxu0 %v4507_v21 }
 0x43e   : > { %v1166_v8 = vadd.f32 %v1165_v6, %v1147_v7 }
 0x440   : > { %v1174_v9 = vadd.f32 %v1166_v8, %v5513_v3 }
 0x442   : > { %1179 = vadd.xlane.f32.xlu0 %v1174_v9 }
 0x443   : > { %v1149_v10 = vpop.f32.mrf.mxu1  ;;  %v1168_v11 = vpop.f32.mrf.mxu2 }
 0x444   : > { %v1150_v12 = vadd.f32 %v1149_v10, %v1038_v17  ;;  %v1257_v10 = vperm.slane %v5477_v48, 5 }
 0x446   : > { %v1169_v13 = vadd.f32 %v1168_v11, %v1150_v12 }
 0x448   : > { %v1175_v15 = vadd.f32 %v1169_v13, %v5519_v18  ;;  %v4506_v13 = vld [vmem:[#allocation8 + $0x68] sm:$0xff] }
 0x449   : > { %1427 = vmatpush.bf16.msra.mxu0 %v4506_v13 }
 0x44a   : > { %1181 = vadd.xlane.f32.xlu1 %v1175_v15 }
 0x44b   : > { %v1151_v16 = vpop.f32.mrf.mxu1  ;;  %v1170_v22 = vpop.f32.mrf.mxu2 }
 0x44c   : > { %v1152_v20 = vadd.f32 %v1151_v16, %v1038_v17 }
 0x44e   : > { %v1171_v25 = vadd.f32 %v1170_v22, %v1152_v20 }
 0x450   : > { %v1176_v2 = vadd.f32 %v1171_v25, %v5521_v19  ;;  %v1262_v25 = vperm.slane %v5477_v48, 6 }
 0x452   : > { %1183 = vadd.xlane.f32.xlu2 %v1176_v2 }
 0x4ad   : > { %v1178_v23 = vpop.xlane.xlu2 %1177 }
 0x4ae   : > { %v1185_v24 = vmul.f32 %v1178_v23, %v5481_v14 }
 0x4b0   : > { %v5532_v29 = vsub.f32 %v1173_v5, %v1185_v24  ;;  %v4505_v24 = vld [vmem:[#allocation8 + $0x60] sm:$0xff] }
 0x4b1   : > { %1428 = vmatpush.bf16.msra.mxu0 %v4505_v24 }
 0x4b2   : > { %v1193_v3 = vmul.f32 %v5532_v29, %v5532_v29 }
 0x4b4   : > { %1197 = vadd.xlane.f32.xlu0 %v1193_v3 }
 0x4b5   : > { %v1180_v26 = vpop.xlane.xlu0 %1179 }
 0x4b6   : > { %v1186_v18 = vmul.f32 %v1180_v26, %v5481_v14 }
 0x4b8   : > { %v5537_v27 = vsub.f32 %v1174_v9, %v1186_v18 }
 0x4ba   : > { %v1194_v28 = vmul.f32 %v5537_v27, %v5537_v27 }
 0x4bc   : > { %1199 = vadd.xlane.f32.xlu1 %v1194_v28 }
 0x4bd   : > { %v1182_v19 = vpop.xlane.xlu1 %1181 }
 0x4be   : > { %v1187_v30 = vmul.f32 %v1182_v19, %v5481_v14 }
 0x4c0   : > { %v5542_v31 = vsub.f32 %v1175_v15, %v1187_v30 }
 0x4c2   : > { %v1195_v32 = vmul.f32 %v5542_v31, %v5542_v31 }
 0x4c4   : > { %1201 = vadd.xlane.f32.xlu2 %v1195_v32  ;;  %v4504_v32 = vld [vmem:[#allocation8 + $0x58] sm:$0xff] }
 0x4c5   : > { %v1184_v33 = vpop.xlane.xlu2 %1183  ;;  %1429 = vmatpush.bf16.msra.mxu0 %v4504_v32 }
 0x4c6   : > { %v1188_v34 = vmul.f32 %v1184_v33, %v5481_v14 }
 0x4c8   : > { %v5547_v35 = vsub.f32 %v1176_v2, %v1188_v34 }
 0x4ca   : > { %v1196_v36 = vmul.f32 %v5547_v35, %v5547_v35 }
 0x4cc   : > { %1203 = vadd.xlane.f32.xlu0 %v1196_v36 }
 0x527   : > { %v1198_v44 = vpop.xlane.xlu0 %1197 }
 0x528   : > { %v1205_v45 = vmul.f32 %v1198_v44, %v5481_v14 }
 0x52a   : > { %v1209_v47 = vadd.f32 1e-05, %v1205_v45  ;;  %v4503_v45 = vld [vmem:[#allocation8 + $0x50] sm:$0xff] }
 0x52b   : > { %1430 = vmatpush.bf16.msra.mxu0 %v4503_v45  ;;  %v4518_v45 = vld [vmem:[#allocation10 + $0xc4] sm:$0xf0] }
 0x52c   : > { %4808 = vrsqrt.f32 %v1209_v47  ;;  %vm1219_vm14 = vweird.f32 %v1209_v47 }
 0x52f   : > { %v1200_v49 = vpop.xlane.xlu1 %1199  ;;  %1431 = vmatpush.bf16.msra.mxu0 %v4502_v46  ;;  %v4517_v46 = vld [vmem:[#allocation10 + $0xc4] sm:$0xf] }
 0x530   : > { %v1206_v50 = vmul.f32 %v1200_v49, %v5481_v14 }
 0x532   : > { %v4809_v51 = vpop.eup %4808  ;;  %v1210_v52 = vadd.f32 1e-05, %v1206_v50 }
 0x533   : > { %v1214_v53 = vmul.f32 %v4809_v51, %v1209_v47  ;;  %vm1220_vm13 = vweird.f32 %v4809_v51  ;;  %v4501_v47 = vld [vmem:[#allocation8 + $0x40] sm:$0xff] }
 0x534   : > { %4810 = vrsqrt.f32 %v1210_v52  ;;  %vm1221_vm15 = vmor %vm1219_vm14, %vm1220_vm13  ;;  %vm1229_vm1 = vweird.f32 %v1210_v52  ;;  %1432 = vmatpush.bf16.msra.mxu0 %v4501_v47 }
 0x535   : > { %v1215_v54 = vmul.f32 %v4809_v51, %v1214_v53 }
 0x537   : > { %v1216_v55 = vmul.f32 0.5, %v1215_v54  ;;  %v1202_v56 = vpop.xlane.xlu2 %1201 }
 0x538   : > { %v1207_v57 = vmul.f32 %v1202_v56, %v5481_v14 }
 0x539   : > { %v1217_v58 = vsub.f32 1.5, %v1216_v55 }
 0x53a   : > { %v4811_v59 = vpop.eup %4810  ;;  %v1211_v60 = vadd.f32 1e-05, %v1207_v57 }
 0x53b   : > { %v1218_v61 = vmul.f32 %v4809_v51, %v1217_v58  ;;  %v1224_v62 = vmul.f32 %v4811_v59, %v1210_v52  ;;  %vm1230_vm0 = vweird.f32 %v4811_v59 }
 0x53c   : > { %4812 = vrsqrt.f32 %v1211_v60  ;;  %vm1231_vm2 = vmor %vm1229_vm1, %vm1230_vm0  ;;  %vm1239_vm4 = vweird.f32 %v1211_v60 }
 0x53d   : > { %v1225_v17 = vmul.f32 %v4811_v59, %v1224_v62  ;;  %v1222_v0 = vsel %vm1221_vm15, %v4809_v51, %v1218_v61 }
 0x53e   : > { %v1253_v8 = vmul.f32 %v1222_v0, %v5532_v29 }
 0x53f   : > { %v1226_v1 = vmul.f32 0.5, %v1225_v17  ;;  %v1204_v4 = vpop.xlane.xlu0 %1203 }
 0x540   : > { %v1208_v5 = vmul.f32 %v1204_v4, %v5481_v14  ;;  %v1258_v22 = vmul.f32 %v1257_v10, %v1253_v8 }
 0x541   : > { %v1227_v6 = vsub.f32 1.5, %v1226_v1 }
 0x542   : > { %v4813_v7 = vpop.eup %4812  ;;  %v1212_v9 = vadd.f32 1e-05, %v1208_v5  ;;  %v1263_v26 = vadd.f32 %v1262_v25, %v1258_v22 }
 0x543   : > { %v1228_v11 = vmul.f32 %v4811_v59, %v1227_v6  ;;  %v1234_v12 = vmul.f32 %v4813_v7, %v1211_v60  ;;  %vm1240_vm3 = vweird.f32 %v4813_v7 }
 0x544   : > { %4814 = vrsqrt.f32 %v1212_v9  ;;  %vm1241_vm5 = vmor %vm1239_vm4, %vm1240_vm3  ;;  %vm1249_vm7 = vweird.f32 %v1212_v9 }
 0x545   : > { %v1232_v15 = vsel %vm1231_vm2, %v4811_v59, %v1228_v11  ;;  %v1235_v16 = vmul.f32 %v4813_v7, %v1234_v12 }
 0x546   : > { %v1254_v20 = vmul.f32 %v1232_v15, %v5537_v27 }
 0x547   : > { %v1236_v2 = vmul.f32 0.5, %v1235_v16 }
 0x548   : > { %v1259_v23 = vmul.f32 %v1257_v10, %v1254_v20 }
 0x549   : > { %v1237_v29 = vsub.f32 1.5, %v1236_v2 }
 0x54a   : > { %v4815_v3 = vpop.eup %4814  ;;  %v1264_v18 = vadd.f32 %v1262_v25, %v1259_v23 }
 0x54b   : > { %v1238_v28 = vmul.f32 %v4813_v7, %v1237_v29  ;;  %v1244_v19 = vmul.f32 %v4815_v3, %v1212_v9  ;;  %vm1250_vm6 = vweird.f32 %v4815_v3 }
 0x54c   : > { %v1270_v30 = vpack.c.bf16 %v1264_v18, %v1263_v26  ;;  %vm1251_vm8 = vmor %vm1249_vm7, %vm1250_vm6 }
 0x54d   : > { %v1245_v33 = vmul.f32 %v4815_v3, %v1244_v19  ;;  %v1242_v48 = vsel %vm1241_vm5, %v4813_v7, %v1238_v28  ;;  %v4523_v28 = vld [vmem:[#allocation10 + $0xf4] sm:$0xf] }
 0x54e   : > { %1346 = vmatmul.bf16.vlgmr.msrb.gmra.mxu3 %v1270_v30  ;;  %v1255_v36 = vmul.f32 %v1242_v48, %v5542_v31  ;;  %v5561_v31 = vld [vmem:[#allocation16 + $0x10] sm:$0xff]  ;;  %v4521_v48 = vld [vmem:[#allocation10 + $0xe4] sm:$0xf] }
 0x54f   : > { %v1246_v27 = vmul.f32 0.5, %v1245_v33  ;;  %v1289_v50 = vperm.slane %v5561_v31, 0  ;;  %v1376_v59 = vperm.slane %v5561_v31, 1  ;;  %v3947_v30 = vld [vmem:[#allocation10 + $0xf8] sm:$0xf0] }
 0x550   : > { %v1260_v40 = vmul.f32 %v1257_v10, %v1255_v36  ;;  %v3950_v32 = vor.u32 %v4523_v28, %v3947_v30  ;;  %v3937_v33 = vld [vmem:[#allocation10 + $0xe0] sm:$0xf]  ;;  %v3939_v36 = vld [vmem:[#allocation10 + $0xe8] sm:$0xf0] }
 0x551   : > { %v1247_v34 = vsub.f32 1.5, %v1246_v27  ;;  %v4522_v27 = vld [vmem:[#allocation10 + $0xe4] sm:$0xf0] }
 0x552   : > { %v1265_v42 = vadd.f32 %v1262_v25, %v1260_v40  ;;  %1658 = vmatpush.bf16.msra.mxu2 %v3950_v32  ;;  %v4519_v40 = vld [vmem:[#allocation10 + $0xd4] sm:$0xf] }
 0x553   : > { %v1248_v37 = vmul.f32 %v4815_v3, %v1247_v34  ;;  %v3938_v34 = vor.u32 %v4522_v27, %v3937_v33 }
 0x555   : > { %v1252_v38 = vsel %vm1251_vm8, %v4815_v3, %v1248_v37  ;;  %v3942_v37 = vor.u32 %v4521_v48, %v3939_v36  ;;  %v4532_v48 = vld [vmem:[#allocation11 + $0xb8] sm:$0xff] }
 0x556   : > { %v1256_v39 = vmul.f32 %v1252_v38, %v5547_v35  ;;  %v3929_v38 = vld [vmem:[#allocation10 + $0xd0] sm:$0xf]  ;;  %1819 = vmatpush.bf16.msra.mxu3 %v4532_v48 }
 0x557   : > { %1659 = vmatpush.bf16.msra.mxu2 %v3942_v37 }
 0x558   : > { %v1261_v41 = vmul.f32 %v1257_v10, %v1256_v39  ;;  %v4520_v39 = vld [vmem:[#allocation10 + $0xd4] sm:$0xf0] }
 0x55a   : > { %v1266_v43 = vadd.f32 %v1262_v25, %v1261_v41  ;;  %v3930_v41 = vor.u32 %v4520_v39, %v3929_v38 }
 0x55c   : > { %v1271_v44 = vpack.c.bf16 %v1266_v43, %v1265_v42 }
 0x55e   : > { %1351 = vmatmul.bf16.gmra.mxu3 %v1271_v44  ;;  %v3921_v44 = vld [vmem:[#allocation10 + $0xc0] sm:$0xf] }
 0x55f   : > { %v3922_v47 = vor.u32 %v4518_v45, %v3921_v44 }
 0x5d1   : > { %v1347_v49 = vpop.f32.mrf.mxu3 }
 0x5d2   : > { %v1348_v52 = vadd.f32 %v1347_v49, %v1289_v50  ;;  %v3923_v49 = vld [vmem:[#allocation10 + $0xc8] sm:$0xf0] }
 0x5d9   : > { %v1349_v51 = vpop.f32.mrf.mxu3 }
 0x5da   : > { %v1350_v35 = vadd.f32 %v1349_v51, %v1289_v50  ;;  %v3913_v51 = vld [vmem:[#allocation10 + $0xb0] sm:$0xf] }
 0x5dc   : > { %v1357_v53 = vpack.c.bf16 %v1350_v35, %v1348_v52  ;;  %v4516_v52 = vld [vmem:[#allocation10 + $0xb4] sm:$0xf0]  ;;  %v4515_v35 = vld [vmem:[#allocation10 + $0xb4] sm:$0xf] }
 0x5de   : > { %1433 = vmatmul.bf16.vlgmr.msra.gmra.mxu0 %v1357_v53  ;;  %v3914_v53 = vor.u32 %v4516_v52, %v3913_v51  ;;  %v4538_v51 = vld [vmem:[#allocation11 + $0xe8] sm:$0xff] }
 0x5e1   : > { %v1352_v54 = vpop.f32.mrf.mxu3 }
 0x5e2   : > { %v1353_v56 = vadd.f32 %v1352_v54, %v1289_v50  ;;  %v3915_v54 = vld [vmem:[#allocation10 + $0xb8] sm:$0xf0] }
 0x5e9   : > { %v1354_v55 = vpop.f32.mrf.mxu3 }
 0x5ea   : > { %v1355_v57 = vadd.f32 %v1354_v55, %v1289_v50  ;;  %v3926_v50 = vor.u32 %v4517_v46, %v3923_v49  ;;  %v3918_v55 = vor.u32 %v4515_v35, %v3915_v54  ;;  %v1528_v46 = vperm.slane %v5561_v31, 2 }
 0x5ec   : > { %v1358_v58 = vpack.c.bf16 %v1355_v57, %v1353_v56  ;;  %v3905_v56 = vld [vmem:[#allocation10 + $0xa0] sm:$0xf]  ;;  %v4514_v57 = vld [vmem:[#allocation10 + $0xa4] sm:$0xf0] }
 0x5ee   : > { %1438 = vmatmul.bf16.gmra.mxu0 %v1358_v58  ;;  %v4513_v58 = vld [vmem:[#allocation10 + $0xa4] sm:$0xf] }
 0x65b   : > { %v1434_v60 = vpop.f32.mrf.mxu0 }
 0x65c   : > { %v1435_v61 = vadd.f32 %v1434_v60, %v1376_v59  ;;  %v3907_v60 = vld [vmem:[#allocation10 + $0xa8] sm:$0xf0] }
 0x65e   : > { %v1444_v62 = vadd.f32 %v1435_v61, %v1263_v26  ;;  %v3945_v26 = vld [vmem:[#allocation10 + $0xf0] sm:$0xf]  ;;  %v3910_v61 = vor.u32 %v4513_v58, %v3907_v60 }
 0x660   : > { %1448 = vadd.xlane.f32.xlu1 %v1444_v62 }
 0x663   : > { %v1436_v17 = vpop.f32.mrf.mxu0 }
 0x664   : > { %v1437_v63 = vadd.f32 %v1436_v17, %v1376_v59  ;;  %v4512_v17 = vld [vmem:[#allocation10 + $0x94] sm:$0xf0] }
 0x666   : > { %v1445_v0 = vadd.f32 %v1437_v63, %v1264_v18  ;;  %v4524_v18 = vld [vmem:[#allocation10 + $0xf4] sm:$0xf0]  ;;  %v4511_v63 = vld [vmem:[#allocation10 + $0x94] sm:$0xf] }
 0x667   : > { %v3946_v19 = vor.u32 %v4524_v18, %v3945_v26 }
 0x668   : > { %1450 = vadd.xlane.f32.xlu2 %v1445_v0 }
 0x669   : > { %1639 = vmatpush.bf16.msra.mxu1 %v3946_v19 }
 0x66b   : > { %v1439_v1 = vpop.f32.mrf.mxu0 }
 0x66c   : > { %v1440_v4 = vadd.f32 %v1439_v1, %v1376_v59  ;;  %v3899_v1 = vld [vmem:[#allocation10 + $0x98] sm:$0xf0] }
 0x66d   : > { %1640 = vmatpush.bf16.msra.mxu1 %v3938_v34  ;;  %v4540_v34 = vld [vmem:[#allocation11 + $0xf8] sm:$0xff] }
 0x66e   : > { %v1446_v5 = vadd.f32 %v1440_v4, %v1265_v42  ;;  %v3931_v42 = vld [vmem:[#allocation10 + $0xd8] sm:$0xf0]  ;;  %v3902_v4 = vor.u32 %v4511_v63, %v3899_v1  ;;  %1838 = vmatpush.bf16.msrb.mxu0 %v4540_v34 }
 0x66f   : > { %v4528_v63 = vld [vmem:[#allocation11 + $0x98] sm:$0xff] }
 0x670   : > { %1452 = vadd.xlane.f32.xlu0 %v1446_v5 }
 0x671   : > { %1641 = vmatpush.bf16.msra.mxu1 %v3930_v41  ;;  %v4539_v41 = vld [vmem:[#allocation11 + $0xf0] sm:$0xff] }
 0x672   : > { %1839 = vmatpush.bf16.msrb.mxu0 %v4539_v41 }
 0x673   : > { %v1441_v21 = vpop.f32.mrf.mxu0 }
 0x674   : > { %v1442_v6 = vadd.f32 %v1441_v21, %v1376_v59  ;;  %v3906_v59 = vor.u32 %v4514_v57, %v3905_v56  ;;  %v4529_v57 = vld [vmem:[#allocation11 + $0xa0] sm:$0xff] }
 0x675   : > { %1642 = vmatpush.bf16.msra.mxu1 %v3922_v47 }
 0x676   : > { %v1447_v7 = vadd.f32 %v1442_v6, %v1266_v43  ;;  %v3934_v43 = vor.u32 %v4519_v40, %v3931_v42  ;;  %v3889_v6 = vld [vmem:[#allocation10 + $0x80] sm:$0xf]  ;;  %v4531_v40 = vld [vmem:[#allocation11 + $0xb0] sm:$0xff]  ;;  %1840 = vmatpush.bf16.msrb.mxu0 %v4538_v51 }
 0x677   : > { %1820 = vmatpush.bf16.msra.mxu3 %v4531_v40 }
 0x678   : > { %1454 = vadd.xlane.f32.xlu1 %v1447_v7  ;;  %1660 = vmatpush.bf16.msra.mxu2 %v3934_v43 }
 0x679   : > { %1643 = vmatpush.bf16.msra.mxu1 %v3914_v53 }
 0x67c   : > { %1661 = vmatpush.bf16.msra.mxu2 %v3926_v50  ;;  %v4530_v50 = vld [vmem:[#allocation11 + $0xa8] sm:$0xff] }
 0x67d   : > { %1644 = vmatpush.bf16.msra.mxu1 %v3906_v59  ;;  %1821 = vmatpush.bf16.msra.mxu3 %v4530_v50 }
 0x680   : > { %1662 = vmatpush.bf16.msra.mxu2 %v3918_v55  ;;  %v1533_v55 = vperm.slane %v5561_v31, 3 }
 0x681   : > { %1822 = vmatpush.bf16.msra.mxu3 %v4529_v57 }
 0x684   : > { %1663 = vmatpush.bf16.msra.mxu2 %v3910_v61 }
 0x685   : > { %1823 = vmatpush.bf16.msra.mxu3 %v4528_v63 }
 0x688   : > { %1664 = vmatpush.bf16.msra.mxu2 %v3902_v4 }
 0x6d3   : > { %v1449_v8 = vpop.xlane.xlu1 %1448 }
 0x6d4   : > { %v1456_v9 = vmul.f32 %v1449_v8, %v5481_v14  ;;  %v4509_v8 = vld [vmem:[#allocation10 + $0x84] sm:$0xf] }
 0x6d6   : > { %v5566_v10 = vsub.f32 %v1444_v62, %v1456_v9  ;;  %v3897_v62 = vld [vmem:[#allocation10 + $0x90] sm:$0xf] }
 0x6d8   : > { %v1464_v11 = vmul.f32 %v5566_v10, %v5566_v10 }
 0x6da   : > { %1468 = vadd.xlane.f32.xlu2 %v1464_v11  ;;  %v3891_v11 = vld [vmem:[#allocation10 + $0x88] sm:$0xf0] }
 0x6db   : > { %v1451_v12 = vpop.xlane.xlu2 %1450 }
 0x6dc   : > { %v1457_v13 = vmul.f32 %v1451_v12, %v5481_v14 }
 0x6de   : > { %v5571_v15 = vsub.f32 %v1445_v0, %v1457_v13  ;;  %v3898_v0 = vor.u32 %v4512_v17, %v3897_v62  ;;  %v3894_v13 = vor.u32 %v4509_v8, %v3891_v11 }
 0x6e0   : > { %v1465_v16 = vmul.f32 %v5571_v15, %v5571_v15  ;;  %1645 = vmatpush.bf16.msra.mxu1 %v3898_v0  ;;  %1665 = vmatpush.bf16.msra.mxu2 %v3894_v13 }
 0x6e2   : > { %1470 = vadd.xlane.f32.xlu0 %v1465_v16 }
 0x6e3   : > { %v1453_v20 = vpop.xlane.xlu0 %1452 }
 0x6e4   : > { %v1458_v22 = vmul.f32 %v1453_v20, %v5481_v14 }
 0x6e6   : > { %v5576_v25 = vsub.f32 %v1446_v5, %v1458_v22 }
 0x6e8   : > { %v1466_v2 = vmul.f32 %v5576_v25, %v5576_v25 }
 0x6ea   : > { %1472 = vadd.xlane.f32.xlu1 %v1466_v2 }
 0x6eb   : > { %v1455_v23 = vpop.xlane.xlu1 %1454 }
 0x6ec   : > { %v1459_v24 = vmul.f32 %v1455_v23, %v5481_v14 }
 0x6ee   : > { %v5581_v29 = vsub.f32 %v1447_v7, %v1459_v24  ;;  %v4510_v7 = vld [vmem:[#allocation10 + $0x84] sm:$0xf0] }
 0x6ef   : > { %v3890_v9 = vor.u32 %v4510_v7, %v3889_v6 }
 0x6f0   : > { %v1467_v3 = vmul.f32 %v5581_v29, %v5581_v29 }
 0x6f1   : > { %1646 = vmatpush.bf16.msra.mxu1 %v3890_v9 }
 0x6f2   : > { %1474 = vadd.xlane.f32.xlu2 %v1467_v3 }
 0x74d   : > { %v1469_v5 = vpop.xlane.xlu2 %1468 }
 0x74e   : > { %v1476_v21 = vmul.f32 %v1469_v5, %v5481_v14 }
 0x750   : > { %v1480_v12 = vadd.f32 1e-05, %v1476_v21 }
 0x752   : > { %4816 = vrsqrt.f32 %v1480_v12  ;;  %vm1490_vm10 = vweird.f32 %v1480_v12 }
 0x755   : > { %v1471_v16 = vpop.xlane.xlu0 %1470 }
 0x756   : > { %v1477_v20 = vmul.f32 %v1471_v16, %v5481_v14 }
 0x758   : > { %v4817_v22 = vpop.eup %4816  ;;  %v1481_v2 = vadd.f32 1e-05, %v1477_v20  ;;  %v4537_v20 = vld [vmem:[#allocation11 + $0xe0] sm:$0xff] }
 0x759   : > { %v1485_v23 = vmul.f32 %v4817_v22, %v1480_v12  ;;  %vm1491_vm9 = vweird.f32 %v4817_v22  ;;  %1841 = vmatpush.bf16.msrb.mxu0 %v4537_v20 }
 0x75a   : > { %4818 = vrsqrt.f32 %v1481_v2  ;;  %vm1492_vm11 = vmor %vm1490_vm10, %vm1491_vm9  ;;  %vm1500_vm13 = vweird.f32 %v1481_v2 }
 0x75b   : > { %v1486_v24 = vmul.f32 %v4817_v22, %v1485_v23  ;;  %v4525_v23 = vld [vmem:[#allocation11 + $0x80] sm:$0xff] }
 0x75d   : > { %v1487_v3 = vmul.f32 0.5, %v1486_v24  ;;  %v1473_v26 = vpop.xlane.xlu1 %1472  ;;  %v4534_v24 = vld [vmem:[#allocation11 + $0xc8] sm:$0xff] }
 0x75e   : > { %v1478_v18 = vmul.f32 %v1473_v26, %v5481_v14 }
 0x75f   : > { %v1488_v28 = vsub.f32 1.5, %v1487_v3  ;;  %v4533_v3 = vld [vmem:[#allocation11 + $0xc0] sm:$0xff] }
 0x760   : > { %v4819_v19 = vpop.eup %4818  ;;  %v1482_v30 = vadd.f32 1e-05, %v1478_v18  ;;  %v1557_v18 = vperm.slane %v5561_v31, 7 }
 0x761   : > { %v1489_v32 = vmul.f32 %v4817_v22, %v1488_v28  ;;  %v1495_v33 = vmul.f32 %v4819_v19, %v1481_v2  ;;  %vm1501_vm12 = vweird.f32 %v4819_v19  ;;  %v4526_v2 = vld [vmem:[#allocation11 + $0x88] sm:$0xff]  ;;  %v1269_v28 = vld [vmem:[#allocation16 + $0x18] sm:$0xff] }
 0x762   : > { %4820 = vrsqrt.f32 %v1482_v30  ;;  %vm1502_vm14 = vmor %vm1500_vm13, %vm1501_vm12  ;;  %vm1510_vm0 = vweird.f32 %v1482_v30 }
 0x763   : > { %v1496_v27 = vmul.f32 %v4819_v19, %v1495_v33  ;;  %v1493_v36 = vsel %vm1492_vm11, %v4817_v22, %v1489_v32  ;;  %v4536_v22 = vld [vmem:[#allocation11 + $0xd8] sm:$0xff]  ;;  %v1558_v33 = vperm.slane %v1269_v28, 7 }
 0x764   : > { %v1524_v44 = vmul.f32 %v1493_v36, %v5566_v10  ;;  %1842 = vmatpush.bf16.msrb.mxu0 %v4536_v22 }
 0x765   : > { %v1497_v37 = vmul.f32 0.5, %v1496_v27  ;;  %v1475_v38 = vpop.xlane.xlu2 %1474 }
 0x766   : > { %v1479_v39 = vmul.f32 %v1475_v38, %v5481_v14  ;;  %v1529_v54 = vmul.f32 %v1528_v46, %v1524_v44 }
 0x767   : > { %v1498_v42 = vsub.f32 1.5, %v1497_v37 }
 0x768   : > { %v4821_v43 = vpop.eup %4820  ;;  %v1483_v45 = vadd.f32 1e-05, %v1479_v39  ;;  %v5593_v60 = vadd.f32 %v1533_v55, %v1529_v54 }
 0x769   : > { %v1499_v47 = vmul.f32 %v4819_v19, %v1498_v42  ;;  %v1505_v49 = vmul.f32 %v4821_v43, %v1482_v30  ;;  %vm1511_vm15 = vweird.f32 %v4821_v43 }
 0x76a   : > { %4822 = vrsqrt.f32 %v1483_v45  ;;  %vm1512_vm1 = vmor %vm1510_vm0, %vm1511_vm15  ;;  %vm1520_vm3 = vweird.f32 %v1483_v45 }
 0x76b   : > { %v1503_v52 = vsel %vm1502_vm14, %v4819_v19, %v1499_v47  ;;  %v1506_v35 = vmul.f32 %v4821_v43, %v1505_v49 }
 0x76c   : > { %v1525_v53 = vmul.f32 %v1503_v52, %v5571_v15 }
 0x76d   : > { %v1507_v10 = vmul.f32 0.5, %v1506_v35 }
 0x76e   : > { %v1530_v56 = vmul.f32 %v1528_v46, %v1525_v53 }
 0x76f   : > { %v1508_v58 = vsub.f32 1.5, %v1507_v10 }
 0x770   : > { %v4823_v59 = vpop.eup %4822  ;;  %v5595_v61 = vadd.f32 %v1533_v55, %v1530_v56  ;;  %v1722_v56 = vperm.slane %v5561_v31, 4 }
 0x771   : > { %v1509_v62 = vmul.f32 %v4821_v43, %v1508_v58  ;;  %v1515_v17 = vmul.f32 %v4823_v59, %v1483_v45  ;;  %vm1521_vm2 = vweird.f32 %v4823_v59 }
 0x772   : > { %v1538_v15 = vpack.c.bf16 %v5595_v61, %v5593_v60  ;;  %vm1522_vm4 = vmor %vm1520_vm3, %vm1521_vm2 }
 0x773   : > { %v1516_v0 = vmul.f32 %v4823_v59, %v1515_v17  ;;  %v1513_v4 = vsel %vm1512_vm1, %v4821_v43, %v1509_v62 }
 0x774   : > { %1647 = vmatmul.bf16.vlgmr.msra.gmra.mxu1 %v1538_v15  ;;  %1666 = vmatmul.bf16.vlgmr.msra.gmra.mxu2 %v1538_v15  ;;  %v1526_v21 = vmul.f32 %v1513_v4, %v5576_v25  ;;  %v4527_v25 = vld [vmem:[#allocation11 + $0x90] sm:$0xff] }
 0x775   : > { %v1517_v1 = vmul.f32 0.5, %v1516_v0  ;;  %1824 = vmatpush.bf16.msra.mxu3 %v4527_v25 }
 0x776   : > { %v1531_v9 = vmul.f32 %v1528_v46, %v1526_v21 }
 0x777   : > { %v1518_v5 = vsub.f32 1.5, %v1517_v1 }
 0x778   : > { %v5601_v12 = vadd.f32 %v1533_v55, %v1531_v9 }
 0x779   : > { %v1519_v6 = vmul.f32 %v4823_v59, %v1518_v5  ;;  %1825 = vmatpush.bf16.msra.mxu3 %v4526_v2 }
 0x77b   : > { %v1523_v7 = vsel %vm1522_vm4, %v4823_v59, %v1519_v6 }
 0x77c   : > { %v1527_v8 = vmul.f32 %v1523_v7, %v5581_v29  ;;  %v4535_v29 = vld [vmem:[#allocation11 + $0xd0] sm:$0xff] }
 0x77d   : > { %1843 = vmatpush.bf16.msrb.mxu0 %v4535_v29  ;;  %1826 = vmatpush.bf16.msra.mxu3 %v4525_v23 }
 0x77e   : > { %v1532_v11 = vmul.f32 %v1528_v46, %v1527_v8 }
 0x780   : > { %v5603_v13 = vadd.f32 %v1533_v55, %v1532_v11 }
 0x781   : > { %1844 = vmatpush.bf16.msrb.mxu0 %v4534_v24 }
 0x782   : > { %v1539_v16 = vpack.c.bf16 %v5603_v13, %v5601_v12 }
 0x784   : > { %1652 = vmatmul.bf16.gmra.mxu1 %v1539_v16  ;;  %1671 = vmatmul.bf16.gmra.mxu2 %v1539_v16 }
 0x785   : > { %1845 = vmatpush.bf16.msrb.mxu0 %v4533_v3 }
 0x7f1   : > { %v1648_v26 = vpop.f32.mrf.mxu1 }
 0x7f2   : > { %v1649_v30 = vadd.f32 %v1648_v26, %v1557_v18 }
 0x7f4   : > { %v1677_v48 = vmax.f32 %v1649_v30, 0.0 }
 0x7f7   : > { %v1667_v19 = vpop.f32.mrf.mxu2 }
 0x7f8   : > { %v1668_v36 = vadd.f32 %v1667_v19, %v1558_v33 }
 0x7f9   : > { %v1650_v32 = vpop.f32.mrf.mxu1 }
 0x7fa   : > { %v1651_v27 = vadd.f32 %v1650_v32, %v1557_v18  ;;  %v1678_v41 = vmax.f32 %v1668_v36, 0.0  ;;  %v4544_v36 = vld [vmem:[#allocation7 + $0x98] sm:$0xff] }
 0x7fc   : > { %v1679_v34 = vmax.f32 %v1651_v27, 0.0  ;;  %v4547_v27 = vld [vmem:[#allocation7 + $0xb0] sm:$0xff] }
 0x7fe   : > { %v1685_v37 = vpack.c.bf16 %v1679_v34, %v1677_v48  ;;  %v4546_v48 = vld [vmem:[#allocation7 + $0xa8] sm:$0xff]  ;;  %v4545_v34 = vld [vmem:[#allocation7 + $0xa0] sm:$0xff] }
 0x7ff   : > { %v1669_v38 = vpop.f32.mrf.mxu2 }
 0x800   : > { %v1670_v39 = vadd.f32 %v1669_v38, %v1558_v33  ;;  %1827 = vmatmul.bf16.vlgmr.msra.gmra.mxu3 %v1685_v37  ;;  %v4543_v37 = vld [vmem:[#allocation7 + $0x90] sm:$0xff]  ;;  %v4542_v38 = vld [vmem:[#allocation7 + $0x88] sm:$0xff] }
 0x801   : > { %v1653_v40 = vpop.f32.mrf.mxu1 }
 0x802   : > { %v1680_v42 = vmax.f32 %v1670_v39, 0.0  ;;  %v1654_v45 = vadd.f32 %v1653_v40, %v1557_v18 }
 0x804   : > { %v1686_v43 = vpack.c.bf16 %v1680_v42, %v1678_v41  ;;  %v1681_v49 = vmax.f32 %v1654_v45, 0.0  ;;  %v4541_v41 = vld [vmem:[#allocation7 + $0x80] sm:$0xff] }
 0x806   : > { %1846 = vmatmul.bf16.vlgmr.msrb.gmra.mxu0 %v1686_v43 }
 0x807   : > { %v1672_v44 = vpop.f32.mrf.mxu2 }
 0x808   : > { %v1673_v51 = vadd.f32 %v1672_v44, %v1558_v33 }
 0x809   : > { %v1655_v46 = vpop.f32.mrf.mxu1 }
 0x80a   : > { %v1656_v47 = vadd.f32 %v1655_v46, %v1557_v18  ;;  %v1682_v54 = vmax.f32 %v1673_v51, 0.0 }
 0x80c   : > { %v1683_v50 = vmax.f32 %v1656_v47, 0.0 }
 0x80e   : > { %v1687_v52 = vpack.c.bf16 %v1683_v50, %v1681_v49 }
 0x80f   : > { %v1674_v35 = vpop.f32.mrf.mxu2 }
 0x810   : > { %v1675_v53 = vadd.f32 %v1674_v35, %v1558_v33  ;;  %1832 = vmatmul.bf16.gmra.mxu3 %v1687_v52  ;;  %v4548_v33 = vld [vmem:[#allocation7 + $0xb8] sm:$0xff] }
 0x811   : > { %2022 = vmatpush.bf16.msrb.mxu1 %v4548_v33 }
 0x812   : > { %v1684_v55 = vmax.f32 %v1675_v53, 0.0 }
 0x814   : > { %v1688_v10 = vpack.c.bf16 %v1684_v55, %v1682_v54 }
 0x815   : > { %2023 = vmatpush.bf16.msrb.mxu1 %v4547_v27 }
 0x816   : > { %1851 = vmatmul.bf16.gmra.mxu0 %v1688_v10 }
 0x819   : > { %2024 = vmatpush.bf16.msrb.mxu1 %v4546_v48 }
 0x81d   : > { %2025 = vmatpush.bf16.msrb.mxu1 %v4545_v34 }
 0x821   : > { %2026 = vmatpush.bf16.msrb.mxu1 %v4544_v36 }
 0x825   : > { %2027 = vmatpush.bf16.msrb.mxu1 %v4543_v37 }
 0x829   : > { %2028 = vmatpush.bf16.msrb.mxu1 %v4542_v38 }
 0x82d   : > { %2029 = vmatpush.bf16.msrb.mxu1 %v4541_v41  ;;  %v4550_v41 = vld [vmem:[#allocation8 + $0x88] sm:$0xff] }
 0x883   : > { %v1828_v57 = vpop.f32.mrf.mxu3  ;;  %v1847_v58 = vpop.f32.mrf.mxu0 }
 0x884   : > { %v1829_v59 = vadd.f32 %v1828_v57, %v1722_v56  ;;  %v4556_v57 = vld [vmem:[#allocation8 + $0xb8] sm:$0xff] }
 0x885   : > { %2109 = vmatpush.bf16.msrb.mxu2 %v4556_v57 }
 0x886   : > { %v1848_v62 = vadd.f32 %v1847_v58, %v1829_v59 }
 0x888   : > { %v1857_v17 = vadd.f32 %v1848_v62, %v5593_v60 }
 0x88a   : > { %1861 = vadd.xlane.f32.xlu0 %v1857_v17 }
 0x88b   : > { %v1830_v15 = vpop.f32.mrf.mxu3  ;;  %v1849_v63 = vpop.f32.mrf.mxu0 }
 0x88c   : > { %v1831_v0 = vadd.f32 %v1830_v15, %v1722_v56  ;;  %v4555_v15 = vld [vmem:[#allocation8 + $0xb0] sm:$0xff] }
 0x88d   : > { %2110 = vmatpush.bf16.msrb.mxu2 %v4555_v15 }
 0x88e   : > { %v1850_v1 = vadd.f32 %v1849_v63, %v1831_v0 }
 0x890   : > { %v1858_v4 = vadd.f32 %v1850_v1, %v5595_v61 }
 0x892   : > { %1863 = vadd.xlane.f32.xlu1 %v1858_v4 }
 0x893   : > { %v1833_v5 = vpop.f32.mrf.mxu3  ;;  %v1852_v21 = vpop.f32.mrf.mxu0 }
 0x894   : > { %v1834_v6 = vadd.f32 %v1833_v5, %v1722_v56  ;;  %v1941_v5 = vperm.slane %v5561_v31, 5 }
 0x896   : > { %v1853_v7 = vadd.f32 %v1852_v21, %v1834_v6 }
 0x898   : > { %v1859_v8 = vadd.f32 %v1853_v7, %v5601_v12  ;;  %v4554_v7 = vld [vmem:[#allocation8 + $0xa8] sm:$0xff] }
 0x899   : > { %2111 = vmatpush.bf16.msrb.mxu2 %v4554_v7 }
 0x89a   : > { %1865 = vadd.xlane.f32.xlu2 %v1859_v8 }
 0x89b   : > { %v1835_v9 = vpop.f32.mrf.mxu3  ;;  %v1854_v16 = vpop.f32.mrf.mxu0 }
 0x89c   : > { %v1836_v11 = vadd.f32 %v1835_v9, %v1722_v56 }
 0x89e   : > { %v1855_v20 = vadd.f32 %v1854_v16, %v1836_v11 }
 0x8a0   : > { %v1860_v60 = vadd.f32 %v1855_v20, %v5603_v13  ;;  %v1946_v20 = vperm.slane %v5561_v31, 6 }
 0x8a2   : > { %1867 = vadd.xlane.f32.xlu0 %v1860_v60 }
 0x8fd   : > { %v1862_v25 = vpop.xlane.xlu0 %1861 }
 0x8fe   : > { %v1869_v22 = vmul.f32 %v1862_v25, %v5481_v14 }
 0x900   : > { %v5614_v2 = vsub.f32 %v1857_v17, %v1869_v22  ;;  %v4553_v22 = vld [vmem:[#allocation8 + $0xa0] sm:$0xff] }
 0x901   : > { %2112 = vmatpush.bf16.msrb.mxu2 %v4553_v22 }
 0x902   : > { %v1877_v61 = vmul.f32 %v5614_v2, %v5614_v2 }
 0x904   : > { %1881 = vadd.xlane.f32.xlu1 %v1877_v61 }
 0x905   : > { %v1864_v29 = vpop.xlane.xlu1 %1863 }
 0x906   : > { %v1870_v12 = vmul.f32 %v1864_v29, %v5481_v14 }
 0x908   : > { %v5619_v23 = vsub.f32 %v1858_v4, %v1870_v12 }
 0x90a   : > { %v1878_v24 = vmul.f32 %v5619_v23, %v5619_v23 }
 0x90c   : > { %1883 = vadd.xlane.f32.xlu2 %v1878_v24 }
 0x90d   : > { %v1866_v13 = vpop.xlane.xlu2 %1865 }
 0x90e   : > { %v1871_v3 = vmul.f32 %v1866_v13, %v5481_v14 }
 0x910   : > { %v5624_v26 = vsub.f32 %v1859_v8, %v1871_v3 }
 0x912   : > { %v1879_v18 = vmul.f32 %v5624_v26, %v5624_v26 }
 0x914   : > { %1885 = vadd.xlane.f32.xlu0 %v1879_v18  ;;  %v4552_v18 = vld [vmem:[#allocation8 + $0x98] sm:$0xff] }
 0x915   : > { %v1868_v28 = vpop.xlane.xlu0 %1867  ;;  %2113 = vmatpush.bf16.msrb.mxu2 %v4552_v18 }
 0x916   : > { %v1872_v19 = vmul.f32 %v1868_v28, %v5481_v14 }
 0x918   : > { %v5629_v30 = vsub.f32 %v1860_v60, %v1872_v19 }
 0x91a   : > { %v1880_v32 = vmul.f32 %v5629_v30, %v5629_v30 }
 0x91c   : > { %1887 = vadd.xlane.f32.xlu1 %v1880_v32 }
 0x977   : > { %v1882_v39 = vpop.xlane.xlu1 %1881 }
 0x978   : > { %v1889_v40 = vmul.f32 %v1882_v39, %v5481_v14 }
 0x97a   : > { %v1893_v42 = vadd.f32 1e-05, %v1889_v40  ;;  %v4551_v40 = vld [vmem:[#allocation8 + $0x90] sm:$0xff] }
 0x97b   : > { %2114 = vmatpush.bf16.msrb.mxu2 %v4551_v40  ;;  %v4566_v40 = vld [vmem:[#allocation10 + $0x144] sm:$0xf0] }
 0x97c   : > { %4824 = vrsqrt.f32 %v1893_v42  ;;  %vm1903_vm6 = vweird.f32 %v1893_v42 }
 0x97f   : > { %v1884_v43 = vpop.xlane.xlu2 %1883  ;;  %2115 = vmatpush.bf16.msrb.mxu2 %v4550_v41  ;;  %v4565_v41 = vld [vmem:[#allocation10 + $0x144] sm:$0xf] }
 0x980   : > { %v1890_v44 = vmul.f32 %v1884_v43, %v5481_v14 }
 0x982   : > { %v4825_v45 = vpop.eup %4824  ;;  %v1894_v46 = vadd.f32 1e-05, %v1890_v44 }
 0x983   : > { %v1898_v47 = vmul.f32 %v4825_v45, %v1893_v42  ;;  %vm1904_vm5 = vweird.f32 %v4825_v45  ;;  %v4549_v42 = vld [vmem:[#allocation8 + $0x80] sm:$0xff] }
 0x984   : > { %4826 = vrsqrt.f32 %v1894_v46  ;;  %vm1905_vm7 = vmor %vm1903_vm6, %vm1904_vm5  ;;  %vm1913_vm9 = vweird.f32 %v1894_v46  ;;  %2116 = vmatpush.bf16.msrb.mxu2 %v4549_v42 }
 0x985   : > { %v1899_v49 = vmul.f32 %v4825_v45, %v1898_v47 }
 0x987   : > { %v1900_v50 = vmul.f32 0.5, %v1899_v49  ;;  %v1886_v51 = vpop.xlane.xlu0 %1885 }
 0x988   : > { %v1891_v52 = vmul.f32 %v1886_v51, %v5481_v14 }
 0x989   : > { %v1901_v35 = vsub.f32 1.5, %v1900_v50 }
 0x98a   : > { %v4827_v53 = vpop.eup %4826  ;;  %v1895_v54 = vadd.f32 1e-05, %v1891_v52 }
 0x98b   : > { %v1902_v55 = vmul.f32 %v4825_v45, %v1901_v35  ;;  %v1908_v10 = vmul.f32 %v4827_v53, %v1894_v46  ;;  %vm1914_vm8 = vweird.f32 %v4827_v53 }
 0x98c   : > { %4828 = vrsqrt.f32 %v1895_v54  ;;  %vm1915_vm10 = vmor %vm1913_vm9, %vm1914_vm8  ;;  %vm1923_vm12 = vweird.f32 %v1895_v54 }
 0x98d   : > { %v1909_v56 = vmul.f32 %v4827_v53, %v1908_v10  ;;  %v1906_v58 = vsel %vm1905_vm7, %v4825_v45, %v1902_v55 }
 0x98e   : > { %v1937_v1 = vmul.f32 %v1906_v58, %v5614_v2 }
 0x98f   : > { %v1910_v59 = vmul.f32 0.5, %v1909_v56  ;;  %v1888_v62 = vpop.xlane.xlu1 %1887 }
 0x990   : > { %v1892_v17 = vmul.f32 %v1888_v62, %v5481_v14  ;;  %v1942_v16 = vmul.f32 %v1941_v5, %v1937_v1 }
 0x991   : > { %v1911_v63 = vsub.f32 1.5, %v1910_v59 }
 0x992   : > { %v4829_v0 = vpop.eup %4828  ;;  %v1896_v4 = vadd.f32 1e-05, %v1892_v17  ;;  %v1947_v29 = vadd.f32 %v1946_v20, %v1942_v16 }
 0x993   : > { %v1912_v21 = vmul.f32 %v4827_v53, %v1911_v63  ;;  %v1918_v6 = vmul.f32 %v4829_v0, %v1895_v54  ;;  %vm1924_vm11 = vweird.f32 %v4829_v0 }
 0x994   : > { %4830 = vrsqrt.f32 %v1896_v4  ;;  %vm1925_vm13 = vmor %vm1923_vm12, %vm1924_vm11  ;;  %vm1933_vm15 = vweird.f32 %v1896_v4 }
 0x995   : > { %v1916_v8 = vsel %vm1915_vm10, %v4827_v53, %v1912_v21  ;;  %v1919_v9 = vmul.f32 %v4829_v0, %v1918_v6 }
 0x996   : > { %v1938_v11 = vmul.f32 %v1916_v8, %v5619_v23 }
 0x997   : > { %v1920_v60 = vmul.f32 0.5, %v1919_v9 }
 0x998   : > { %v1943_v25 = vmul.f32 %v1941_v5, %v1938_v11 }
 0x999   : > { %v1921_v2 = vsub.f32 1.5, %v1920_v60 }
 0x99a   : > { %v4831_v61 = vpop.eup %4830  ;;  %v1948_v12 = vadd.f32 %v1946_v20, %v1943_v25 }
 0x99b   : > { %v1922_v24 = vmul.f32 %v4829_v0, %v1921_v2  ;;  %v1928_v13 = vmul.f32 %v4831_v61, %v1896_v4  ;;  %vm1934_vm14 = vweird.f32 %v4831_v61 }
 0x99c   : > { %v1954_v3 = vpack.c.bf16 %v1948_v12, %v1947_v29  ;;  %vm1935_vm0 = vmor %vm1933_vm15, %vm1934_vm14 }
 0x99d   : > { %v1929_v28 = vmul.f32 %v4831_v61, %v1928_v13  ;;  %v1926_v31 = vsel %vm1925_vm13, %v4829_v0, %v1922_v24  ;;  %v4571_v24 = vld [vmem:[#allocation10 + $0x174] sm:$0xf] }
 0x99e   : > { %2030 = vmatmul.bf16.vlgmr.msrb.gmra.mxu1 %v1954_v3  ;;  %v1939_v32 = vmul.f32 %v1926_v31, %v5624_v26  ;;  %v5643_v26 = vld [vmem:[#allocation16 + $0x20] sm:$0xff]  ;;  %v4139_v3 = vld [vmem:[#allocation10 + $0x178] sm:$0xf0]  ;;  %v4569_v31 = vld [vmem:[#allocation10 + $0x164] sm:$0xf] }
 0x99f   : > { %v1930_v23 = vmul.f32 0.5, %v1929_v28  ;;  %v1973_v44 = vperm.slane %v5643_v26, 0  ;;  %v2060_v53 = vperm.slane %v5643_v26, 1  ;;  %v4142_v18 = vor.u32 %v4571_v24, %v4139_v3  ;;  %v4129_v28 = vld [vmem:[#allocation10 + $0x160] sm:$0xf] }
 0x9a0   : > { %v1944_v34 = vmul.f32 %v1941_v5, %v1939_v32  ;;  %v4131_v32 = vld [vmem:[#allocation10 + $0x168] sm:$0xf0] }
 0x9a1   : > { %v1931_v19 = vsub.f32 1.5, %v1930_v23  ;;  %2342 = vmatpush.bf16.msra.mxu0 %v4142_v18  ;;  %v4570_v23 = vld [vmem:[#allocation10 + $0x164] sm:$0xf0] }
 0x9a2   : > { %v1949_v37 = vadd.f32 %v1946_v20, %v1944_v34  ;;  %v4567_v34 = vld [vmem:[#allocation10 + $0x154] sm:$0xf] }
 0x9a3   : > { %v1932_v33 = vmul.f32 %v4831_v61, %v1931_v19  ;;  %v4130_v19 = vor.u32 %v4570_v23, %v4129_v28 }
 0x9a5   : > { %v1936_v27 = vsel %vm1935_vm0, %v4831_v61, %v1932_v33  ;;  %v4134_v33 = vor.u32 %v4569_v31, %v4131_v32  ;;  %v4588_v31 = vld [vmem:[#allocation11 + $0x178] sm:$0xff] }
 0x9a6   : > { %v1940_v48 = vmul.f32 %v1936_v27, %v5629_v30  ;;  %v4121_v27 = vld [vmem:[#allocation10 + $0x150] sm:$0xf]  ;;  %2522 = vmatpush.bf16.msra.mxu2 %v4588_v31 }
 0x9a7   : > { %2343 = vmatpush.bf16.msra.mxu0 %v4134_v33 }
 0x9a8   : > { %v1945_v36 = vmul.f32 %v1941_v5, %v1940_v48  ;;  %v4568_v48 = vld [vmem:[#allocation10 + $0x154] sm:$0xf0] }
 0x9aa   : > { %v1950_v38 = vadd.f32 %v1946_v20, %v1945_v36  ;;  %v4122_v36 = vor.u32 %v4568_v48, %v4121_v27 }
 0x9ac   : > { %v1955_v39 = vpack.c.bf16 %v1950_v38, %v1949_v37 }
 0x9ae   : > { %2035 = vmatmul.bf16.gmra.mxu1 %v1955_v39  ;;  %v4113_v39 = vld [vmem:[#allocation10 + $0x140] sm:$0xf] }
 0x9af   : > { %v4114_v42 = vor.u32 %v4566_v40, %v4113_v39 }
 0xa1b   : > { %v2031_v43 = vpop.f32.mrf.mxu1 }
 0xa1c   : > { %v2032_v46 = vadd.f32 %v2031_v43, %v1973_v44  ;;  %v4115_v43 = vld [vmem:[#allocation10 + $0x148] sm:$0xf0] }
 0xa23   : > { %v2033_v45 = vpop.f32.mrf.mxu1 }
 0xa24   : > { %v2034_v30 = vadd.f32 %v2033_v45, %v1973_v44  ;;  %v4105_v45 = vld [vmem:[#allocation10 + $0x130] sm:$0xf] }
 0xa26   : > { %v2041_v47 = vpack.c.bf16 %v2034_v30, %v2032_v46  ;;  %v4564_v46 = vld [vmem:[#allocation10 + $0x134] sm:$0xf0]  ;;  %v4563_v30 = vld [vmem:[#allocation10 + $0x134] sm:$0xf] }
 0xa28   : > { %2117 = vmatmul.bf16.vlgmr.msrb.gmra.mxu2 %v2041_v47  ;;  %v4106_v47 = vor.u32 %v4564_v46, %v4105_v45  ;;  %v4578_v45 = vld [vmem:[#allocation11 + $0x128] sm:$0xff] }
 0xa2b   : > { %v2036_v49 = vpop.f32.mrf.mxu1 }
 0xa2c   : > { %v2037_v51 = vadd.f32 %v2036_v49, %v1973_v44  ;;  %v4107_v49 = vld [vmem:[#allocation10 + $0x138] sm:$0xf0] }
 0xa33   : > { %v2038_v50 = vpop.f32.mrf.mxu1 }
 0xa34   : > { %v2039_v52 = vadd.f32 %v2038_v50, %v1973_v44  ;;  %v4118_v44 = vor.u32 %v4565_v41, %v4115_v43  ;;  %v4110_v50 = vor.u32 %v4563_v30, %v4107_v49  ;;  %v2212_v41 = vperm.slane %v5643_v26, 2 }
 0xa36   : > { %v2042_v35 = vpack.c.bf16 %v2039_v52, %v2037_v51  ;;  %v4097_v51 = vld [vmem:[#allocation10 + $0x120] sm:$0xf]  ;;  %v4562_v52 = vld [vmem:[#allocation10 + $0x124] sm:$0xf0] }
 0xa38   : > { %2122 = vmatmul.bf16.gmra.mxu2 %v2042_v35  ;;  %v4561_v35 = vld [vmem:[#allocation10 + $0x124] sm:$0xf] }
 0xaab   : > { %v2118_v54 = vpop.f32.mrf.mxu2 }
 0xaac   : > { %v2119_v55 = vadd.f32 %v2118_v54, %v2060_v53  ;;  %v4099_v54 = vld [vmem:[#allocation10 + $0x128] sm:$0xf0] }
 0xaae   : > { %v2128_v10 = vadd.f32 %v2119_v55, %v1947_v29  ;;  %v4137_v29 = vld [vmem:[#allocation10 + $0x170] sm:$0xf]  ;;  %v4102_v55 = vor.u32 %v4561_v35, %v4099_v54 }
 0xab0   : > { %2132 = vadd.xlane.f32.xlu2 %v2128_v10 }
 0xab3   : > { %v2120_v56 = vpop.f32.mrf.mxu2 }
 0xab4   : > { %v2121_v57 = vadd.f32 %v2120_v56, %v2060_v53  ;;  %v4560_v56 = vld [vmem:[#allocation10 + $0x114] sm:$0xf0] }
 0xab6   : > { %v2129_v58 = vadd.f32 %v2121_v57, %v1948_v12  ;;  %v4572_v12 = vld [vmem:[#allocation10 + $0x174] sm:$0xf0]  ;;  %v4559_v57 = vld [vmem:[#allocation10 + $0x114] sm:$0xf] }
 0xab7   : > { %v4138_v13 = vor.u32 %v4572_v12, %v4137_v29 }
 0xab8   : > { %2134 = vadd.xlane.f32.xlu0 %v2129_v58 }
 0xab9   : > { %2323 = vmatpush.bf16.msrb.mxu3 %v4138_v13 }
 0xabb   : > { %v2123_v59 = vpop.f32.mrf.mxu2 }
 0xabc   : > { %v2124_v62 = vadd.f32 %v2123_v59, %v2060_v53  ;;  %v4091_v59 = vld [vmem:[#allocation10 + $0x118] sm:$0xf0] }
 0xabd   : > { %2324 = vmatpush.bf16.msrb.mxu3 %v4130_v19  ;;  %v4580_v19 = vld [vmem:[#allocation11 + $0x138] sm:$0xff] }
 0xabe   : > { %v2130_v17 = vadd.f32 %v2124_v62, %v1949_v37  ;;  %v4123_v37 = vld [vmem:[#allocation10 + $0x158] sm:$0xf0]  ;;  %v4094_v62 = vor.u32 %v4559_v57, %v4091_v59  ;;  %2503 = vmatpush.bf16.msra.mxu1 %v4580_v19 }
 0xac0   : > { %2136 = vadd.xlane.f32.xlu1 %v2130_v17 }
 0xac1   : > { %2325 = vmatpush.bf16.msrb.mxu3 %v4122_v36  ;;  %v4579_v36 = vld [vmem:[#allocation11 + $0x130] sm:$0xff] }
 0xac2   : > { %2504 = vmatpush.bf16.msra.mxu1 %v4579_v36 }
 0xac3   : > { %v2125_v15 = vpop.f32.mrf.mxu2 }
 0xac4   : > { %v2126_v63 = vadd.f32 %v2125_v15, %v2060_v53  ;;  %v4098_v53 = vor.u32 %v4562_v52, %v4097_v51  ;;  %v4585_v52 = vld [vmem:[#allocation11 + $0x160] sm:$0xff] }
 0xac5   : > { %2326 = vmatpush.bf16.msrb.mxu3 %v4114_v42 }
 0xac6   : > { %v2131_v0 = vadd.f32 %v2126_v63, %v1950_v38  ;;  %v4126_v38 = vor.u32 %v4567_v34, %v4123_v37  ;;  %v4081_v63 = vld [vmem:[#allocation10 + $0x100] sm:$0xf]  ;;  %v4587_v34 = vld [vmem:[#allocation11 + $0x170] sm:$0xff]  ;;  %2505 = vmatpush.bf16.msra.mxu1 %v4578_v45 }
 0xac7   : > { %2523 = vmatpush.bf16.msra.mxu2 %v4587_v34 }
 0xac8   : > { %2138 = vadd.xlane.f32.xlu2 %v2131_v0  ;;  %2344 = vmatpush.bf16.msra.mxu0 %v4126_v38 }
 0xac9   : > { %2327 = vmatpush.bf16.msrb.mxu3 %v4106_v47 }
 0xacc   : > { %2345 = vmatpush.bf16.msra.mxu0 %v4118_v44  ;;  %v4586_v44 = vld [vmem:[#allocation11 + $0x168] sm:$0xff] }
 0xacd   : > { %2328 = vmatpush.bf16.msrb.mxu3 %v4098_v53  ;;  %2524 = vmatpush.bf16.msra.mxu2 %v4586_v44 }
 0xad0   : > { %2346 = vmatpush.bf16.msra.mxu0 %v4110_v50  ;;  %v2217_v50 = vperm.slane %v5643_v26, 3 }
 0xad1   : > { %2525 = vmatpush.bf16.msra.mxu2 %v4585_v52 }
 0xad4   : > { %2347 = vmatpush.bf16.msra.mxu0 %v4102_v55 }
 0xad8   : > { %2348 = vmatpush.bf16.msra.mxu0 %v4094_v62 }
 0xb23   : > { %v2133_v1 = vpop.xlane.xlu2 %2132 }
 0xb24   : > { %v2140_v4 = vmul.f32 %v2133_v1, %v5481_v14  ;;  %v4557_v1 = vld [vmem:[#allocation10 + $0x104] sm:$0xf] }
 0xb26   : > { %v5648_v5 = vsub.f32 %v2128_v10, %v2140_v4  ;;  %v4089_v10 = vld [vmem:[#allocation10 + $0x110] sm:$0xf] }
 0xb28   : > { %v2148_v21 = vmul.f32 %v5648_v5, %v5648_v5 }
 0xb2a   : > { %2152 = vadd.xlane.f32.xlu0 %v2148_v21  ;;  %v4083_v21 = vld [vmem:[#allocation10 + $0x108] sm:$0xf0] }
 0xb2b   : > { %v2135_v6 = vpop.xlane.xlu0 %2134 }
 0xb2c   : > { %v2141_v7 = vmul.f32 %v2135_v6, %v5481_v14 }
 0xb2e   : > { %v5653_v8 = vsub.f32 %v2129_v58, %v2141_v7  ;;  %v4090_v58 = vor.u32 %v4560_v56, %v4089_v10  ;;  %v4086_v7 = vor.u32 %v4557_v1, %v4083_v21 }
 0xb30   : > { %v2149_v9 = vmul.f32 %v5653_v8, %v5653_v8  ;;  %2329 = vmatpush.bf16.msrb.mxu3 %v4090_v58  ;;  %2349 = vmatpush.bf16.msra.mxu0 %v4086_v7 }
 0xb32   : > { %2154 = vadd.xlane.f32.xlu1 %v2149_v9 }
 0xb33   : > { %v2137_v11 = vpop.xlane.xlu1 %2136 }
 0xb34   : > { %v2142_v16 = vmul.f32 %v2137_v11, %v5481_v14 }
 0xb36   : > { %v5658_v20 = vsub.f32 %v2130_v17, %v2142_v16 }
 0xb38   : > { %v2150_v60 = vmul.f32 %v5658_v20, %v5658_v20 }
 0xb3a   : > { %2156 = vadd.xlane.f32.xlu2 %v2150_v60 }
 0xb3b   : > { %v2139_v25 = vpop.xlane.xlu2 %2138 }
 0xb3c   : > { %v2143_v22 = vmul.f32 %v2139_v25, %v5481_v14 }
 0xb3e   : > { %v5663_v2 = vsub.f32 %v2131_v0, %v2143_v22  ;;  %v4558_v0 = vld [vmem:[#allocation10 + $0x104] sm:$0xf0] }
 0xb3f   : > { %v4082_v4 = vor.u32 %v4558_v0, %v4081_v63 }
 0xb40   : > { %v2151_v61 = vmul.f32 %v5663_v2, %v5663_v2 }
 0xb41   : > { %2330 = vmatpush.bf16.msrb.mxu3 %v4082_v4 }
 0xb42   : > { %2158 = vadd.xlane.f32.xlu0 %v2151_v61 }
 0xb9d   : > { %v2153_v17 = vpop.xlane.xlu0 %2152 }
 0xb9e   : > { %v2160_v15 = vmul.f32 %v2153_v17, %v5481_v14 }
 0xba0   : > { %v2164_v6 = vadd.f32 1e-05, %v2160_v15 }
 0xba2   : > { %4832 = vrsqrt.f32 %v2164_v6  ;;  %vm2174_vm2 = vweird.f32 %v2164_v6 }
 0xba5   : > { %v2155_v9 = vpop.xlane.xlu1 %2154 }
 0xba6   : > { %v2161_v11 = vmul.f32 %v2155_v9, %v5481_v14  ;;  %v4584_v9 = vld [vmem:[#allocation11 + $0x158] sm:$0xff] }
 0xba7   : > { %2526 = vmatpush.bf16.msra.mxu2 %v4584_v9 }
 0xba8   : > { %v4833_v16 = vpop.eup %4832  ;;  %v2165_v60 = vadd.f32 1e-05, %v2161_v11  ;;  %v4583_v11 = vld [vmem:[#allocation11 + $0x150] sm:$0xff] }
 0xba9   : > { %v2169_v25 = vmul.f32 %v4833_v16, %v2164_v6  ;;  %vm2175_vm1 = vweird.f32 %v4833_v16 }
 0xbaa   : > { %4834 = vrsqrt.f32 %v2165_v60  ;;  %vm2176_vm3 = vmor %vm2174_vm2, %vm2175_vm1  ;;  %vm2184_vm5 = vweird.f32 %v2165_v60 }
 0xbab   : > { %v2170_v22 = vmul.f32 %v4833_v16, %v2169_v25  ;;  %2527 = vmatpush.bf16.msra.mxu2 %v4583_v11  ;;  %v4581_v25 = vld [vmem:[#allocation11 + $0x140] sm:$0xff] }
 0xbad   : > { %v2171_v61 = vmul.f32 0.5, %v2170_v22  ;;  %v2157_v29 = vpop.xlane.xlu2 %2156  ;;  %v4574_v22 = vld [vmem:[#allocation11 + $0x108] sm:$0xff] }
 0xbae   : > { %v2162_v12 = vmul.f32 %v2157_v29, %v5481_v14  ;;  %v1953_v29 = vld [vmem:[#allocation16 + $0x28] sm:$0xff] }
 0xbaf   : > { %v2172_v24 = vsub.f32 1.5, %v2171_v61  ;;  %v4573_v61 = vld [vmem:[#allocation11 + $0x100] sm:$0xff] }
 0xbb0   : > { %v4835_v13 = vpop.eup %4834  ;;  %v2166_v3 = vadd.f32 1e-05, %v2162_v12 }
 0xbb1   : > { %v2173_v18 = vmul.f32 %v4833_v16, %v2172_v24  ;;  %v2179_v28 = vmul.f32 %v4835_v13, %v2165_v60  ;;  %vm2185_vm4 = vweird.f32 %v4835_v13  ;;  %v4575_v60 = vld [vmem:[#allocation11 + $0x110] sm:$0xff]  ;;  %v2242_v24 = vperm.slane %v1953_v29, 7 }
 0xbb2   : > { %4836 = vrsqrt.f32 %v2166_v3  ;;  %vm2186_vm6 = vmor %vm2184_vm5, %vm2185_vm4  ;;  %vm2194_vm8 = vweird.f32 %v2166_v3 }
 0xbb3   : > { %v2180_v23 = vmul.f32 %v4835_v13, %v2179_v28  ;;  %v2177_v32 = vsel %vm2176_vm3, %v4833_v16, %v2173_v18  ;;  %v4576_v16 = vld [vmem:[#allocation11 + $0x118] sm:$0xff]  ;;  %v2241_v28 = vperm.slane %v5643_v26, 7 }
 0xbb4   : > { %v2208_v39 = vmul.f32 %v2177_v32, %v5648_v5 }
 0xbb5   : > { %v2181_v33 = vmul.f32 0.5, %v2180_v23  ;;  %v2159_v27 = vpop.xlane.xlu0 %2158 }
 0xbb6   : > { %v2163_v48 = vmul.f32 %v2159_v27, %v5481_v14  ;;  %v2213_v49 = vmul.f32 %v2212_v41, %v2208_v39 }
 0xbb7   : > { %v2182_v37 = vsub.f32 1.5, %v2181_v33 }
 0xbb8   : > { %v4837_v38 = vpop.eup %4836  ;;  %v2167_v40 = vadd.f32 1e-05, %v2163_v48  ;;  %v5675_v54 = vadd.f32 %v2217_v50, %v2213_v49 }
 0xbb9   : > { %v2183_v42 = vmul.f32 %v4835_v13, %v2182_v37  ;;  %v2189_v43 = vmul.f32 %v4837_v38, %v2166_v3  ;;  %vm2195_vm7 = vweird.f32 %v4837_v38 }
 0xbba   : > { %4838 = vrsqrt.f32 %v2167_v40  ;;  %vm2196_vm9 = vmor %vm2194_vm8, %vm2195_vm7  ;;  %vm2204_vm11 = vweird.f32 %v2167_v40 }
 0xbbb   : > { %v2187_v46 = vsel %vm2186_vm6, %v4835_v13, %v2183_v42  ;;  %v2190_v30 = vmul.f32 %v4837_v38, %v2189_v43 }
 0xbbc   : > { %v2209_v47 = vmul.f32 %v2187_v46, %v5653_v8 }
 0xbbd   : > { %v2191_v5 = vmul.f32 0.5, %v2190_v30 }
 0xbbe   : > { %v2214_v51 = vmul.f32 %v2212_v41, %v2209_v47 }
 0xbbf   : > { %v2192_v35 = vsub.f32 1.5, %v2191_v5 }
 0xbc0   : > { %v4839_v53 = vpop.eup %4838  ;;  %v5677_v55 = vadd.f32 %v2217_v50, %v2214_v51  ;;  %v2406_v51 = vperm.slane %v5643_v26, 4 }
 0xbc1   : > { %v2193_v10 = vmul.f32 %v4837_v38, %v2192_v35  ;;  %v2199_v56 = vmul.f32 %v4839_v53, %v2167_v40  ;;  %vm2205_vm10 = vweird.f32 %v4839_v53 }
 0xbc2   : > { %v2222_v8 = vpack.c.bf16 %v5677_v55, %v5675_v54  ;;  %vm2206_vm12 = vmor %vm2204_vm11, %vm2205_vm10 }
 0xbc3   : > { %v2200_v57 = vmul.f32 %v4839_v53, %v2199_v56  ;;  %v2197_v59 = vsel %vm2196_vm9, %v4837_v38, %v2193_v10 }
 0xbc4   : > { %2331 = vmatmul.bf16.vlgmr.msrb.gmra.mxu3 %v2222_v8  ;;  %2350 = vmatmul.bf16.vlgmr.msra.gmra.mxu0 %v2222_v8  ;;  %v2210_v17 = vmul.f32 %v2197_v59, %v5658_v20  ;;  %v4577_v20 = vld [vmem:[#allocation11 + $0x120] sm:$0xff] }
 0xbc5   : > { %v2201_v58 = vmul.f32 0.5, %v2200_v57  ;;  %2506 = vmatpush.bf16.msra.mxu1 %v4577_v20 }
 0xbc6   : > { %v2215_v1 = vmul.f32 %v2212_v41, %v2210_v17 }
 0xbc7   : > { %v2202_v62 = vsub.f32 1.5, %v2201_v58 }
 0xbc8   : > { %v5683_v21 = vadd.f32 %v2217_v50, %v2215_v1 }
 0xbc9   : > { %v2203_v15 = vmul.f32 %v4839_v53, %v2202_v62  ;;  %2507 = vmatpush.bf16.msra.mxu1 %v4576_v16 }
 0xbcb   : > { %v2207_v63 = vsel %vm2206_vm12, %v4839_v53, %v2203_v15 }
 0xbcc   : > { %v2211_v0 = vmul.f32 %v2207_v63, %v5663_v2  ;;  %v4582_v2 = vld [vmem:[#allocation11 + $0x148] sm:$0xff] }
 0xbcd   : > { %2528 = vmatpush.bf16.msra.mxu2 %v4582_v2  ;;  %2508 = vmatpush.bf16.msra.mxu1 %v4575_v60 }
 0xbce   : > { %v2216_v4 = vmul.f32 %v2212_v41, %v2211_v0 }
 0xbd0   : > { %v5685_v6 = vadd.f32 %v2217_v50, %v2216_v4 }
 0xbd1   : > { %2529 = vmatpush.bf16.msra.mxu2 %v4581_v25  ;;  %2509 = vmatpush.bf16.msra.mxu1 %v4574_v22 }
 0xbd2   : > { %v2223_v7 = vpack.c.bf16 %v5685_v6, %v5683_v21 }
 0xbd4   : > { %2336 = vmatmul.bf16.gmra.mxu3 %v2223_v7  ;;  %2355 = vmatmul.bf16.gmra.mxu0 %v2223_v7 }
 0xbd5   : > { %2510 = vmatpush.bf16.msra.mxu1 %v4573_v61 }
 0xc41   : > { %v2351_v12 = vpop.f32.mrf.mxu0 }
 0xc42   : > { %v2352_v3 = vadd.f32 %v2351_v12, %v2242_v24 }
 0xc44   : > { %v2362_v31 = vmax.f32 %v2352_v3, 0.0 }
 0xc47   : > { %v2332_v13 = vpop.f32.mrf.mxu3 }
 0xc48   : > { %v2333_v32 = vadd.f32 %v2332_v13, %v2241_v28 }
 0xc49   : > { %v2353_v18 = vpop.f32.mrf.mxu0 }
 0xc4a   : > { %v2354_v23 = vadd.f32 %v2353_v18, %v2242_v24  ;;  %v2361_v36 = vmax.f32 %v2333_v32, 0.0  ;;  %v4592_v32 = vld [vmem:[#allocation7 + $0xd8] sm:$0xff] }
 0xc4c   : > { %v2364_v19 = vmax.f32 %v2354_v23, 0.0  ;;  %v4595_v23 = vld [vmem:[#allocation7 + $0xf0] sm:$0xff] }
 0xc4e   : > { %v2370_v33 = vpack.c.bf16 %v2364_v19, %v2362_v31  ;;  %v4594_v31 = vld [vmem:[#allocation7 + $0xe8] sm:$0xff]  ;;  %v4593_v19 = vld [vmem:[#allocation7 + $0xe0] sm:$0xff] }
 0xc4f   : > { %v2334_v27 = vpop.f32.mrf.mxu3 }
 0xc50   : > { %v2335_v48 = vadd.f32 %v2334_v27, %v2241_v28  ;;  %2530 = vmatmul.bf16.vlgmr.msra.gmra.mxu2 %v2370_v33  ;;  %v4591_v33 = vld [vmem:[#allocation7 + $0xd0] sm:$0xff]  ;;  %v4590_v27 = vld [vmem:[#allocation7 + $0xc8] sm:$0xff] }
 0xc51   : > { %v2356_v34 = vpop.f32.mrf.mxu0 }
 0xc52   : > { %v2363_v37 = vmax.f32 %v2335_v48, 0.0  ;;  %v2357_v40 = vadd.f32 %v2356_v34, %v2242_v24 }
 0xc54   : > { %v2369_v38 = vpack.c.bf16 %v2363_v37, %v2361_v36  ;;  %v2366_v43 = vmax.f32 %v2357_v40, 0.0  ;;  %v4589_v36 = vld [vmem:[#allocation7 + $0xc0] sm:$0xff] }
 0xc56   : > { %2511 = vmatmul.bf16.vlgmr.msra.gmra.mxu1 %v2369_v38 }
 0xc57   : > { %v2337_v39 = vpop.f32.mrf.mxu3 }
 0xc58   : > { %v2338_v45 = vadd.f32 %v2337_v39, %v2241_v28 }
 0xc59   : > { %v2358_v41 = vpop.f32.mrf.mxu0 }
 0xc5a   : > { %v2359_v42 = vadd.f32 %v2358_v41, %v2242_v24  ;;  %v2365_v49 = vmax.f32 %v2338_v45, 0.0 }
 0xc5c   : > { %v2368_v44 = vmax.f32 %v2359_v42, 0.0 }
 0xc5e   : > { %v2372_v46 = vpack.c.bf16 %v2368_v44, %v2366_v43 }
 0xc5f   : > { %v2339_v30 = vpop.f32.mrf.mxu3 }
 0xc60   : > { %v2340_v47 = vadd.f32 %v2339_v30, %v2241_v28  ;;  %2535 = vmatmul.bf16.gmra.mxu2 %v2372_v46  ;;  %v4596_v28 = vld [vmem:[#allocation7 + $0xf8] sm:$0xff] }
 0xc61   : > { %2706 = vmatpush.bf16.msra.mxu3 %v4596_v28 }
 0xc62   : > { %v2367_v50 = vmax.f32 %v2340_v47, 0.0 }
 0xc64   : > { %v2371_v5 = vpack.c.bf16 %v2367_v50, %v2365_v49 }
 0xc65   : > { %2707 = vmatpush.bf16.msra.mxu3 %v4595_v23 }
 0xc66   : > { %2516 = vmatmul.bf16.gmra.mxu1 %v2371_v5 }
 0xc69   : > { %2708 = vmatpush.bf16.msra.mxu3 %v4594_v31 }
 0xc6d   : > { %2709 = vmatpush.bf16.msra.mxu3 %v4593_v19 }
 0xc71   : > { %2710 = vmatpush.bf16.msra.mxu3 %v4592_v32 }
 0xc75   : > { %2711 = vmatpush.bf16.msra.mxu3 %v4591_v33 }
 0xc79   : > { %2712 = vmatpush.bf16.msra.mxu3 %v4590_v27 }
 0xc7d   : > { %2713 = vmatpush.bf16.msra.mxu3 %v4589_v36  ;;  %v4598_v36 = vld [vmem:[#allocation8 + $0xc8] sm:$0xff] }
 0xcd3   : > { %v2512_v52 = vpop.f32.mrf.mxu1  ;;  %v2531_v35 = vpop.f32.mrf.mxu2 }
 0xcd4   : > { %v2513_v53 = vadd.f32 %v2512_v52, %v2406_v51  ;;  %v4604_v52 = vld [vmem:[#allocation8 + $0xf8] sm:$0xff] }
 0xcd5   : > { %2793 = vmatpush.bf16.msrb.mxu0 %v4604_v52 }
 0xcd6   : > { %v2532_v10 = vadd.f32 %v2531_v35, %v2513_v53 }
 0xcd8   : > { %v2541_v56 = vadd.f32 %v2532_v10, %v5675_v54 }
 0xcda   : > { %2545 = vadd.xlane.f32.xlu1 %v2541_v56 }
 0xcdb   : > { %v2514_v8 = vpop.f32.mrf.mxu1  ;;  %v2533_v57 = vpop.f32.mrf.mxu2 }
 0xcdc   : > { %v2515_v58 = vadd.f32 %v2514_v8, %v2406_v51  ;;  %v4603_v8 = vld [vmem:[#allocation8 + $0xf0] sm:$0xff] }
 0xcdd   : > { %2794 = vmatpush.bf16.msrb.mxu0 %v4603_v8 }
 0xcde   : > { %v2534_v59 = vadd.f32 %v2533_v57, %v2515_v58 }
 0xce0   : > { %v2542_v62 = vadd.f32 %v2534_v59, %v5677_v55 }
 0xce2   : > { %2547 = vadd.xlane.f32.xlu2 %v2542_v62 }
 0xce3   : > { %v2517_v17 = vpop.f32.mrf.mxu1  ;;  %v2536_v15 = vpop.f32.mrf.mxu2 }
 0xce4   : > { %v2518_v63 = vadd.f32 %v2517_v17, %v2406_v51  ;;  %v2625_v17 = vperm.slane %v5643_v26, 5 }
 0xce6   : > { %v2537_v0 = vadd.f32 %v2536_v15, %v2518_v63 }
 0xce8   : > { %v2543_v1 = vadd.f32 %v2537_v0, %v5683_v21  ;;  %v4602_v0 = vld [vmem:[#allocation8 + $0xe8] sm:$0xff] }
 0xce9   : > { %2795 = vmatpush.bf16.msrb.mxu0 %v4602_v0 }
 0xcea   : > { %2549 = vadd.xlane.f32.xlu0 %v2543_v1 }
 0xceb   : > { %v2519_v4 = vpop.f32.mrf.mxu1  ;;  %v2538_v9 = vpop.f32.mrf.mxu2 }
 0xcec   : > { %v2520_v7 = vadd.f32 %v2519_v4, %v2406_v51 }
 0xcee   : > { %v2539_v20 = vadd.f32 %v2538_v9, %v2520_v7 }
 0xcf0   : > { %v2544_v54 = vadd.f32 %v2539_v20, %v5685_v6  ;;  %v2630_v20 = vperm.slane %v5643_v26, 6 }
 0xcf2   : > { %2551 = vadd.xlane.f32.xlu1 %v2544_v54 }
 0xd4d   : > { %v2546_v11 = vpop.xlane.xlu1 %2545 }
 0xd4e   : > { %v2553_v16 = vmul.f32 %v2546_v11, %v5481_v14 }
 0xd50   : > { %v5696_v2 = vsub.f32 %v2541_v56, %v2553_v16  ;;  %v4601_v16 = vld [vmem:[#allocation8 + $0xe0] sm:$0xff] }
 0xd51   : > { %2796 = vmatpush.bf16.msrb.mxu0 %v4601_v16 }
 0xd52   : > { %v2561_v55 = vmul.f32 %v5696_v2, %v5696_v2 }
 0xd54   : > { %2565 = vadd.xlane.f32.xlu2 %v2561_v55 }
 0xd55   : > { %v2548_v60 = vpop.xlane.xlu2 %2547 }
 0xd56   : > { %v2554_v21 = vmul.f32 %v2548_v60, %v5481_v14 }
 0xd58   : > { %v5701_v25 = vsub.f32 %v2542_v62, %v2554_v21 }
 0xd5a   : > { %v2562_v22 = vmul.f32 %v5701_v25, %v5701_v25 }
 0xd5c   : > { %2567 = vadd.xlane.f32.xlu0 %v2562_v22 }
 0xd5d   : > { %v2550_v6 = vpop.xlane.xlu0 %2549 }
 0xd5e   : > { %v2555_v61 = vmul.f32 %v2550_v6, %v5481_v14 }
 0xd60   : > { %v5706_v29 = vsub.f32 %v2543_v1, %v2555_v61 }
 0xd62   : > { %v2563_v12 = vmul.f32 %v5706_v29, %v5706_v29 }
 0xd64   : > { %2569 = vadd.xlane.f32.xlu1 %v2563_v12  ;;  %v4600_v12 = vld [vmem:[#allocation8 + $0xd8] sm:$0xff] }
 0xd65   : > { %v2552_v24 = vpop.xlane.xlu1 %2551  ;;  %2797 = vmatpush.bf16.msrb.mxu0 %v4600_v12 }
 0xd66   : > { %v2556_v13 = vmul.f32 %v2552_v24, %v5481_v14 }
 0xd68   : > { %v5711_v3 = vsub.f32 %v2544_v54, %v2556_v13 }
 0xd6a   : > { %v2564_v18 = vmul.f32 %v5711_v3, %v5711_v3 }
 0xd6c   : > { %2571 = vadd.xlane.f32.xlu2 %v2564_v18 }
 0xdc7   : > { %v2566_v48 = vpop.xlane.xlu2 %2565 }
 0xdc8   : > { %v2573_v34 = vmul.f32 %v2566_v48, %v5481_v14 }
 0xdca   : > { %v2577_v37 = vadd.f32 1e-05, %v2573_v34  ;;  %v4599_v34 = vld [vmem:[#allocation8 + $0xd0] sm:$0xff] }
 0xdcb   : > { %2798 = vmatpush.bf16.msrb.mxu0 %v4599_v34  ;;  %v4307_v34 = vld [vmem:[#allocation10 + $0x1c8] sm:$0xf0] }
 0xdcc   : > { %4840 = vrsqrt.f32 %v2577_v37  ;;  %vm2587_vm14 = vweird.f32 %v2577_v37 }
 0xdcf   : > { %v2568_v38 = vpop.xlane.xlu0 %2567  ;;  %2799 = vmatpush.bf16.msrb.mxu0 %v4598_v36  ;;  %v4305_v36 = vld [vmem:[#allocation10 + $0x1c0] sm:$0xf] }
 0xdd0   : > { %v2574_v39 = vmul.f32 %v2568_v38, %v5481_v14 }
 0xdd2   : > { %v4841_v40 = vpop.eup %4840  ;;  %v2578_v41 = vadd.f32 1e-05, %v2574_v39 }
 0xdd3   : > { %v2582_v42 = vmul.f32 %v4841_v40, %v2577_v37  ;;  %vm2588_vm13 = vweird.f32 %v4841_v40  ;;  %v4597_v37 = vld [vmem:[#allocation8 + $0xc0] sm:$0xff] }
 0xdd4   : > { %4842 = vrsqrt.f32 %v2578_v41  ;;  %vm2589_vm15 = vmor %vm2587_vm14, %vm2588_vm13  ;;  %vm2597_vm1 = vweird.f32 %v2578_v41  ;;  %2800 = vmatpush.bf16.msrb.mxu0 %v4597_v37 }
 0xdd5   : > { %v2583_v43 = vmul.f32 %v4841_v40, %v2582_v42 }
 0xdd7   : > { %v2584_v44 = vmul.f32 0.5, %v2583_v43  ;;  %v2570_v45 = vpop.xlane.xlu1 %2569 }
 0xdd8   : > { %v2575_v46 = vmul.f32 %v2570_v45, %v5481_v14 }
 0xdd9   : > { %v2585_v30 = vsub.f32 1.5, %v2584_v44 }
 0xdda   : > { %v4843_v47 = vpop.eup %4842  ;;  %v2579_v49 = vadd.f32 1e-05, %v2575_v46 }
 0xddb   : > { %v2586_v50 = vmul.f32 %v4841_v40, %v2585_v30  ;;  %v2592_v5 = vmul.f32 %v4843_v47, %v2578_v41  ;;  %vm2598_vm0 = vweird.f32 %v4843_v47 }
 0xddc   : > { %4844 = vrsqrt.f32 %v2579_v49  ;;  %vm2599_vm2 = vmor %vm2597_vm1, %vm2598_vm0  ;;  %vm2607_vm4 = vweird.f32 %v2579_v49 }
 0xddd   : > { %v2593_v51 = vmul.f32 %v4843_v47, %v2592_v5  ;;  %v2590_v35 = vsel %vm2589_vm15, %v4841_v40, %v2586_v50 }
 0xdde   : > { %v2621_v59 = vmul.f32 %v2590_v35, %v5696_v2 }
 0xddf   : > { %v2594_v53 = vmul.f32 0.5, %v2593_v51  ;;  %v2572_v10 = vpop.xlane.xlu2 %2571 }
 0xde0   : > { %v2576_v56 = vmul.f32 %v2572_v10, %v5481_v14  ;;  %v2626_v9 = vmul.f32 %v2625_v17, %v2621_v59 }
 0xde1   : > { %v2595_v57 = vsub.f32 1.5, %v2594_v53 }
 0xde2   : > { %v4845_v58 = vpop.eup %4844  ;;  %v2580_v62 = vadd.f32 1e-05, %v2576_v56  ;;  %v2631_v60 = vadd.f32 %v2630_v20, %v2626_v9 }
 0xde3   : > { %v2596_v15 = vmul.f32 %v4843_v47, %v2595_v57  ;;  %v2602_v63 = vmul.f32 %v4845_v58, %v2579_v49  ;;  %vm2608_vm3 = vweird.f32 %v4845_v58 }
 0xde4   : > { %4846 = vrsqrt.f32 %v2580_v62  ;;  %vm2609_vm5 = vmor %vm2607_vm4, %vm2608_vm3  ;;  %vm2617_vm7 = vweird.f32 %v2580_v62 }
 0xde5   : > { %v2600_v1 = vsel %vm2599_vm2, %v4843_v47, %v2596_v15  ;;  %v2603_v4 = vmul.f32 %v4845_v58, %v2602_v63 }
 0xde6   : > { %v2622_v7 = vmul.f32 %v2600_v1, %v5701_v25 }
 0xde7   : > { %v2604_v54 = vmul.f32 0.5, %v2603_v4 }
 0xde8   : > { %v2627_v11 = vmul.f32 %v2625_v17, %v2622_v7 }
 0xde9   : > { %v2605_v2 = vsub.f32 1.5, %v2604_v54 }
 0xdea   : > { %v4847_v55 = vpop.eup %4846  ;;  %v2632_v21 = vadd.f32 %v2630_v20, %v2627_v11 }
 0xdeb   : > { %v2606_v22 = vmul.f32 %v4845_v58, %v2605_v2  ;;  %v2612_v6 = vmul.f32 %v4847_v55, %v2580_v62  ;;  %vm2618_vm6 = vweird.f32 %v4847_v55 }
 0xdec   : > { %v2638_v61 = vpack.c.bf16 %v2632_v21, %v2631_v60  ;;  %vm2619_vm8 = vmor %vm2617_vm7, %vm2618_vm6 }
 0xded   : > { %v2613_v24 = vmul.f32 %v4847_v55, %v2612_v6  ;;  %v2610_v26 = vsel %vm2609_vm5, %v4845_v58, %v2606_v22  ;;  %v4329_v22 = vld [vmem:[#allocation10 + $0x1f0] sm:$0xf] }
 0xdee   : > { %2714 = vmatmul.bf16.vlgmr.msra.gmra.mxu3 %v2638_v61  ;;  %v2623_v18 = vmul.f32 %v2610_v26, %v5706_v29  ;;  %v5725_v29 = vld [vmem:[#allocation16 + $0x30] sm:$0xff]  ;;  %v4321_v26 = vld [vmem:[#allocation10 + $0x1e0] sm:$0xf] }
 0xdef   : > { %v2614_v25 = vmul.f32 0.5, %v2613_v24  ;;  %v2657_v39 = vperm.slane %v5725_v29, 0  ;;  %v2744_v47 = vperm.slane %v5725_v29, 1  ;;  %v4620_v61 = vld [vmem:[#allocation10 + $0x1f4] sm:$0xf0] }
 0xdf0   : > { %v2628_v19 = vmul.f32 %v2625_v17, %v2623_v18  ;;  %v4330_v12 = vor.u32 %v4620_v61, %v4329_v22  ;;  %v4617_v24 = vld [vmem:[#allocation10 + $0x1e4] sm:$0xf]  ;;  %v4618_v18 = vld [vmem:[#allocation10 + $0x1e4] sm:$0xf0] }
 0xdf1   : > { %v2615_v13 = vsub.f32 1.5, %v2614_v25  ;;  %v4323_v25 = vld [vmem:[#allocation10 + $0x1e8] sm:$0xf0] }
 0xdf2   : > { %v2633_v33 = vadd.f32 %v2630_v20, %v2628_v19  ;;  %3007 = vmatpush.bf16.msrb.mxu1 %v4330_v12  ;;  %v4313_v19 = vld [vmem:[#allocation10 + $0x1d0] sm:$0xf] }
 0xdf3   : > { %v2616_v28 = vmul.f32 %v4847_v55, %v2615_v13  ;;  %v4326_v13 = vor.u32 %v4617_v24, %v4323_v25 }
 0xdf5   : > { %v2620_v23 = vsel %vm2619_vm8, %v4847_v55, %v2616_v28  ;;  %v4322_v28 = vor.u32 %v4618_v18, %v4321_v26  ;;  %v4628_v26 = vld [vmem:[#allocation11 + $0x1b8] sm:$0xff] }
 0xdf6   : > { %v2624_v31 = vmul.f32 %v2620_v23, %v5711_v3  ;;  %v4615_v23 = vld [vmem:[#allocation10 + $0x1d4] sm:$0xf]  ;;  %3187 = vmatpush.bf16.msrb.mxu3 %v4628_v26 }
 0xdf7   : > { %3008 = vmatpush.bf16.msrb.mxu1 %v4322_v28 }
 0xdf8   : > { %v2629_v32 = vmul.f32 %v2625_v17, %v2624_v31  ;;  %v4315_v31 = vld [vmem:[#allocation10 + $0x1d8] sm:$0xf0] }
 0xdfa   : > { %v2634_v27 = vadd.f32 %v2630_v20, %v2629_v32  ;;  %v4318_v32 = vor.u32 %v4615_v23, %v4315_v31 }
 0xdfc   : > { %v2639_v48 = vpack.c.bf16 %v2634_v27, %v2633_v33 }
 0xdfe   : > { %2719 = vmatmul.bf16.gmra.mxu3 %v2639_v48  ;;  %v4613_v48 = vld [vmem:[#allocation10 + $0x1c4] sm:$0xf] }
 0xdff   : > { %v4310_v37 = vor.u32 %v4613_v48, %v4307_v34 }
 0xe71   : > { %v2715_v38 = vpop.f32.mrf.mxu3 }
 0xe72   : > { %v2716_v41 = vadd.f32 %v2715_v38, %v2657_v39  ;;  %v4614_v38 = vld [vmem:[#allocation10 + $0x1c4] sm:$0xf0] }
 0xe79   : > { %v2717_v40 = vpop.f32.mrf.mxu3 }
 0xe7a   : > { %v2718_v3 = vadd.f32 %v2717_v40, %v2657_v39  ;;  %v4611_v40 = vld [vmem:[#allocation10 + $0x1b4] sm:$0xf] }
 0xe7c   : > { %v2725_v42 = vpack.c.bf16 %v2718_v3, %v2716_v41  ;;  %v4299_v41 = vld [vmem:[#allocation10 + $0x1b8] sm:$0xf0]  ;;  %v4297_v3 = vld [vmem:[#allocation10 + $0x1b0] sm:$0xf] }
 0xe7e   : > { %2801 = vmatmul.bf16.vlgmr.msrb.gmra.mxu0 %v2725_v42  ;;  %v4302_v42 = vor.u32 %v4611_v40, %v4299_v41  ;;  %v4634_v40 = vld [vmem:[#allocation11 + $0x1e8] sm:$0xff] }
 0xe81   : > { %v2720_v43 = vpop.f32.mrf.mxu3 }
 0xe82   : > { %v2721_v45 = vadd.f32 %v2720_v43, %v2657_v39  ;;  %v4612_v43 = vld [vmem:[#allocation10 + $0x1b4] sm:$0xf0] }
 0xe89   : > { %v2722_v44 = vpop.f32.mrf.mxu3 }
 0xe8a   : > { %v2723_v46 = vadd.f32 %v2722_v44, %v2657_v39  ;;  %v4306_v39 = vor.u32 %v4614_v38, %v4305_v36  ;;  %v4298_v44 = vor.u32 %v4612_v43, %v4297_v3  ;;  %v2896_v36 = vperm.slane %v5725_v29, 2 }
 0xe8c   : > { %v2726_v30 = vpack.c.bf16 %v2723_v46, %v2721_v45  ;;  %v4609_v45 = vld [vmem:[#allocation10 + $0x1a4] sm:$0xf]  ;;  %v4291_v46 = vld [vmem:[#allocation10 + $0x1a8] sm:$0xf0] }
 0xe8e   : > { %2806 = vmatmul.bf16.gmra.mxu0 %v2726_v30  ;;  %v4289_v30 = vld [vmem:[#allocation10 + $0x1a0] sm:$0xf] }
 0xefb   : > { %v2802_v49 = vpop.f32.mrf.mxu0 }
 0xefc   : > { %v2803_v50 = vadd.f32 %v2802_v49, %v2744_v47  ;;  %v4610_v49 = vld [vmem:[#allocation10 + $0x1a4] sm:$0xf0] }
 0xefe   : > { %v2812_v5 = vadd.f32 %v2803_v50, %v2631_v60  ;;  %v4619_v60 = vld [vmem:[#allocation10 + $0x1f4] sm:$0xf]  ;;  %v4290_v50 = vor.u32 %v4610_v49, %v4289_v30 }
 0xf00   : > { %2816 = vadd.xlane.f32.xlu0 %v2812_v5 }
 0xf03   : > { %v2804_v51 = vpop.f32.mrf.mxu0 }
 0xf04   : > { %v2805_v52 = vadd.f32 %v2804_v51, %v2744_v47  ;;  %v4283_v51 = vld [vmem:[#allocation10 + $0x198] sm:$0xf0] }
 0xf06   : > { %v2813_v35 = vadd.f32 %v2805_v52, %v2632_v21  ;;  %v4331_v21 = vld [vmem:[#allocation10 + $0x1f8] sm:$0xf0]  ;;  %v4281_v52 = vld [vmem:[#allocation10 + $0x190] sm:$0xf] }
 0xf07   : > { %v4334_v6 = vor.u32 %v4619_v60, %v4331_v21 }
 0xf08   : > { %2818 = vadd.xlane.f32.xlu1 %v2813_v35 }
 0xf09   : > { %3026 = vmatpush.bf16.msrb.mxu2 %v4334_v6 }
 0xf0b   : > { %v2807_v53 = vpop.f32.mrf.mxu0 }
 0xf0c   : > { %v2808_v10 = vadd.f32 %v2807_v53, %v2744_v47  ;;  %v4608_v53 = vld [vmem:[#allocation10 + $0x194] sm:$0xf0] }
 0xf0d   : > { %3027 = vmatpush.bf16.msrb.mxu2 %v4326_v13  ;;  %v4636_v13 = vld [vmem:[#allocation11 + $0x1f8] sm:$0xff] }
 0xf0e   : > { %v2814_v56 = vadd.f32 %v2808_v10, %v2633_v33  ;;  %v4616_v33 = vld [vmem:[#allocation10 + $0x1d4] sm:$0xf0]  ;;  %v4282_v10 = vor.u32 %v4608_v53, %v4281_v52  ;;  %3206 = vmatpush.bf16.msra.mxu0 %v4636_v13 }
 0xf10   : > { %2820 = vadd.xlane.f32.xlu2 %v2814_v56 }
 0xf11   : > { %3028 = vmatpush.bf16.msrb.mxu2 %v4318_v32  ;;  %v4635_v32 = vld [vmem:[#allocation11 + $0x1f0] sm:$0xff] }
 0xf12   : > { %3207 = vmatpush.bf16.msra.mxu0 %v4635_v32 }
 0xf13   : > { %v2809_v8 = vpop.f32.mrf.mxu0 }
 0xf14   : > { %v2810_v57 = vadd.f32 %v2809_v8, %v2744_v47  ;;  %v4294_v47 = vor.u32 %v4609_v45, %v4291_v46  ;;  %v4625_v46 = vld [vmem:[#allocation11 + $0x1a0] sm:$0xff] }
 0xf15   : > { %3029 = vmatpush.bf16.msrb.mxu2 %v4310_v37 }
 0xf16   : > { %v2815_v58 = vadd.f32 %v2810_v57, %v2634_v27  ;;  %v4314_v27 = vor.u32 %v4616_v33, %v4313_v19  ;;  %v4605_v57 = vld [vmem:[#allocation10 + $0x184] sm:$0xf]  ;;  %v4627_v19 = vld [vmem:[#allocation11 + $0x1b0] sm:$0xff]  ;;  %3208 = vmatpush.bf16.msra.mxu0 %v4634_v40 }
 0xf17   : > { %3188 = vmatpush.bf16.msrb.mxu3 %v4627_v19 }
 0xf18   : > { %2822 = vadd.xlane.f32.xlu0 %v2815_v58  ;;  %3009 = vmatpush.bf16.msrb.mxu1 %v4314_v27 }
 0xf19   : > { %3030 = vmatpush.bf16.msrb.mxu2 %v4302_v42 }
 0xf1c   : > { %3010 = vmatpush.bf16.msrb.mxu1 %v4306_v39  ;;  %v4626_v39 = vld [vmem:[#allocation11 + $0x1a8] sm:$0xff] }
 0xf1d   : > { %3031 = vmatpush.bf16.msrb.mxu2 %v4294_v47  ;;  %3189 = vmatpush.bf16.msrb.mxu3 %v4626_v39 }
 0xf20   : > { %3011 = vmatpush.bf16.msrb.mxu1 %v4298_v44 }
 0xf21   : > { %3190 = vmatpush.bf16.msrb.mxu3 %v4625_v46 }
 0xf24   : > { %3012 = vmatpush.bf16.msrb.mxu1 %v4290_v50 }
 0xf28   : > { %3013 = vmatpush.bf16.msrb.mxu1 %v4282_v10 }
 0xf73   : > { %v2817_v59 = vpop.xlane.xlu0 %2816 }
 0xf74   : > { %v2824_v62 = vmul.f32 %v2817_v59, %v5481_v14  ;;  %v4273_v59 = vld [vmem:[#allocation10 + $0x180] sm:$0xf] }
 0xf76   : > { %v5730_v17 = vsub.f32 %v2812_v5, %v2824_v62  ;;  %v4607_v5 = vld [vmem:[#allocation10 + $0x194] sm:$0xf] }
 0xf78   : > { %v2832_v15 = vmul.f32 %v5730_v17, %v5730_v17 }
 0xf7a   : > { %2836 = vadd.xlane.f32.xlu1 %v2832_v15  ;;  %v4606_v15 = vld [vmem:[#allocation10 + $0x184] sm:$0xf0] }
 0xf7b   : > { %v2819_v63 = vpop.xlane.xlu1 %2818 }
 0xf7c   : > { %v2825_v0 = vmul.f32 %v2819_v63, %v5481_v14 }
 0xf7e   : > { %v5735_v1 = vsub.f32 %v2813_v35, %v2825_v0  ;;  %v4286_v35 = vor.u32 %v4607_v5, %v4283_v51  ;;  %v4274_v0 = vor.u32 %v4606_v15, %v4273_v59 }
 0xf80   : > { %v2833_v4 = vmul.f32 %v5735_v1, %v5735_v1  ;;  %3032 = vmatpush.bf16.msrb.mxu2 %v4286_v35  ;;  %3014 = vmatpush.bf16.msrb.mxu1 %v4274_v0 }
 0xf82   : > { %2838 = vadd.xlane.f32.xlu2 %v2833_v4 }
 0xf83   : > { %v2821_v7 = vpop.xlane.xlu2 %2820 }
 0xf84   : > { %v2826_v9 = vmul.f32 %v2821_v7, %v5481_v14 }
 0xf86   : > { %v5740_v20 = vsub.f32 %v2814_v56, %v2826_v9 }
 0xf88   : > { %v2834_v54 = vmul.f32 %v5740_v20, %v5740_v20 }
 0xf8a   : > { %2840 = vadd.xlane.f32.xlu0 %v2834_v54 }
 0xf8b   : > { %v2823_v11 = vpop.xlane.xlu0 %2822 }
 0xf8c   : > { %v2827_v16 = vmul.f32 %v2823_v11, %v5481_v14 }
 0xf8e   : > { %v5745_v2 = vsub.f32 %v2815_v58, %v2827_v16  ;;  %v4275_v58 = vld [vmem:[#allocation10 + $0x188] sm:$0xf0] }
 0xf8f   : > { %v4278_v62 = vor.u32 %v4605_v57, %v4275_v58 }
 0xf90   : > { %v2835_v55 = vmul.f32 %v5745_v2, %v5745_v2 }
 0xf91   : > { %3033 = vmatpush.bf16.msrb.mxu2 %v4278_v62 }
 0xf92   : > { %2842 = vadd.xlane.f32.xlu1 %v2835_v55 }
 0xf95   : > { %4646 = vmatpush.bf16.msra.mxu2 %v4636_v13 }
 0xf99   : > { %4647 = vmatpush.bf16.msra.mxu2 %v4635_v32 }
 0xf9d   : > { %4648 = vmatpush.bf16.msra.mxu2 %v4634_v40 }
 0xfed   : > { %v2837_v56 = vpop.xlane.xlu1 %2836 }
 0xfee   : > { %v2844_v8 = vmul.f32 %v2837_v56, %v5481_v14 }
 0xff0   : > { %v2848_v63 = vadd.f32 1e-05, %v2844_v8 }
 0xff2   : > { %4848 = vrsqrt.f32 %v2848_v63  ;;  %vm2858_vm10 = vweird.f32 %v2848_v63 }
 0xff5   : > { %v2839_v4 = vpop.xlane.xlu2 %2838 }
 0xff6   : > { %v2845_v7 = vmul.f32 %v2839_v4, %v5481_v14  ;;  %v4624_v4 = vld [vmem:[#allocation11 + $0x198] sm:$0xff] }
 0xff7   : > { %3191 = vmatpush.bf16.msrb.mxu3 %v4624_v4 }
 0xff8   : > { %v4849_v9 = vpop.eup %4848  ;;  %v2849_v54 = vadd.f32 1e-05, %v2845_v7  ;;  %v4623_v7 = vld [vmem:[#allocation11 + $0x190] sm:$0xff] }
 0xff9   : > { %v2853_v11 = vmul.f32 %v4849_v9, %v2848_v63  ;;  %vm2859_vm9 = vweird.f32 %v4849_v9 }
 0xffa   : > { %4850 = vrsqrt.f32 %v2849_v54  ;;  %vm2860_vm11 = vmor %vm2858_vm10, %vm2859_vm9  ;;  %vm2868_vm13 = vweird.f32 %v2849_v54 }
 0xffb   : > { %v2854_v16 = vmul.f32 %v4849_v9, %v2853_v11  ;;  %3192 = vmatpush.bf16.msrb.mxu3 %v4623_v7  ;;  %v4621_v11 = vld [vmem:[#allocation11 + $0x180] sm:$0xff] }
 0xffd   : > { %v2855_v55 = vmul.f32 0.5, %v2854_v16  ;;  %v2841_v60 = vpop.xlane.xlu0 %2840  ;;  %v4630_v16 = vld [vmem:[#allocation11 + $0x1c8] sm:$0xff] }
 0xffe   : > { %v2846_v21 = vmul.f32 %v2841_v60, %v5481_v14 }
 0xfff   : > { %v2856_v22 = vsub.f32 1.5, %v2855_v55  ;;  %v4629_v55 = vld [vmem:[#allocation11 + $0x1c0] sm:$0xff] }
0x1000   : > { %v4851_v6 = vpop.eup %4850  ;;  %v2850_v61 = vadd.f32 1e-05, %v2846_v21  ;;  %v2925_v21 = vperm.slane %v5725_v29, 7 }
0x1001   : > { %v2857_v12 = vmul.f32 %v4849_v9, %v2856_v22  ;;  %v2863_v24 = vmul.f32 %v4851_v6, %v2849_v54  ;;  %vm2869_vm12 = vweird.f32 %v4851_v6  ;;  %v4631_v54 = vld [vmem:[#allocation11 + $0x1d0] sm:$0xff]  ;;  %v2637_v22 = vld [vmem:[#allocation16 + $0x38] sm:$0xff] }
0x1002   : > { %4852 = vrsqrt.f32 %v2850_v61  ;;  %vm2870_vm14 = vmor %vm2868_vm13, %vm2869_vm12  ;;  %vm2878_vm0 = vweird.f32 %v2850_v61 }
0x1003   : > { %v2864_v25 = vmul.f32 %v4851_v6, %v2863_v24  ;;  %v2861_v18 = vsel %vm2860_vm11, %v4849_v9, %v2857_v12  ;;  %v4632_v9 = vld [vmem:[#allocation11 + $0x1d8] sm:$0xff]  ;;  %v2926_v24 = vperm.slane %v2637_v22, 7 }
0x1004   : > { %v2892_v48 = vmul.f32 %v2861_v18, %v5730_v17  ;;  %v2901_v17 = vperm.slane %v5725_v29, 3 }
0x1005   : > { %v2865_v28 = vmul.f32 0.5, %v2864_v25  ;;  %v2843_v23 = vpop.xlane.xlu1 %2842 }
0x1006   : > { %v2847_v31 = vmul.f32 %v2843_v23, %v5481_v14  ;;  %v2897_v43 = vmul.f32 %v2896_v36, %v2892_v48 }
0x1007   : > { %v2866_v33 = vsub.f32 1.5, %v2865_v28 }
0x1008   : > { %v4853_v27 = vpop.eup %4852  ;;  %v2851_v34 = vadd.f32 1e-05, %v2847_v31  ;;  %v5757_v49 = vadd.f32 %v2901_v17, %v2897_v43 }
0x1009   : > { %v2867_v37 = vmul.f32 %v4851_v6, %v2866_v33  ;;  %v2873_v38 = vmul.f32 %v4853_v27, %v2850_v61  ;;  %vm2879_vm15 = vweird.f32 %v4853_v27 }
0x100a   : > { %4854 = vrsqrt.f32 %v2851_v34  ;;  %vm2880_vm1 = vmor %vm2878_vm0, %vm2879_vm15  ;;  %vm2888_vm3 = vweird.f32 %v2851_v34 }
0x100b   : > { %v2871_v41 = vsel %vm2870_vm14, %v4851_v6, %v2867_v37  ;;  %v2874_v3 = vmul.f32 %v4853_v27, %v2873_v38 }
0x100c   : > { %v2893_v42 = vmul.f32 %v2871_v41, %v5735_v1 }
0x100d   : > { %v2875_v44 = vmul.f32 0.5, %v2874_v3 }
0x100e   : > { %v2898_v45 = vmul.f32 %v2896_v36, %v2893_v42 }
0x100f   : > { %v2876_v30 = vsub.f32 1.5, %v2875_v44 }
0x1010   : > { %v4855_v47 = vpop.eup %4854  ;;  %v5759_v50 = vadd.f32 %v2901_v17, %v2898_v45  ;;  %v3090_v45 = vperm.slane %v5725_v29, 4 }
0x1011   : > { %v2877_v5 = vmul.f32 %v4853_v27, %v2876_v30  ;;  %v2883_v51 = vmul.f32 %v4855_v47, %v2851_v34  ;;  %vm2889_vm2 = vweird.f32 %v4855_v47 }
0x1012   : > { %v2906_v1 = vpack.c.bf16 %v5759_v50, %v5757_v49  ;;  %vm2890_vm4 = vmor %vm2888_vm3, %vm2889_vm2 }
0x1013   : > { %v2884_v52 = vmul.f32 %v4855_v47, %v2883_v51  ;;  %v2881_v53 = vsel %vm2880_vm1, %v4853_v27, %v2877_v5 }
0x1014   : > { %3015 = vmatmul.bf16.vlgmr.msrb.gmra.mxu1 %v2906_v1  ;;  %3034 = vmatmul.bf16.vlgmr.msrb.gmra.mxu2 %v2906_v1  ;;  %v2894_v56 = vmul.f32 %v2881_v53, %v5740_v20  ;;  %v4633_v20 = vld [vmem:[#allocation11 + $0x1e0] sm:$0xff] }
0x1015   : > { %v2885_v35 = vmul.f32 0.5, %v2884_v52  ;;  %3209 = vmatpush.bf16.msra.mxu0 %v4633_v20  ;;  %4649 = vmatpush.bf16.msra.mxu2 %v4633_v20 }
0x1016   : > { %v2899_v59 = vmul.f32 %v2896_v36, %v2894_v56 }
0x1017   : > { %v2886_v10 = vsub.f32 1.5, %v2885_v35 }
0x1018   : > { %v5765_v15 = vadd.f32 %v2901_v17, %v2899_v59 }
0x1019   : > { %v2887_v8 = vmul.f32 %v4855_v47, %v2886_v10  ;;  %3210 = vmatpush.bf16.msra.mxu0 %v4632_v9  ;;  %4650 = vmatpush.bf16.msra.mxu2 %v4632_v9 }
0x101b   : > { %v2891_v57 = vsel %vm2890_vm4, %v4855_v47, %v2887_v8 }
0x101c   : > { %v2895_v58 = vmul.f32 %v2891_v57, %v5745_v2  ;;  %v4622_v2 = vld [vmem:[#allocation11 + $0x188] sm:$0xff] }
0x101d   : > { %3193 = vmatpush.bf16.msrb.mxu3 %v4622_v2  ;;  %3211 = vmatpush.bf16.msra.mxu0 %v4631_v54 }
0x101e   : > { %v2900_v62 = vmul.f32 %v2896_v36, %v2895_v58  ;;  %4651 = vmatpush.bf16.msra.mxu2 %v4631_v54 }
0x1020   : > { %v5767_v63 = vadd.f32 %v2901_v17, %v2900_v62 }
0x1021   : > { %3194 = vmatpush.bf16.msrb.mxu3 %v4621_v11  ;;  %3212 = vmatpush.bf16.msra.mxu0 %v4630_v16 }
0x1022   : > { %v2907_v0 = vpack.c.bf16 %v5767_v63, %v5765_v15  ;;  %4652 = vmatpush.bf16.msra.mxu2 %v4630_v16 }
0x1024   : > { %3020 = vmatmul.bf16.gmra.mxu1 %v2907_v0  ;;  %3039 = vmatmul.bf16.gmra.mxu2 %v2907_v0 }
0x1025   : > { %3213 = vmatpush.bf16.msra.mxu0 %v4629_v55 }
0x1026   : > { %4653 = vmatpush.bf16.msra.mxu2 %v4629_v55 }
0x1091   : > { %v3016_v60 = vpop.f32.mrf.mxu1 }
0x1092   : > { %v3017_v61 = vadd.f32 %v3016_v60, %v2925_v21 }
0x1094   : > { %v3045_v26 = vmax.f32 %v3017_v61, 0.0 }
0x1097   : > { %v3035_v6 = vpop.f32.mrf.mxu2 }
0x1098   : > { %v3036_v18 = vadd.f32 %v3035_v6, %v2926_v24 }
0x1099   : > { %v3018_v12 = vpop.f32.mrf.mxu1 }
0x109a   : > { %v3019_v25 = vadd.f32 %v3018_v12, %v2925_v21  ;;  %v3046_v32 = vmax.f32 %v3036_v18, 0.0  ;;  %v4641_v18 = vld [vmem:[#allocation13 + $0x20] sm:$0xff] }
0x109c   : > { %v3047_v13 = vmax.f32 %v3019_v25, 0.0  ;;  %v4643_v25 = vld [vmem:[#allocation13 + $0x30] sm:$0xff] }
0x109e   : > { %v3053_v28 = vpack.c.bf16 %v3047_v13, %v3045_v26  ;;  %v4642_v26 = vld [vmem:[#allocation13 + $0x28] sm:$0xff] }
0x109f   : > { %v3037_v23 = vpop.f32.mrf.mxu2 }
0x10a0   : > { %v3038_v31 = vadd.f32 %v3037_v23, %v2926_v24  ;;  %3195 = vmatmul.bf16.vlgmr.msrb.gmra.mxu3 %v3053_v28  ;;  %v4640_v23 = vld [vmem:[#allocation13 + $0x18] sm:$0xff] }
0x10a1   : > { %v3021_v19 = vpop.f32.mrf.mxu1 }
0x10a2   : > { %v3048_v33 = vmax.f32 %v3038_v31, 0.0  ;;  %v3022_v34 = vadd.f32 %v3021_v19, %v2925_v21  ;;  %v4639_v19 = vld [vmem:[#allocation13 + $0x10] sm:$0xff] }
0x10a4   : > { %v3054_v27 = vpack.c.bf16 %v3048_v33, %v3046_v32  ;;  %v3049_v38 = vmax.f32 %v3022_v34, 0.0  ;;  %v4638_v32 = vld [vmem:[#allocation13 + $0x8] sm:$0xff] }
0x10a6   : > { %3214 = vmatmul.bf16.vlgmr.msra.gmra.mxu0 %v3054_v27 }
0x10a7   : > { %v3040_v48 = vpop.f32.mrf.mxu2 }
0x10a8   : > { %v3041_v40 = vadd.f32 %v3040_v48, %v2926_v24 }
0x10a9   : > { %v3023_v36 = vpop.f32.mrf.mxu1 }
0x10aa   : > { %v3024_v37 = vadd.f32 %v3023_v36, %v2925_v21  ;;  %v3050_v43 = vmax.f32 %v3041_v40, 0.0  ;;  %v4637_v36 = vld [vmem:[#allocation13] sm:$0xff] }
0x10ac   : > { %v3051_v39 = vmax.f32 %v3024_v37, 0.0 }
0x10ae   : > { %v3055_v41 = vpack.c.bf16 %v3051_v39, %v3049_v38 }
0x10af   : > { %v3042_v3 = vpop.f32.mrf.mxu2 }
0x10b0   : > { %v3043_v42 = vadd.f32 %v3042_v3, %v2926_v24  ;;  %3200 = vmatmul.bf16.gmra.mxu3 %v3055_v41  ;;  %v4644_v24 = vld [vmem:[#allocation13 + $0x38] sm:$0xff] }
0x10b1   : > { %4654 = vmatpush.bf16.msra.mxu3 %v4644_v24  ;;  %3386 = vmatpush.bf16.msra.mxu1 %v4644_v24 }
0x10b2   : > { %v3052_v17 = vmax.f32 %v3043_v42, 0.0 }
0x10b4   : > { %v3056_v44 = vpack.c.bf16 %v3052_v17, %v3050_v43 }
0x10b5   : > { %4655 = vmatpush.bf16.msra.mxu3 %v4643_v25  ;;  %3387 = vmatpush.bf16.msra.mxu1 %v4643_v25 }
0x10b6   : > { %3219 = vmatmul.bf16.vlgmr.msra.gmra.mxu2 %v3056_v44 }
0x10b9   : > { %4656 = vmatpush.bf16.msra.mxu3 %v4642_v26  ;;  %3388 = vmatpush.bf16.msra.mxu1 %v4642_v26 }
0x10bd   : > { %4657 = vmatpush.bf16.msra.mxu3 %v4641_v18  ;;  %3389 = vmatpush.bf16.msra.mxu1 %v4641_v18 }
0x10c1   : > { %4658 = vmatpush.bf16.msra.mxu3 %v4640_v23  ;;  %3390 = vmatpush.bf16.msra.mxu1 %v4640_v23 }
0x10c5   : > { %4659 = vmatpush.bf16.msra.mxu3 %v4639_v19  ;;  %3391 = vmatpush.bf16.msra.mxu1 %v4639_v19 }
0x10c9   : > { %4660 = vmatpush.bf16.msra.mxu3 %v4638_v32  ;;  %3392 = vmatpush.bf16.msra.mxu1 %v4638_v32 }
0x10cd   : > { %4661 = vmatpush.bf16.msra.mxu3 %v4637_v36  ;;  %3393 = vmatpush.bf16.msra.mxu1 %v4637_v36 }
0x1123   : > { %v3196_v46 = vpop.f32.mrf.mxu3  ;;  %v3215_v47 = vpop.f32.mrf.mxu0 }
0x1124   : > { %v3197_v30 = vadd.f32 %v3196_v46, %v3090_v45 }
0x1126   : > { %v3216_v5 = vadd.f32 %v3215_v47, %v3197_v30 }
0x1128   : > { %v3225_v51 = vadd.f32 %v3216_v5, %v5757_v49 }
0x112a   : > { %3229 = vadd.xlane.f32.xlu1 %v3225_v51 }
0x112b   : > { %v3198_v1 = vpop.f32.mrf.mxu3  ;;  %v3217_v58 = vpop.f32.mrf.mxu0 }
0x112c   : > { %v3199_v56 = vadd.f32 %v3198_v1, %v3090_v45 }
0x112e   : > { %v3218_v59 = vadd.f32 %v3217_v58, %v3199_v56 }
0x1130   : > { %v3226_v49 = vadd.f32 %v3218_v59, %v5759_v50 }
0x1133   : > { %v3201_v52 = vpop.f32.mrf.mxu3 }
0x1134   : > { %v3202_v35 = vadd.f32 %v3201_v52, %v3090_v45 }
0x1139   : > { %v3220_v53 = vpop.f32.mrf.mxu2 }
0x113a   : > { %v3221_v10 = vadd.f32 %v3220_v53, %v3202_v35 }
0x113b   : > { %v3203_v57 = vpop.f32.mrf.mxu3 }
0x113c   : > { %v3227_v8 = vadd.f32 %v3221_v10, %v5765_v15  ;;  %v3204_v62 = vadd.f32 %v3203_v57, %v3090_v45 }
0x113e   : > { %3233 = vadd.xlane.f32.xlu2 %v3227_v8 }
0x1141   : > { %v3222_v0 = vpop.f32.mrf.mxu2 }
0x1142   : > { %v3223_v4 = vadd.f32 %v3222_v0, %v3204_v62 }
0x1144   : > { %v3228_v20 = vadd.f32 %v3223_v4, %v5767_v63 }
0x1146   : > { %3235 = vadd.xlane.f32.xlu0 %v3228_v20  ;;  %3231 = vadd.xlane.f32.xlu2 %v3226_v49 }
0x119d   : > { %v3230_v7 = vpop.xlane.xlu1 %3229 }
0x119e   : > { %v3237_v9 = vmul.f32 %v3230_v7, %v5481_v14 }
0x11a0   : > { %v5778_v2 = vsub.f32 %v3225_v51, %v3237_v9 }
0x11a2   : > { %v3245_v15 = vmul.f32 %v5778_v2, %v5778_v2 }
0x11a4   : > { %3249 = vadd.xlane.f32.xlu2 %v3245_v15 }
0x11b1   : > { %v3234_v54 = vpop.xlane.xlu2 %3233 }
0x11b2   : > { %v3239_v11 = vmul.f32 %v3234_v54, %v5481_v14 }
0x11b4   : > { %v5783_v16 = vsub.f32 %v3227_v8, %v3239_v11 }
0x11b6   : > { %v3247_v63 = vmul.f32 %v5783_v16, %v5783_v16 }
0x11b8   : > { %3253 = vadd.xlane.f32.xlu0 %v3247_v63 }
0x11b9   : > { %v3236_v50 = vpop.xlane.xlu0 %3235  ;;  %v3232_v55 = vpop.xlane.xlu2 %3231 }
0x11ba   : > { %v3240_v60 = vmul.f32 %v3236_v50, %v5481_v14  ;;  %v3238_v21 = vmul.f32 %v3232_v55, %v5481_v14  ;;  %v3314_v50 = vperm.slane %v5725_v29, 6 }
0x11bc   : > { %v5789_v22 = vsub.f32 %v3228_v20, %v3240_v60  ;;  %v5791_v6 = vsub.f32 %v3226_v49, %v3238_v21  ;;  %v3309_v20 = vperm.slane %v5725_v29, 5 }
0x11be   : > { %v3248_v61 = vmul.f32 %v5789_v22, %v5789_v22  ;;  %v3246_v12 = vmul.f32 %v5791_v6, %v5791_v6 }
0x11c0   : > { %3255 = vadd.xlane.f32.xlu1 %v3248_v61  ;;  %3251 = vadd.xlane.f32.xlu0 %v3246_v12 }
0x1217   : > { %v3250_v13 = vpop.xlane.xlu2 %3249 }
0x1218   : > { %v3257_v28 = vmul.f32 %v3250_v13, %v5481_v14  ;;  %v4864_v13 = vld [vmem:[#allocation14] sm:$0xff] }
0x121a   : > { %v3261_v31 = vadd.f32 1e-05, %v3257_v28 }
0x121c   : > { %4856 = vrsqrt.f32 %v3261_v31  ;;  %vm3271_vm8 = vweird.f32 %v3261_v31 }
0x1222   : > { %v4857_v48 = vpop.eup %4856 }
0x1223   : > { %v3266_v37 = vmul.f32 %v4857_v48, %v3261_v31  ;;  %vm3272_vm6 = vweird.f32 %v4857_v48 }
0x1224   : > { %vm3273_vm10 = vmor %vm3271_vm8, %vm3272_vm6 }
0x1225   : > { %v3267_v40 = vmul.f32 %v4857_v48, %v3266_v37 }
0x1227   : > { %v3268_v45 = vmul.f32 0.5, %v3267_v40 }
0x1229   : > { %v3269_v47 = vsub.f32 1.5, %v3268_v45 }
0x122b   : > { %v3254_v33 = vpop.xlane.xlu0 %3253  ;;  %v3270_v53 = vmul.f32 %v4857_v48, %v3269_v47 }
0x122c   : > { %v3259_v27 = vmul.f32 %v3254_v33, %v5481_v14 }
0x122d   : > { %v3274_v58 = vsel %vm3273_vm10, %v4857_v48, %v3270_v53 }
0x122e   : > { %v3263_v34 = vadd.f32 1e-05, %v3259_v27  ;;  %v3305_v49 = vmul.f32 %v3274_v58, %v5778_v2 }
0x1230   : > { %4858 = vrsqrt.f32 %v3263_v34  ;;  %vm3291_vm7 = vweird.f32 %v3263_v34 }
0x1233   : > { %v3256_v38 = vpop.xlane.xlu1 %3255  ;;  %v3252_v39 = vpop.xlane.xlu0 %3251 }
0x1234   : > { %v3260_v41 = vmul.f32 %v3256_v38, %v5481_v14  ;;  %v3258_v3 = vmul.f32 %v3252_v39, %v5481_v14 }
0x1236   : > { %v4859_v42 = vpop.eup %4858  ;;  %v3264_v43 = vadd.f32 1e-05, %v3260_v41  ;;  %v3262_v17 = vadd.f32 1e-05, %v3258_v3 }
0x1237   : > { %v3286_v44 = vmul.f32 %v4859_v42, %v3263_v34  ;;  %vm3292_vm5 = vweird.f32 %v4859_v42 }
0x1238   : > { %4860 = vrsqrt.f32 %v3264_v43  ;;  %vm3293_vm9 = vmor %vm3291_vm7, %vm3292_vm5  ;;  %vm3301_vm13 = vweird.f32 %v3264_v43  ;;  %vm3281_vm15 = vweird.f32 %v3262_v17 }
0x1239   : > { %v3287_v46 = vmul.f32 %v4859_v42, %v3286_v44  ;;  %4862 = vrsqrt.f32 %v3262_v17 }
0x123b   : > { %v3288_v30 = vmul.f32 0.5, %v3287_v46 }
0x123d   : > { %v3289_v5 = vsub.f32 1.5, %v3288_v30 }
0x123e   : > { %v4861_v51 = vpop.eup %4860 }
0x123f   : > { %v4863_v1 = vpop.eup %4862  ;;  %v3290_v52 = vmul.f32 %v4859_v42, %v3289_v5  ;;  %v3296_v35 = vmul.f32 %v4861_v51, %v3264_v43  ;;  %vm3302_vm11 = vweird.f32 %v4861_v51 }
0x1240   : > { %v3276_v10 = vmul.f32 %v4863_v1, %v3262_v17  ;;  %vm3282_vm12 = vweird.f32 %v4863_v1  ;;  %vm3303_vm14 = vmor %vm3301_vm13, %vm3302_vm11 }
0x1241   : > { %v3297_v14 = vmul.f32 %v4861_v51, %v3296_v35  ;;  %v3294_v8 = vsel %vm3293_vm9, %v4859_v42, %v3290_v52  ;;  %vm3283_vm0 = vmor %vm3281_vm15, %vm3282_vm12 }
0x1242   : > { %v3277_v56 = vmul.f32 %v4863_v1, %v3276_v10  ;;  %v3307_v0 = vmul.f32 %v3294_v8, %v5783_v16  ;;  %v3310_v16 = vmul.f32 %v3309_v20, %v3305_v49 }
0x1243   : > { %v3298_v57 = vmul.f32 0.5, %v3297_v14 }
0x1244   : > { %v3278_v59 = vmul.f32 0.5, %v3277_v56  ;;  %v3312_v54 = vmul.f32 %v3309_v20, %v3307_v0  ;;  %v3315_v12 = vadd.f32 %v3314_v50, %v3310_v16 }
0x1245   : > { %v3299_v62 = vsub.f32 1.5, %v3298_v57 }
0x1246   : > { %v3279_v4 = vsub.f32 1.5, %v3278_v59  ;;  %v3317_v21 = vadd.f32 %v3314_v50, %v3312_v54 }
0x1247   : > { %v3300_v7 = vmul.f32 %v4861_v51, %v3299_v62 }
0x1248   : > { %v3280_v9 = vmul.f32 %v4863_v1, %v3279_v4 }
0x1249   : > { %v3304_v15 = vsel %vm3303_vm14, %v4861_v51, %v3300_v7 }
0x124a   : > { %v3308_v11 = vmul.f32 %v3304_v15, %v5789_v22  ;;  %v3284_v63 = vsel %vm3283_vm0, %v4863_v1, %v3280_v9  ;;  %v3337_v22 = vperm.slane %v4864_v13, 2 }
0x124b   : > { %v3306_v55 = vmul.f32 %v3284_v63, %v5791_v6 }
0x124c   : > { %v3313_v60 = vmul.f32 %v3309_v20, %v3308_v11 }
0x124d   : > { %v3311_v2 = vmul.f32 %v3309_v20, %v3306_v55 }
0x124e   : > { %v3318_v61 = vadd.f32 %v3314_v50, %v3313_v60 }
0x124f   : > { %v3316_v24 = vadd.f32 %v3314_v50, %v3311_v2 }
0x1250   : > { %v3320_v25 = vpack.c.bf16 %v3318_v61, %v3317_v21 }
0x1251   : > { %v3319_v26 = vpack.c.bf16 %v3316_v24, %v3315_v12 }
0x1252   : > { %3399 = vmatmul.bf16.vlgmr.msra.gmra.mxu3 %v3320_v25 }
0x1253   : > { %3394 = vmatmul.bf16.vlgmr.msra.gmra.mxu1 %v3319_v26 }
0x12d0   : > { %v3395_v18 = vpop.f32.mrf.mxu1 }
0x12d1   : > { %v3396_v28 = vadd.f32 %v3395_v18, %v3337_v22 }
0x12d3   : > { %3405 = vst [vmem:[%s482_s2] sm:$0xff] %v3396_v28 }
0x12d5   : > { %v3400_v29 = vpop.f32.mrf.mxu3 }
0x12d6   : > { %v3401_v6 = vadd.f32 %v3400_v29, %v3337_v22 }
0x12d8   : > { %3407 = vst [vmem:[%s482_s2 + $0x10] sm:$0xff] %v3401_v6  ;;  %v3397_v23 = vpop.f32.mrf.mxu1 }
0x12d9   : > { %v3398_v31 = vadd.f32 %v3397_v23, %v3337_v22 }
0x12db   : > { %3406 = vst [vmem:[%s482_s2 + $0x8] sm:$0xff] %v3398_v31 }
0x12dd   : > { %v3402_v19 = vpop.f32.mrf.mxu3 }
0x12de   : > { %v3403_v32 = vadd.f32 %v3402_v19, %v3337_v22 }
0x12e0   : > { %3408 = vst [vmem:[%s482_s2 + $0x18] sm:$0xff] %v3403_v32 }
0x12e1   : > { %5162 = shalt.err (!%p5159_p9)
}
0x12e2   : > { %s5234_s29 = smov 128   ;;  %s5235_s18 = smov 8  }
0x12e3   : > { %4696 = dma.vmem_to_hbm [thread:$0]  (%p5411_p4), %s3423_s25, 512, %s3425_s26, %s3410_s24, %s5234_s29, %s5234_s29, %s5235_s18  }
0x12e4 PF: > { %s3439_s2 = sand.u32 1, %s5205_s30   ;;  %p5871_p10 = scmp.ge.s32.totalorder %s5217_s12, 2 }
0x12e5   : > { %s3440_s17 = scalar_lea.sflag [#allocation4], %s3439_s2 }
0x12e6   : > { %p4728_p13 = pnand %p5871_p10, %p5415_p6 }
0x12e8   : > { %p4729_p11 = pneg %p4728_p13 }
0x12ea   : > { %5200 = dma.done.wait (%p4729_p11), %s3440_s17, 512  }
0x12eb   : > { %5202 = vsyncadd (%p4729_p11), %s3440_s17, 4294966784  ;;  %p26_p0 = scmp.ge.s32.totalorder %s5385_s1, 4   ;;  %s5872_s30 = smov %s5209_s10 }
0x12ec   : > { %s5873_s10 = smov %s5213_s11  ;;  %s5874_s11 = smov %s5396_s13 }
0x12ed   : > { %s5875_s12 = smov %s5385_s1  ;;  %28 = sbr.rel (!%p26_p0) target bundleno = 14 (0xe), region = 148 }
0x12f2   :  { %3446 = vsyncpa [#allocation3], 1 }
0x12f3   :  { %3448 = vsyncpa [#allocation3 + $0x1], 1 }
0x12f4   :  { %3449 = vsyncpa [#allocation6], 1 }
0x12f5   :  { %3450 = vsyncpa [#allocation9], 1 }
0x12f6   :  { %3451 = vsyncpa [#allocation12], 1 }
0x12f7   :  { %3452 = vsyncpa [#allocation15], 1 }
0x12f8   :  { %3453 = vsyncpa [#allocation4], 1 }
0x12f9   :  { %3455 = vsyncpa [#allocation4 + $0x1], 1 }

</bundles_post_ra>
